<compile_context>
chip_gen: v7x
topology: tpu7x:2x2x1
jax: 0.10.0
libtpu: 0.0.40
codegen_flags: <defaults>
</compile_context>

<pallas_src>
import numpy as np
import jax
import jax.numpy as jnp
from jax.experimental import pallas as pl
from jax.experimental.pallas import tpu as pltpu


def _round_up(x, m):
    return ((x + m - 1) // m) * m


# -----------------------------------------------------------------------------
# Fused Pallas kernel: gated-GNN steps + alias gather + attention readout
# -----------------------------------------------------------------------------
def make_srgnn_kernel(BB, N, L, D, step):
    M = BB * N

    def kernel(a_in_ref, a_out_ref, emb_ref, alias_ref, last_ref, mask_ref,
               w_ein_ref, b_ein_ref, w_eout_ref, b_eout_ref,
               b_iah_ref, b_oah_ref,
               wih_in_ref, wih_out_ref, b_ih_ref,
               whh_ref, b_hh_ref,
               w1_ref, b1_ref, w2_ref, b2_ref, w3_ref, b3_ref,
               wta_ref, wth_ref, bt_ref,
               sh_out_ref, so_out_ref):
        # ---- graph tiles & weights: load once, hoisted out of the step loop --
        A_in = a_in_ref[...]                      # (BB, N, N)
        A_out = a_out_ref[...]                    # (BB, N, N)
        w_ein, b_ein = w_ein_ref[...], b_ein_ref[...]
        w_eout, b_eout = w_eout_ref[...], b_eout_ref[...]
        b_iah, b_oah = b_iah_ref[...], b_oah_ref[...]
        wih_in = [wih_in_ref[g] for g in range(3)]    # 3 x (D, D)
        wih_out = [wih_out_ref[g] for g in range(3)]  # 3 x (D, D)
        b_ih = [b_ih_ref[g] for g in range(3)]        # 3 x (1, D)
        whh = [whh_ref[g] for g in range(3)]          # 3 x (D, D)
        b_hh = [b_hh_ref[g] for g in range(3)]        # 3 x (1, D)

        # fold batch into the matmul M dimension for all shared-weight matmuls
        # (exact relayout; N is the sublane dim so this is cheap when N % 8 == 0)
        h2 = emb_ref[...].reshape(M, D)               # (BB*N, D)

        # ---- gated GNN, `step` iterations (unrolled) ----
        for _ in range(step):
            ein = jnp.dot(h2, w_ein, preferred_element_type=jnp.float32) + b_ein
            eout = jnp.dot(h2, w_eout, preferred_element_type=jnp.float32) + b_eout
            # per-sample graph contractions (batched matmul on the MXU)
            input_in = jnp.einsum(
                'bnm,bmd->bnd', A_in, ein.reshape(BB, N, D),
                preferred_element_type=jnp.float32).reshape(M, D) + b_iah
            input_out = jnp.einsum(
                'bnm,bmd->bnd', A_out, eout.reshape(BB, N, D),
                preferred_element_type=jnp.float32).reshape(M, D) + b_oah

            # per-gate weight blocks: no lane-misaligned concat / gate slicing
            def gate(g):
                gi = (jnp.dot(input_in, wih_in[g], preferred_element_type=jnp.float32)
                      + jnp.dot(input_out, wih_out[g], preferred_element_type=jnp.float32)
                      + b_ih[g])
                gh = jnp.dot(h2, whh[g], preferred_element_type=jnp.float32) + b_hh[g]
                return gi, gh

            gi_r, gh_r = gate(0)
            gi_i, gh_i = gate(1)
            gi_n, gh_n = gate(2)
            resetgate = jax.nn.sigmoid(gi_r + gh_r)
            inputgate = jax.nn.sigmoid(gi_i + gh_i)
            newgate = jnp.tanh(gi_n + resetgate * gh_n)
            h2 = newgate + inputgate * (h2 - newgate)

        h3 = h2.reshape(BB, N, D)

        # ---- gather node states back to sequence positions (one-hot matmul,
        #      exact: weights are 0/1) ----
        alias = alias_ref[...]                                            # (BB, L)
        node_iota = jax.lax.broadcasted_iota(jnp.int32, (BB, L, N), 2)
        sel = (alias[:, :, None] == node_iota).astype(jnp.float32)        # (BB, L, N)
        seq_hidden = jnp.einsum('bln,bnd->bld', sel, h3,
                                preferred_element_type=jnp.float32)       # (BB, L, D)

        # ---- last valid item per sequence (one-hot select, exact) ----
        last = last_ref[...]                                              # (BB, 1)
        pos_iota = jax.lax.broadcasted_iota(jnp.int32, (BB, L), 1)
        sel_last = (last == pos_iota).astype(jnp.float32)                 # (BB, L)
        ht = jnp.sum(sel_last[:, :, None] * seq_hidden, axis=1)           # (BB, D)

        # ---- attention readout + output projection ----
        sh2 = seq_hidden.reshape(BB * L, D)
        q1 = jnp.dot(ht, w1_ref[...], preferred_element_type=jnp.float32) + b1_ref[...]
        q2 = (jnp.dot(sh2, w2_ref[...], preferred_element_type=jnp.float32)
              + b2_ref[...]).reshape(BB, L, D)
        sig = jax.nn.sigmoid(q1[:, None, :] + q2)                         # (BB, L, D)
        alp = (jnp.dot(sig.reshape(BB * L, D), w3_ref[...],
                       preferred_element_type=jnp.float32)
               + b3_ref[...]).reshape(BB, L, D)
        maskf = mask_ref[...]                                             # (BB, L)
        a_vec = jnp.sum(alp * seq_hidden * maskf[:, :, None], axis=1)     # (BB, D)
        # linear_transform([a, ht]) as two half-matmuls (no (1,2D) concat)
        seq_out = (jnp.dot(a_vec, wta_ref[...], preferred_element_type=jnp.float32)
                   + jnp.dot(ht, wth_ref[...], preferred_element_type=jnp.float32)
                   + bt_ref[...])                                         # (BB, D)

        sh_out_ref[...] = seq_hidden
        so_out_ref[...] = seq_out

    return kernel


def srgnn_pallas_call(A_in, A_out, emb, alias, last, maskf, p, step, BB):
    B_pad, N, D = emb.shape
    L = alias.shape[1]
    n_blocks = B_pad // BB

    # --- host-side repack of weights into kernel-friendly blocks (free glue) --
    wih_T = p["w_ih"].T                                # (2D, 3D)
    whh_T = p["w_hh"].T                                # (D, 3D)
    wih_in = jnp.stack([wih_T[:D, g * D:(g + 1) * D] for g in range(3)])   # (3,D,D)
    wih_out = jnp.stack([wih_T[D:, g * D:(g + 1) * D] for g in range(3)])  # (3,D,D)
    whh3 = jnp.stack([whh_T[:, g * D:(g + 1) * D] for g in range(3)])      # (3,D,D)
    b_ih3 = jnp.stack([p["b_ih"][g * D:(g + 1) * D][None, :] for g in range(3)])
    b_hh3 = jnp.stack([p["b_hh"][g * D:(g + 1) * D][None, :] for g in range(3)])
    lint_T = p["lint_w"].T                             # (2D, D)

    def rep(shape):   # replicated (weights, no batch tiling; stay resident)
        n = len(shape)
        return pl.BlockSpec(shape, lambda b, _n=n: (0,) * _n)

    in_specs = [
        pl.BlockSpec((BB, N, N), lambda b: (b, 0, 0)),   # A_in
        pl.BlockSpec((BB, N, N), lambda b: (b, 0, 0)),   # A_out
        pl.BlockSpec((BB, N, D), lambda b: (b, 0, 0)),   # embedded node states
        pl.BlockSpec((BB, L), lambda b: (b, 0)),         # alias indices (int32)
        pl.BlockSpec((BB, 1), lambda b: (b, 0)),         # last position (int32)
        pl.BlockSpec((BB, L), lambda b: (b, 0)),         # mask (float32)
        rep((D, D)), rep((1, D)),                        # edge_in  W^T, b
        rep((D, D)), rep((1, D)),                        # edge_out W^T, b
        rep((1, D)), rep((1, D)),                        # b_iah, b_oah
        rep((3, D, D)), rep((3, D, D)), rep((3, 1, D)),  # w_ih blocks, b_ih
        rep((3, D, D)), rep((3, 1, D)),                  # w_hh blocks, b_hh
        rep((D, D)), rep((1, D)),                        # linear1
        rep((D, D)), rep((1, D)),                        # linear2
        rep((D, D)), rep((1, D)),                        # linear3
        rep((D, D)), rep((D, D)), rep((1, D)),           # linear_transform halves
    ]
    out_specs = (
        pl.BlockSpec((BB, L, D), lambda b: (b, 0, 0)),   # seq_hidden
        pl.BlockSpec((BB, D), lambda b: (b, 0)),         # seq_output
    )
    out_shape = (
        jax.ShapeDtypeStruct((B_pad, L, D), jnp.float32),
        jax.ShapeDtypeStruct((B_pad, D), jnp.float32),
    )
    # TODO(synk): for realistic N (~70) / D (~100) re-derive BB against the
    # per-generation VMEM budget (v7x: 64 MiB) and set vmem_limit_bytes; the
    # default scoped limit is ample for the block sizes used here.
    return pl.pallas_call(
        make_srgnn_kernel(BB, N, L, D, step),
        out_shape=out_shape,
        grid=(n_blocks,),
        in_specs=in_specs,
        out_specs=out_specs,
        compiler_params=pltpu.CompilerParams(
            dimension_semantics=("parallel",)),   # batch blocks are independent
    )(
        A_in, A_out, emb, alias, last, maskf,
        p["edge_in_w"].T, p["edge_in_b"][None, :],
        p["edge_out_w"].T, p["edge_out_b"][None, :],
        p["b_iah"][None, :], p["b_oah"][None, :],
        wih_in, wih_out, b_ih3,
        whh3, b_hh3,
        p["lin1_w"].T, p["lin1_b"][None, :],
        p["lin2_w"].T, p["lin2_b"][None, :],
        p["lin3_w"].T, p["lin3_b"][None, :],
        lint_T[:D, :], lint_T[D:, :], p["lint_b"][None, :],
    )


# -----------------------------------------------------------------------------
# Host-side graph construction (port of SRGNN._get_slice, pure numpy).
# alias rows are padded to length L for robustness (ragged-row fix).
# -----------------------------------------------------------------------------
def get_slice(seqs_np, n_items):
    mask = (seqs_np > 0)
    items, A, alias_inputs = [], [], []
    max_n_nodes = seqs_np.shape[1]
    for seq in seqs_np:
        node = np.unique(seq)
        node = np.clip(node, 0, n_items - 1)
        items.append(node.tolist() + (max_n_nodes - len(node)) * [0])
        u_A = np.zeros((max_n_nodes, max_n_nodes))
        for i in np.arange(len(seq) - 1):
            if seq[i + 1] == 0:
                break
            u = np.where(node == seq[i])[0][0]
            v = np.where(node == seq[i + 1])[0][0]
            u_A[u][v] = 1
        u_sum_in = np.sum(u_A, 0)
        u_sum_in[np.where(u_sum_in == 0)] = 1
        u_A_in = np.divide(u_A, u_sum_in)
        u_sum_out = np.sum(u_A, 1)
        u_sum_out[np.where(u_sum_out == 0)] = 1
        u_A_out = np.divide(u_A.transpose(), u_sum_out)
        u_A = np.concatenate([u_A_in, u_A_out]).transpose()
        A.append(u_A)
        row = [int(np.where(node == i)[0][0]) for i in seq if i in node]
        row = row + [0] * (max_n_nodes - len(row))
        alias_inputs.append(row)
    alias_inputs = np.asarray(alias_inputs, dtype=np.int32)
    A = np.asarray(A, dtype=np.float32)
    items = np.asarray(items, dtype=np.int32)
    return alias_inputs, A, items, mask


# -----------------------------------------------------------------------------
# Parameter init (uniform(-stdv, stdv), stdv = 1/sqrt(D); PyTorch param shapes)
# -----------------------------------------------------------------------------
def init_params(key, n_items, D):
    stdv = 1.0 / np.sqrt(D)
    shapes = {
        "embedding": (n_items, D),
        # GNN
        "w_ih": (3 * D, 2 * D), "w_hh": (3 * D, D),
        "b_ih": (3 * D,), "b_hh": (3 * D,),
        "b_iah": (D,), "b_oah": (D,),
        "edge_in_w": (D, D), "edge_in_b": (D,),
        "edge_out_w": (D, D), "edge_out_b": (D,),
        "edge_f_w": (D, D), "edge_f_b": (D,),   # unused in forward (parity)
        # readout
        "lin1_w": (D, D), "lin1_b": (D,),
        "lin2_w": (D, D), "lin2_b": (D,),
        "lin3_w": (D, D), "lin3_b": (D,),
        "lint_w": (D, 2 * D), "lint_b": (D,),
    }
    keys = jax.random.split(key, len(shapes))
    params = {}
    for k, (name, shape) in zip(keys, shapes.items()):
        params[name] = jax.random.uniform(k, shape, jnp.float32, -stdv, stdv)
    return params


# -----------------------------------------------------------------------------
# Full SRGNN forward (host glue + one fused Pallas kernel)
# -----------------------------------------------------------------------------
def srgnn_forward(params, seqs_np, lengths_np, n_items, D, n_layers, BB=None):
    B, L = seqs_np.shape
    N = L
    alias_np, A_np, items_np, mask_np = get_slice(seqs_np, n_items)

    if BB is None:
        # target BB*N >= 128 (fold batch into MXU M dim), multiple of 8,
        # but never pad the batch far beyond what's actually present.
        bb_target = _round_up(max(8, -(-128 // N)), 8)
        BB = min(bb_target, _round_up(B, 8))
    B_pad = _round_up(B, BB)

    def pad_b(x):
        if x.shape[0] == B_pad:
            return x
        pad_width = [(0, B_pad - x.shape[0])] + [(0, 0)] * (x.ndim - 1)
        return np.pad(x, pad_width)

    last_np = np.clip(lengths_np.astype(np.int32) - 1, 0, L - 1)[:, None]

    A = jnp.asarray(pad_b(A_np), jnp.float32)                # (B_pad, N, 2N)
    A_in, A_out = A[:, :, :N], A[:, :, N:]                   # host-side split
    items = jnp.asarray(pad_b(items_np), jnp.int32)          # (B_pad, N)
    alias = jnp.asarray(pad_b(alias_np), jnp.int32)          # (B_pad, L)
    maskf = jnp.asarray(pad_b(mask_np.astype(np.float32)), jnp.float32)
    last = jnp.asarray(pad_b(last_np), jnp.int32)            # (B_pad, 1)

    # embedding lookup (glue)
    emb = jnp.take(params["embedding"], items, axis=0)       # (B_pad, N, D)

    seq_hidden, seq_output = srgnn_pallas_call(
        A_in, A_out, emb, alias, last, maskf, params, n_layers, BB)
    return seq_hidden[:B], seq_output[:B]


# -----------------------------------------------------------------------------
# Plain-JAX (non-Pallas) reference for numerical validation
# -----------------------------------------------------------------------------
def srgnn_reference(params, A, items, alias, last, maskf, n_layers):
    hp = jax.lax.Precision.HIGHEST
    mm = lambda x, w: jnp.matmul(x, w, precision=hp)
    N = items.shape[1]
    hidden = jnp.take(params["embedding"], items, axis=0)
    A_in, A_out = A[:, :, :N], A[:, :, N:]
    for _ in range(n_layers):
        ein = mm(hidden, params["edge_in_w"].T) + params["edge_in_b"]
        eout = mm(hidden, params["edge_out_w"].T) + params["edge_out_b"]
        input_in = jnp.einsum('bnm,bmd->bnd', A_in, ein, precision=hp) + params["b_iah"]
        input_out = jnp.einsum('bnm,bmd->bnd', A_out, eout, precision=hp) + params["b_oah"]
        inputs = jnp.concatenate([input_in, input_out], axis=2)
        gi = mm(inputs, params["w_ih"].T) + params["b_ih"]
        gh = mm(hidden, params["w_hh"].T) + params["b_hh"]
        i_r, i_i, i_n = jnp.split(gi, 3, axis=2)
        h_r, h_i, h_n = jnp.split(gh, 3, axis=2)
        resetgate = jax.nn.sigmoid(i_r + h_r)
        inputgate = jax.nn.sigmoid(i_i + h_i)
        newgate = jnp.tanh(i_n + resetgate * h_n)
        hidden = newgate + inputgate * (hidden - newgate)
    seq_hidden = jnp.take_along_axis(hidden, alias[:, :, None], axis=1)
    ht = jnp.take_along_axis(seq_hidden, last[:, :, None], axis=1)[:, 0, :]
    q1 = mm(ht, params["lin1_w"].T) + params["lin1_b"]
    q2 = mm(seq_hidden, params["lin2_w"].T) + params["lin2_b"]
    alp = mm(jax.nn.sigmoid(q1[:, None, :] + q2), params["lin3_w"].T) + params["lin3_b"]
    a = jnp.sum(alp * seq_hidden * maskf[:, :, None], axis=1)
    seq_out = mm(jnp.concatenate([a, ht], axis=1), params["lint_w"].T) + params["lint_b"]
    return seq_hidden, seq_out


if __name__ == "__main__":
    B, L, D = 2, 8, 32
    n_items = 20
    n_layers = 2      # GNN steps

    key = jax.random.PRNGKey(0)
    k_seq, k_par = jax.random.split(key)

    # deterministic small sessions (padded with 0)
    lengths_np = np.array([8, 5], dtype=np.int64)
    seq_vals = np.asarray(jax.random.randint(k_seq, (B, L), 1, n_items))
    seqs_np = np.zeros((B, L), dtype=np.int64)
    for b in range(B):
        seqs_np[b, : lengths_np[b]] = seq_vals[b, : lengths_np[b]]

    params = init_params(k_par, n_items, D)

    seq_hidden, seq_output = srgnn_forward(
        params, seqs_np, lengths_np, n_items, D, n_layers
    )
    jax.block_until_ready((seq_hidden, seq_output))
    assert seq_hidden.shape == (B, L, D)
    assert seq_output.shape == (B, D)

    # numerical check against plain-JAX reference
    alias_np, A_np, items_np, mask_np = get_slice(seqs_np, n_items)
    last_np = np.clip(lengths_np.astype(np.int32) - 1, 0, L - 1)[:, None]
    ref_sh, ref_so = srgnn_reference(
        params,
        jnp.asarray(A_np, jnp.float32),
        jnp.asarray(items_np, jnp.int32),
        jnp.asarray(alias_np, jnp.int32),
        jnp.asarray(last_np, jnp.int32),
        jnp.asarray(mask_np.astype(np.float32)),
        n_layers,
    )
    np.testing.assert_allclose(np.asarray(seq_hidden), np.asarray(ref_sh),
                               rtol=5e-3, atol=1e-3)
    np.testing.assert_allclose(np.asarray(seq_output), np.asarray(ref_so),
                               rtol=5e-3, atol=1e-3)
    print("KERNEL_OK")
</pallas_src>

<mosaic_0001>
module attributes {stable_mosaic.version = 11 : i64} {
  func.func @kernel(%arg0: i32, %arg1: memref<8x8x8xf32, #tpu.memory_space<vmem>>, %arg2: memref<8x8x8xf32, #tpu.memory_space<vmem>>, %arg3: memref<8x8x32xf32, #tpu.memory_space<vmem>>, %arg4: memref<8x8xi32, #tpu.memory_space<vmem>>, %arg5: memref<8x1xi32, #tpu.memory_space<vmem>>, %arg6: memref<8x8xf32, #tpu.memory_space<vmem>>, %arg7: memref<32x32xf32, #tpu.memory_space<vmem>>, %arg8: memref<1x32xf32, #tpu.memory_space<vmem>>, %arg9: memref<32x32xf32, #tpu.memory_space<vmem>>, %arg10: memref<1x32xf32, #tpu.memory_space<vmem>>, %arg11: memref<1x32xf32, #tpu.memory_space<vmem>>, %arg12: memref<1x32xf32, #tpu.memory_space<vmem>>, %arg13: memref<3x32x32xf32, #tpu.memory_space<vmem>>, %arg14: memref<3x32x32xf32, #tpu.memory_space<vmem>>, %arg15: memref<3x1x32xf32, #tpu.memory_space<vmem>>, %arg16: memref<3x32x32xf32, #tpu.memory_space<vmem>>, %arg17: memref<3x1x32xf32, #tpu.memory_space<vmem>>, %arg18: memref<32x32xf32, #tpu.memory_space<vmem>>, %arg19: memref<1x32xf32, #tpu.memory_space<vmem>>, %arg20: memref<32x32xf32, #tpu.memory_space<vmem>>, %arg21: memref<1x32xf32, #tpu.memory_space<vmem>>, %arg22: memref<32x32xf32, #tpu.memory_space<vmem>>, %arg23: memref<1x32xf32, #tpu.memory_space<vmem>>, %arg24: memref<32x32xf32, #tpu.memory_space<vmem>>, %arg25: memref<32x32xf32, #tpu.memory_space<vmem>>, %arg26: memref<1x32xf32, #tpu.memory_space<vmem>>, %arg27: memref<8x8x32xf32, #tpu.memory_space<vmem>>, %arg28: memref<8x32xf32, #tpu.memory_space<vmem>>) attributes {dimension_semantics = [#tpu.dimension_semantics<parallel>], iteration_bounds = array<i64: 1>, scalar_prefetch = 0 : i64, scratch_operands = 0 : i64, tpu.core_type = #tpu.core_type<tc>, window_params = [{transform_indices = @transform_0, window_bounds = array<i64: 8, 8, 8>}, {transform_indices = @transform_1, window_bounds = array<i64: 8, 8, 8>}, {transform_indices = @transform_2, window_bounds = array<i64: 8, 8, 32>}, {transform_indices = @transform_3, window_bounds = array<i64: 8, 8>}, {transform_indices = @transform_4, window_bounds = array<i64: 8, 1>}, {transform_indices = @transform_5, window_bounds = array<i64: 8, 8>}, {pipeline_mode = #tpu.pipeline_mode<synchronous>, transform_indices = @transform_6, window_bounds = array<i64: 32, 32>}, {pipeline_mode = #tpu.pipeline_mode<synchronous>, transform_indices = @transform_7, window_bounds = array<i64: 1, 32>}, {pipeline_mode = #tpu.pipeline_mode<synchronous>, transform_indices = @transform_8, window_bounds = array<i64: 32, 32>}, {pipeline_mode = #tpu.pipeline_mode<synchronous>, transform_indices = @transform_9, window_bounds = array<i64: 1, 32>}, {pipeline_mode = #tpu.pipeline_mode<synchronous>, transform_indices = @transform_10, window_bounds = array<i64: 1, 32>}, {pipeline_mode = #tpu.pipeline_mode<synchronous>, transform_indices = @transform_11, window_bounds = array<i64: 1, 32>}, {pipeline_mode = #tpu.pipeline_mode<synchronous>, transform_indices = @transform_12, window_bounds = array<i64: 3, 32, 32>}, {pipeline_mode = #tpu.pipeline_mode<synchronous>, transform_indices = @transform_13, window_bounds = array<i64: 3, 32, 32>}, {pipeline_mode = #tpu.pipeline_mode<synchronous>, transform_indices = @transform_14, window_bounds = array<i64: 3, 1, 32>}, {pipeline_mode = #tpu.pipeline_mode<synchronous>, transform_indices = @transform_15, window_bounds = array<i64: 3, 32, 32>}, {pipeline_mode = #tpu.pipeline_mode<synchronous>, transform_indices = @transform_16, window_bounds = array<i64: 3, 1, 32>}, {pipeline_mode = #tpu.pipeline_mode<synchronous>, transform_indices = @transform_17, window_bounds = array<i64: 32, 32>}, {pipeline_mode = #tpu.pipeline_mode<synchronous>, transform_indices = @transform_18, window_bounds = array<i64: 1, 32>}, {pipeline_mode = #tpu.pipeline_mode<synchronous>, transform_indices = @transform_19, window_bounds = array<i64: 32, 32>}, {pipeline_mode = #tpu.pipeline_mode<synchronous>, transform_indices = @transform_20, window_bounds = array<i64: 1, 32>}, {pipeline_mode = #tpu.pipeline_mode<synchronous>, transform_indices = @transform_21, window_bounds = array<i64: 32, 32>}, {pipeline_mode = #tpu.pipeline_mode<synchronous>, transform_indices = @transform_22, window_bounds = array<i64: 1, 32>}, {pipeline_mode = #tpu.pipeline_mode<synchronous>, transform_indices = @transform_23, window_bounds = array<i64: 32, 32>}, {pipeline_mode = #tpu.pipeline_mode<synchronous>, transform_indices = @transform_24, window_bounds = array<i64: 32, 32>}, {pipeline_mode = #tpu.pipeline_mode<synchronous>, transform_indices = @transform_25, window_bounds = array<i64: 1, 32>}, {transform_indices = @transform_26, window_bounds = array<i64: 8, 8, 32>}, {transform_indices = @transform_27, window_bounds = array<i64: 8, 32>}]} {
    %c0 = arith.constant 0 : index
    %c0_0 = arith.constant 0 : index
    %c0_1 = arith.constant 0 : index
    %0 = vector.load %arg1[%c0, %c0_0, %c0_1] : memref<8x8x8xf32, #tpu.memory_space<vmem>>, vector<8x8x8xf32>
    %c0_2 = arith.constant 0 : index
    %c0_3 = arith.constant 0 : index
    %c0_4 = arith.constant 0 : index
    %1 = vector.load %arg2[%c0_2, %c0_3, %c0_4] : memref<8x8x8xf32, #tpu.memory_space<vmem>>, vector<8x8x8xf32>
    %c0_5 = arith.constant 0 : index
    %c0_6 = arith.constant 0 : index
    %2 = vector.load %arg7[%c0_5, %c0_6] : memref<32x32xf32, #tpu.memory_space<vmem>>, vector<32x32xf32>
    %c0_7 = arith.constant 0 : index
    %c0_8 = arith.constant 0 : index
    %3 = vector.load %arg8[%c0_7, %c0_8] : memref<1x32xf32, #tpu.memory_space<vmem>>, vector<1x32xf32>
    %c0_9 = arith.constant 0 : index
    %c0_10 = arith.constant 0 : index
    %4 = vector.load %arg9[%c0_9, %c0_10] : memref<32x32xf32, #tpu.memory_space<vmem>>, vector<32x32xf32>
    %c0_11 = arith.constant 0 : index
    %c0_12 = arith.constant 0 : index
    %5 = vector.load %arg10[%c0_11, %c0_12] : memref<1x32xf32, #tpu.memory_space<vmem>>, vector<1x32xf32>
    %c0_13 = arith.constant 0 : index
    %c0_14 = arith.constant 0 : index
    %6 = vector.load %arg11[%c0_13, %c0_14] : memref<1x32xf32, #tpu.memory_space<vmem>>, vector<1x32xf32>
    %c0_15 = arith.constant 0 : index
    %c0_16 = arith.constant 0 : index
    %7 = vector.load %arg12[%c0_15, %c0_16] : memref<1x32xf32, #tpu.memory_space<vmem>>, vector<1x32xf32>
    %c0_17 = arith.constant 0 : index
    %c0_18 = arith.constant 0 : index
    %c0_19 = arith.constant 0 : index
    %8 = vector.load %arg13[%c0_17, %c0_18, %c0_19] : memref<3x32x32xf32, #tpu.memory_space<vmem>>, vector<1x32x32xf32>
    %9 = vector.shape_cast %8 : vector<1x32x32xf32> to vector<32x32xf32>
    %c1 = arith.constant 1 : index
    %c0_20 = arith.constant 0 : index
    %c0_21 = arith.constant 0 : index
    %10 = vector.load %arg13[%c1, %c0_20, %c0_21] : memref<3x32x32xf32, #tpu.memory_space<vmem>>, vector<1x32x32xf32>
    %11 = vector.shape_cast %10 : vector<1x32x32xf32> to vector<32x32xf32>
    %c2 = arith.constant 2 : index
    %c0_22 = arith.constant 0 : index
    %c0_23 = arith.constant 0 : index
    %12 = vector.load %arg13[%c2, %c0_22, %c0_23] : memref<3x32x32xf32, #tpu.memory_space<vmem>>, vector<1x32x32xf32>
    %13 = vector.shape_cast %12 : vector<1x32x32xf32> to vector<32x32xf32>
    %c0_24 = arith.constant 0 : index
    %c0_25 = arith.constant 0 : index
    %c0_26 = arith.constant 0 : index
    %14 = vector.load %arg14[%c0_24, %c0_25, %c0_26] : memref<3x32x32xf32, #tpu.memory_space<vmem>>, vector<1x32x32xf32>
    %15 = vector.shape_cast %14 : vector<1x32x32xf32> to vector<32x32xf32>
    %c1_27 = arith.constant 1 : index
    %c0_28 = arith.constant 0 : index
    %c0_29 = arith.constant 0 : index
    %16 = vector.load %arg14[%c1_27, %c0_28, %c0_29] : memref<3x32x32xf32, #tpu.memory_space<vmem>>, vector<1x32x32xf32>
    %17 = vector.shape_cast %16 : vector<1x32x32xf32> to vector<32x32xf32>
    %c2_30 = arith.constant 2 : index
    %c0_31 = arith.constant 0 : index
    %c0_32 = arith.constant 0 : index
    %18 = vector.load %arg14[%c2_30, %c0_31, %c0_32] : memref<3x32x32xf32, #tpu.memory_space<vmem>>, vector<1x32x32xf32>
    %19 = vector.shape_cast %18 : vector<1x32x32xf32> to vector<32x32xf32>
    %c0_33 = arith.constant 0 : index
    %c0_34 = arith.constant 0 : index
    %c0_35 = arith.constant 0 : index
    %20 = vector.load %arg15[%c0_33, %c0_34, %c0_35] : memref<3x1x32xf32, #tpu.memory_space<vmem>>, vector<1x1x32xf32>
    %21 = vector.shape_cast %20 : vector<1x1x32xf32> to vector<1x32xf32>
    %c1_36 = arith.constant 1 : index
    %c0_37 = arith.constant 0 : index
    %c0_38 = arith.constant 0 : index
    %22 = vector.load %arg15[%c1_36, %c0_37, %c0_38] : memref<3x1x32xf32, #tpu.memory_space<vmem>>, vector<1x1x32xf32>
    %23 = vector.shape_cast %22 : vector<1x1x32xf32> to vector<1x32xf32>
    %c2_39 = arith.constant 2 : index
    %c0_40 = arith.constant 0 : index
    %c0_41 = arith.constant 0 : index
    %24 = vector.load %arg15[%c2_39, %c0_40, %c0_41] : memref<3x1x32xf32, #tpu.memory_space<vmem>>, vector<1x1x32xf32>
    %25 = vector.shape_cast %24 : vector<1x1x32xf32> to vector<1x32xf32>
    %c0_42 = arith.constant 0 : index
    %c0_43 = arith.constant 0 : index
    %c0_44 = arith.constant 0 : index
    %26 = vector.load %arg16[%c0_42, %c0_43, %c0_44] : memref<3x32x32xf32, #tpu.memory_space<vmem>>, vector<1x32x32xf32>
    %27 = vector.shape_cast %26 : vector<1x32x32xf32> to vector<32x32xf32>
    %c1_45 = arith.constant 1 : index
    %c0_46 = arith.constant 0 : index
    %c0_47 = arith.constant 0 : index
    %28 = vector.load %arg16[%c1_45, %c0_46, %c0_47] : memref<3x32x32xf32, #tpu.memory_space<vmem>>, vector<1x32x32xf32>
    %29 = vector.shape_cast %28 : vector<1x32x32xf32> to vector<32x32xf32>
    %c2_48 = arith.constant 2 : index
    %c0_49 = arith.constant 0 : index
    %c0_50 = arith.constant 0 : index
    %30 = vector.load %arg16[%c2_48, %c0_49, %c0_50] : memref<3x32x32xf32, #tpu.memory_space<vmem>>, vector<1x32x32xf32>
    %31 = vector.shape_cast %30 : vector<1x32x32xf32> to vector<32x32xf32>
    %c0_51 = arith.constant 0 : index
    %c0_52 = arith.constant 0 : index
    %c0_53 = arith.constant 0 : index
    %32 = vector.load %arg17[%c0_51, %c0_52, %c0_53] : memref<3x1x32xf32, #tpu.memory_space<vmem>>, vector<1x1x32xf32>
    %33 = vector.shape_cast %32 : vector<1x1x32xf32> to vector<1x32xf32>
    %c1_54 = arith.constant 1 : index
    %c0_55 = arith.constant 0 : index
    %c0_56 = arith.constant 0 : index
    %34 = vector.load %arg17[%c1_54, %c0_55, %c0_56] : memref<3x1x32xf32, #tpu.memory_space<vmem>>, vector<1x1x32xf32>
    %35 = vector.shape_cast %34 : vector<1x1x32xf32> to vector<1x32xf32>
    %c2_57 = arith.constant 2 : index
    %c0_58 = arith.constant 0 : index
    %c0_59 = arith.constant 0 : index
    %36 = vector.load %arg17[%c2_57, %c0_58, %c0_59] : memref<3x1x32xf32, #tpu.memory_space<vmem>>, vector<1x1x32xf32>
    %37 = vector.shape_cast %36 : vector<1x1x32xf32> to vector<1x32xf32>
    %c0_60 = arith.constant 0 : index
    %c0_61 = arith.constant 0 : index
    %c0_62 = arith.constant 0 : index
    %38 = vector.load %arg3[%c0_60, %c0_61, %c0_62] : memref<8x8x32xf32, #tpu.memory_space<vmem>>, vector<8x8x32xf32>
    %39 = vector.shape_cast %38 : vector<8x8x32xf32> to vector<64x32xf32>
    %cst = arith.constant dense<0.000000e+00> : vector<64x32xf32>
    %40 = tpu.matmul %39, %2, %cst {dimension_numbers = #tpu.dot_dimension_numbers<[1], [0], [0], [1], [0, 0, 1, 1], [], []>} : vector<64x32xf32>, vector<32x32xf32>, vector<64x32xf32> -> vector<64x32xf32>
    %41 = vector.broadcast %3 : vector<1x32xf32> to vector<64x32xf32>
    %42 = arith.addf %40, %41 : vector<64x32xf32>
    %cst_63 = arith.constant dense<0.000000e+00> : vector<64x32xf32>
    %43 = tpu.matmul %39, %4, %cst_63 {dimension_numbers = #tpu.dot_dimension_numbers<[1], [0], [0], [1], [0, 0, 1, 1], [], []>} : vector<64x32xf32>, vector<32x32xf32>, vector<64x32xf32> -> vector<64x32xf32>
    %44 = vector.broadcast %5 : vector<1x32xf32> to vector<64x32xf32>
    %45 = arith.addf %43, %44 : vector<64x32xf32>
    %46 = vector.shape_cast %42 : vector<64x32xf32> to vector<8x8x32xf32>
    "tpu.trace_start"() <{level = 10 : i32, message = "bnm,bmd->bnd"}> : () -> ()
    %cst_64 = arith.constant dense<0.000000e+00> : vector<8x8x32xf32>
    %47 = tpu.matmul %0, %46, %cst_64 {dimension_numbers = #tpu.dot_dimension_numbers<[2], [1], [1], [2], [0, 0, 0, 1, 1, 2], [0], [0]>} : vector<8x8x8xf32>, vector<8x8x32xf32>, vector<8x8x32xf32> -> vector<8x8x32xf32>
    "tpu.trace_stop"() : () -> ()
    %48 = vector.shape_cast %47 : vector<8x8x32xf32> to vector<64x32xf32>
    %49 = vector.broadcast %6 : vector<1x32xf32> to vector<64x32xf32>
    %50 = arith.addf %48, %49 : vector<64x32xf32>
    %51 = vector.shape_cast %45 : vector<64x32xf32> to vector<8x8x32xf32>
    "tpu.trace_start"() <{level = 10 : i32, message = "bnm,bmd->bnd"}> : () -> ()
    %cst_65 = arith.constant dense<0.000000e+00> : vector<8x8x32xf32>
    %52 = tpu.matmul %1, %51, %cst_65 {dimension_numbers = #tpu.dot_dimension_numbers<[2], [1], [1], [2], [0, 0, 0, 1, 1, 2], [0], [0]>} : vector<8x8x8xf32>, vector<8x8x32xf32>, vector<8x8x32xf32> -> vector<8x8x32xf32>
    "tpu.trace_stop"() : () -> ()
    %53 = vector.shape_cast %52 : vector<8x8x32xf32> to vector<64x32xf32>
    %54 = vector.broadcast %7 : vector<1x32xf32> to vector<64x32xf32>
    %55 = arith.addf %53, %54 : vector<64x32xf32>
    %cst_66 = arith.constant dense<0.000000e+00> : vector<64x32xf32>
    %56 = tpu.matmul %50, %9, %cst_66 {dimension_numbers = #tpu.dot_dimension_numbers<[1], [0], [0], [1], [0, 0, 1, 1], [], []>} : vector<64x32xf32>, vector<32x32xf32>, vector<64x32xf32> -> vector<64x32xf32>
    %cst_67 = arith.constant dense<0.000000e+00> : vector<64x32xf32>
    %57 = tpu.matmul %55, %15, %cst_67 {dimension_numbers = #tpu.dot_dimension_numbers<[1], [0], [0], [1], [0, 0, 1, 1], [], []>} : vector<64x32xf32>, vector<32x32xf32>, vector<64x32xf32> -> vector<64x32xf32>
    %58 = arith.addf %56, %57 : vector<64x32xf32>
    %59 = vector.broadcast %21 : vector<1x32xf32> to vector<64x32xf32>
    %60 = arith.addf %58, %59 : vector<64x32xf32>
    %cst_68 = arith.constant dense<0.000000e+00> : vector<64x32xf32>
    %61 = tpu.matmul %39, %27, %cst_68 {dimension_numbers = #tpu.dot_dimension_numbers<[1], [0], [0], [1], [0, 0, 1, 1], [], []>} : vector<64x32xf32>, vector<32x32xf32>, vector<64x32xf32> -> vector<64x32xf32>
    %62 = vector.broadcast %33 : vector<1x32xf32> to vector<64x32xf32>
    %63 = arith.addf %61, %62 : vector<64x32xf32>
    %cst_69 = arith.constant dense<0.000000e+00> : vector<64x32xf32>
    %64 = tpu.matmul %50, %11, %cst_69 {dimension_numbers = #tpu.dot_dimension_numbers<[1], [0], [0], [1], [0, 0, 1, 1], [], []>} : vector<64x32xf32>, vector<32x32xf32>, vector<64x32xf32> -> vector<64x32xf32>
    %cst_70 = arith.constant dense<0.000000e+00> : vector<64x32xf32>
    %65 = tpu.matmul %55, %17, %cst_70 {dimension_numbers = #tpu.dot_dimension_numbers<[1], [0], [0], [1], [0, 0, 1, 1], [], []>} : vector<64x32xf32>, vector<32x32xf32>, vector<64x32xf32> -> vector<64x32xf32>
    %66 = arith.addf %64, %65 : vector<64x32xf32>
    %67 = vector.broadcast %23 : vector<1x32xf32> to vector<64x32xf32>
    %68 = arith.addf %66, %67 : vector<64x32xf32>
    %cst_71 = arith.constant dense<0.000000e+00> : vector<64x32xf32>
    %69 = tpu.matmul %39, %29, %cst_71 {dimension_numbers = #tpu.dot_dimension_numbers<[1], [0], [0], [1], [0, 0, 1, 1], [], []>} : vector<64x32xf32>, vector<32x32xf32>, vector<64x32xf32> -> vector<64x32xf32>
    %70 = vector.broadcast %35 : vector<1x32xf32> to vector<64x32xf32>
    %71 = arith.addf %69, %70 : vector<64x32xf32>
    %cst_72 = arith.constant dense<0.000000e+00> : vector<64x32xf32>
    %72 = tpu.matmul %50, %13, %cst_72 {dimension_numbers = #tpu.dot_dimension_numbers<[1], [0], [0], [1], [0, 0, 1, 1], [], []>} : vector<64x32xf32>, vector<32x32xf32>, vector<64x32xf32> -> vector<64x32xf32>
    %cst_73 = arith.constant dense<0.000000e+00> : vector<64x32xf32>
    %73 = tpu.matmul %55, %19, %cst_73 {dimension_numbers = #tpu.dot_dimension_numbers<[1], [0], [0], [1], [0, 0, 1, 1], [], []>} : vector<64x32xf32>, vector<32x32xf32>, vector<64x32xf32> -> vector<64x32xf32>
    %74 = arith.addf %72, %73 : vector<64x32xf32>
    %75 = vector.broadcast %25 : vector<1x32xf32> to vector<64x32xf32>
    %76 = arith.addf %74, %75 : vector<64x32xf32>
    %cst_74 = arith.constant dense<0.000000e+00> : vector<64x32xf32>
    %77 = tpu.matmul %39, %31, %cst_74 {dimension_numbers = #tpu.dot_dimension_numbers<[1], [0], [0], [1], [0, 0, 1, 1], [], []>} : vector<64x32xf32>, vector<32x32xf32>, vector<64x32xf32> -> vector<64x32xf32>
    %78 = vector.broadcast %37 : vector<1x32xf32> to vector<64x32xf32>
    %79 = arith.addf %77, %78 : vector<64x32xf32>
    %80 = arith.addf %60, %63 : vector<64x32xf32>
    %81 = arith.negf %80 : vector<64x32xf32>
    %82 = math.exp %81 : vector<64x32xf32>
    %cst_75 = arith.constant 1.000000e+00 : f32
    %83 = vector.broadcast %cst_75 : f32 to vector<64x32xf32>
    %84 = arith.addf %83, %82 : vector<64x32xf32>
    %85 = arith.divf %83, %84 : vector<64x32xf32>
    %86 = arith.addf %68, %71 : vector<64x32xf32>
    %87 = arith.negf %86 : vector<64x32xf32>
    %88 = math.exp %87 : vector<64x32xf32>
    %cst_76 = arith.constant 1.000000e+00 : f32
    %89 = vector.broadcast %cst_76 : f32 to vector<64x32xf32>
    %90 = arith.addf %89, %88 : vector<64x32xf32>
    %91 = arith.divf %89, %90 : vector<64x32xf32>
    %92 = arith.mulf %85, %79 : vector<64x32xf32>
    %93 = arith.addf %76, %92 : vector<64x32xf32>
    %94 = math.tanh %93 : vector<64x32xf32>
    %95 = arith.subf %39, %94 : vector<64x32xf32>
    %96 = arith.mulf %91, %95 : vector<64x32xf32>
    %97 = arith.addf %94, %96 : vector<64x32xf32>
    %cst_77 = arith.constant dense<0.000000e+00> : vector<64x32xf32>
    %98 = tpu.matmul %97, %2, %cst_77 {dimension_numbers = #tpu.dot_dimension_numbers<[1], [0], [0], [1], [0, 0, 1, 1], [], []>} : vector<64x32xf32>, vector<32x32xf32>, vector<64x32xf32> -> vector<64x32xf32>
    %99 = vector.broadcast %3 : vector<1x32xf32> to vector<64x32xf32>
    %100 = arith.addf %98, %99 : vector<64x32xf32>
    %cst_78 = arith.constant dense<0.000000e+00> : vector<64x32xf32>
    %101 = tpu.matmul %97, %4, %cst_78 {dimension_numbers = #tpu.dot_dimension_numbers<[1], [0], [0], [1], [0, 0, 1, 1], [], []>} : vector<64x32xf32>, vector<32x32xf32>, vector<64x32xf32> -> vector<64x32xf32>
    %102 = vector.broadcast %5 : vector<1x32xf32> to vector<64x32xf32>
    %103 = arith.addf %101, %102 : vector<64x32xf32>
    %104 = vector.shape_cast %100 : vector<64x32xf32> to vector<8x8x32xf32>
    "tpu.trace_start"() <{level = 10 : i32, message = "bnm,bmd->bnd"}> : () -> ()
    %cst_79 = arith.constant dense<0.000000e+00> : vector<8x8x32xf32>
    %105 = tpu.matmul %0, %104, %cst_79 {dimension_numbers = #tpu.dot_dimension_numbers<[2], [1], [1], [2], [0, 0, 0, 1, 1, 2], [0], [0]>} : vector<8x8x8xf32>, vector<8x8x32xf32>, vector<8x8x32xf32> -> vector<8x8x32xf32>
    "tpu.trace_stop"() : () -> ()
    %106 = vector.shape_cast %105 : vector<8x8x32xf32> to vector<64x32xf32>
    %107 = vector.broadcast %6 : vector<1x32xf32> to vector<64x32xf32>
    %108 = arith.addf %106, %107 : vector<64x32xf32>
    %109 = vector.shape_cast %103 : vector<64x32xf32> to vector<8x8x32xf32>
    "tpu.trace_start"() <{level = 10 : i32, message = "bnm,bmd->bnd"}> : () -> ()
    %cst_80 = arith.constant dense<0.000000e+00> : vector<8x8x32xf32>
    %110 = tpu.matmul %1, %109, %cst_80 {dimension_numbers = #tpu.dot_dimension_numbers<[2], [1], [1], [2], [0, 0, 0, 1, 1, 2], [0], [0]>} : vector<8x8x8xf32>, vector<8x8x32xf32>, vector<8x8x32xf32> -> vector<8x8x32xf32>
    "tpu.trace_stop"() : () -> ()
    %111 = vector.shape_cast %110 : vector<8x8x32xf32> to vector<64x32xf32>
    %112 = vector.broadcast %7 : vector<1x32xf32> to vector<64x32xf32>
    %113 = arith.addf %111, %112 : vector<64x32xf32>
    %cst_81 = arith.constant dense<0.000000e+00> : vector<64x32xf32>
    %114 = tpu.matmul %108, %9, %cst_81 {dimension_numbers = #tpu.dot_dimension_numbers<[1], [0], [0], [1], [0, 0, 1, 1], [], []>} : vector<64x32xf32>, vector<32x32xf32>, vector<64x32xf32> -> vector<64x32xf32>
    %cst_82 = arith.constant dense<0.000000e+00> : vector<64x32xf32>
    %115 = tpu.matmul %113, %15, %cst_82 {dimension_numbers = #tpu.dot_dimension_numbers<[1], [0], [0], [1], [0, 0, 1, 1], [], []>} : vector<64x32xf32>, vector<32x32xf32>, vector<64x32xf32> -> vector<64x32xf32>
    %116 = arith.addf %114, %115 : vector<64x32xf32>
    %117 = vector.broadcast %21 : vector<1x32xf32> to vector<64x32xf32>
    %118 = arith.addf %116, %117 : vector<64x32xf32>
    %cst_83 = arith.constant dense<0.000000e+00> : vector<64x32xf32>
    %119 = tpu.matmul %97, %27, %cst_83 {dimension_numbers = #tpu.dot_dimension_numbers<[1], [0], [0], [1], [0, 0, 1, 1], [], []>} : vector<64x32xf32>, vector<32x32xf32>, vector<64x32xf32> -> vector<64x32xf32>
    %120 = vector.broadcast %33 : vector<1x32xf32> to vector<64x32xf32>
    %121 = arith.addf %119, %120 : vector<64x32xf32>
    %cst_84 = arith.constant dense<0.000000e+00> : vector<64x32xf32>
    %122 = tpu.matmul %108, %11, %cst_84 {dimension_numbers = #tpu.dot_dimension_numbers<[1], [0], [0], [1], [0, 0, 1, 1], [], []>} : vector<64x32xf32>, vector<32x32xf32>, vector<64x32xf32> -> vector<64x32xf32>
    %cst_85 = arith.constant dense<0.000000e+00> : vector<64x32xf32>
    %123 = tpu.matmul %113, %17, %cst_85 {dimension_numbers = #tpu.dot_dimension_numbers<[1], [0], [0], [1], [0, 0, 1, 1], [], []>} : vector<64x32xf32>, vector<32x32xf32>, vector<64x32xf32> -> vector<64x32xf32>
    %124 = arith.addf %122, %123 : vector<64x32xf32>
    %125 = vector.broadcast %23 : vector<1x32xf32> to vector<64x32xf32>
    %126 = arith.addf %124, %125 : vector<64x32xf32>
    %cst_86 = arith.constant dense<0.000000e+00> : vector<64x32xf32>
    %127 = tpu.matmul %97, %29, %cst_86 {dimension_numbers = #tpu.dot_dimension_numbers<[1], [0], [0], [1], [0, 0, 1, 1], [], []>} : vector<64x32xf32>, vector<32x32xf32>, vector<64x32xf32> -> vector<64x32xf32>
    %128 = vector.broadcast %35 : vector<1x32xf32> to vector<64x32xf32>
    %129 = arith.addf %127, %128 : vector<64x32xf32>
    %cst_87 = arith.constant dense<0.000000e+00> : vector<64x32xf32>
    %130 = tpu.matmul %108, %13, %cst_87 {dimension_numbers = #tpu.dot_dimension_numbers<[1], [0], [0], [1], [0, 0, 1, 1], [], []>} : vector<64x32xf32>, vector<32x32xf32>, vector<64x32xf32> -> vector<64x32xf32>
    %cst_88 = arith.constant dense<0.000000e+00> : vector<64x32xf32>
    %131 = tpu.matmul %113, %19, %cst_88 {dimension_numbers = #tpu.dot_dimension_numbers<[1], [0], [0], [1], [0, 0, 1, 1], [], []>} : vector<64x32xf32>, vector<32x32xf32>, vector<64x32xf32> -> vector<64x32xf32>
    %132 = arith.addf %130, %131 : vector<64x32xf32>
    %133 = vector.broadcast %25 : vector<1x32xf32> to vector<64x32xf32>
    %134 = arith.addf %132, %133 : vector<64x32xf32>
    %cst_89 = arith.constant dense<0.000000e+00> : vector<64x32xf32>
    %135 = tpu.matmul %97, %31, %cst_89 {dimension_numbers = #tpu.dot_dimension_numbers<[1], [0], [0], [1], [0, 0, 1, 1], [], []>} : vector<64x32xf32>, vector<32x32xf32>, vector<64x32xf32> -> vector<64x32xf32>
    %136 = vector.broadcast %37 : vector<1x32xf32> to vector<64x32xf32>
    %137 = arith.addf %135, %136 : vector<64x32xf32>
    %138 = arith.addf %118, %121 : vector<64x32xf32>
    %139 = arith.negf %138 : vector<64x32xf32>
    %140 = math.exp %139 : vector<64x32xf32>
    %cst_90 = arith.constant 1.000000e+00 : f32
    %141 = vector.broadcast %cst_90 : f32 to vector<64x32xf32>
    %142 = arith.addf %141, %140 : vector<64x32xf32>
    %143 = arith.divf %141, %142 : vector<64x32xf32>
    %144 = arith.addf %126, %129 : vector<64x32xf32>
    %145 = arith.negf %144 : vector<64x32xf32>
    %146 = math.exp %145 : vector<64x32xf32>
    %cst_91 = arith.constant 1.000000e+00 : f32
    %147 = vector.broadcast %cst_91 : f32 to vector<64x32xf32>
    %148 = arith.addf %147, %146 : vector<64x32xf32>
    %149 = arith.divf %147, %148 : vector<64x32xf32>
    %150 = arith.mulf %143, %137 : vector<64x32xf32>
    %151 = arith.addf %134, %150 : vector<64x32xf32>
    %152 = math.tanh %151 : vector<64x32xf32>
    %153 = arith.subf %97, %152 : vector<64x32xf32>
    %154 = arith.mulf %149, %153 : vector<64x32xf32>
    %155 = arith.addf %152, %154 : vector<64x32xf32>
    %156 = vector.shape_cast %155 : vector<64x32xf32> to vector<8x8x32xf32>
    %c0_92 = arith.constant 0 : index
    %c0_93 = arith.constant 0 : index
    %157 = vector.load %arg4[%c0_92, %c0_93] : memref<8x8xi32, #tpu.memory_space<vmem>>, vector<8x8xi32>
    %158 = tpu.iota {dimensions = array<i32: 2>} : vector<8x8x8xi32>
    %159 = vector.shape_cast %157 : vector<8x8xi32> to vector<8x8x1xi32>
    %160 = vector.broadcast %159 : vector<8x8x1xi32> to vector<8x8x8xi32>
    %161 = arith.cmpi eq, %160, %158 : vector<8x8x8xi32>
    %162 = arith.extui %161 : vector<8x8x8xi1> to vector<8x8x8xi32>
    %163 = arith.sitofp %162 : vector<8x8x8xi32> to vector<8x8x8xf32>
    "tpu.trace_start"() <{level = 10 : i32, message = "bln,bnd->bld"}> : () -> ()
    %cst_94 = arith.constant dense<0.000000e+00> : vector<8x8x32xf32>
    %164 = tpu.matmul %163, %156, %cst_94 {dimension_numbers = #tpu.dot_dimension_numbers<[2], [1], [1], [2], [0, 0, 0, 1, 1, 2], [0], [0]>} : vector<8x8x8xf32>, vector<8x8x32xf32>, vector<8x8x32xf32> -> vector<8x8x32xf32>
    "tpu.trace_stop"() : () -> ()
    %c0_95 = arith.constant 0 : index
    %c0_96 = arith.constant 0 : index
    %165 = vector.load %arg5[%c0_95, %c0_96] : memref<8x1xi32, #tpu.memory_space<vmem>>, vector<8x1xi32>
    %166 = tpu.iota {dimensions = array<i32: 1>} : vector<8x8xi32>
    %167 = vector.broadcast %165 : vector<8x1xi32> to vector<8x8xi32>
    %168 = arith.cmpi eq, %167, %166 : vector<8x8xi32>
    %169 = arith.extui %168 : vector<8x8xi1> to vector<8x8xi32>
    %170 = arith.sitofp %169 : vector<8x8xi32> to vector<8x8xf32>
    %171 = vector.shape_cast %170 : vector<8x8xf32> to vector<8x8x1xf32>
    %172 = vector.broadcast %171 : vector<8x8x1xf32> to vector<8x8x32xf32>
    %173 = arith.mulf %172, %164 : vector<8x8x32xf32>
    %cst_97 = arith.constant dense<0.000000e+00> : vector<8x32xf32>
    %174 = vector.multi_reduction <add>, %173, %cst_97 [1] : vector<8x8x32xf32> to vector<8x32xf32>
    %175 = vector.shape_cast %164 : vector<8x8x32xf32> to vector<64x32xf32>
    %c0_98 = arith.constant 0 : index
    %c0_99 = arith.constant 0 : index
    %176 = vector.load %arg18[%c0_98, %c0_99] : memref<32x32xf32, #tpu.memory_space<vmem>>, vector<32x32xf32>
    %cst_100 = arith.constant dense<0.000000e+00> : vector<8x32xf32>
    %177 = tpu.matmul %174, %176, %cst_100 {dimension_numbers = #tpu.dot_dimension_numbers<[1], [0], [0], [1], [0, 0, 1, 1], [], []>} : vector<8x32xf32>, vector<32x32xf32>, vector<8x32xf32> -> vector<8x32xf32>
    %c0_101 = arith.constant 0 : index
    %c0_102 = arith.constant 0 : index
    %178 = vector.load %arg19[%c0_101, %c0_102] : memref<1x32xf32, #tpu.memory_space<vmem>>, vector<1x32xf32>
    %179 = vector.broadcast %178 : vector<1x32xf32> to vector<8x32xf32>
    %180 = arith.addf %177, %179 : vector<8x32xf32>
    %c0_103 = arith.constant 0 : index
    %c0_104 = arith.constant 0 : index
    %181 = vector.load %arg20[%c0_103, %c0_104] : memref<32x32xf32, #tpu.memory_space<vmem>>, vector<32x32xf32>
    %cst_105 = arith.constant dense<0.000000e+00> : vector<64x32xf32>
    %182 = tpu.matmul %175, %181, %cst_105 {dimension_numbers = #tpu.dot_dimension_numbers<[1], [0], [0], [1], [0, 0, 1, 1], [], []>} : vector<64x32xf32>, vector<32x32xf32>, vector<64x32xf32> -> vector<64x32xf32>
    %c0_106 = arith.constant 0 : index
    %c0_107 = arith.constant 0 : index
    %183 = vector.load %arg21[%c0_106, %c0_107] : memref<1x32xf32, #tpu.memory_space<vmem>>, vector<1x32xf32>
    %184 = vector.broadcast %183 : vector<1x32xf32> to vector<64x32xf32>
    %185 = arith.addf %182, %184 : vector<64x32xf32>
    %186 = vector.shape_cast %185 : vector<64x32xf32> to vector<8x8x32xf32>
    %187 = vector.shape_cast %180 : vector<8x32xf32> to vector<8x1x32xf32>
    %188 = vector.broadcast %187 : vector<8x1x32xf32> to vector<8x8x32xf32>
    %189 = arith.addf %188, %186 : vector<8x8x32xf32>
    %190 = arith.negf %189 : vector<8x8x32xf32>
    %191 = math.exp %190 : vector<8x8x32xf32>
    %cst_108 = arith.constant 1.000000e+00 : f32
    %192 = vector.broadcast %cst_108 : f32 to vector<8x8x32xf32>
    %193 = arith.addf %192, %191 : vector<8x8x32xf32>
    %194 = arith.divf %192, %193 : vector<8x8x32xf32>
    %195 = vector.shape_cast %194 : vector<8x8x32xf32> to vector<64x32xf32>
    %c0_109 = arith.constant 0 : index
    %c0_110 = arith.constant 0 : index
    %196 = vector.load %arg22[%c0_109, %c0_110] : memref<32x32xf32, #tpu.memory_space<vmem>>, vector<32x32xf32>
    %cst_111 = arith.constant dense<0.000000e+00> : vector<64x32xf32>
    %197 = tpu.matmul %195, %196, %cst_111 {dimension_numbers = #tpu.dot_dimension_numbers<[1], [0], [0], [1], [0, 0, 1, 1], [], []>} : vector<64x32xf32>, vector<32x32xf32>, vector<64x32xf32> -> vector<64x32xf32>
    %c0_112 = arith.constant 0 : index
    %c0_113 = arith.constant 0 : index
    %198 = vector.load %arg23[%c0_112, %c0_113] : memref<1x32xf32, #tpu.memory_space<vmem>>, vector<1x32xf32>
    %199 = vector.broadcast %198 : vector<1x32xf32> to vector<64x32xf32>
    %200 = arith.addf %197, %199 : vector<64x32xf32>
    %201 = vector.shape_cast %200 : vector<64x32xf32> to vector<8x8x32xf32>
    %c0_114 = arith.constant 0 : index
    %c0_115 = arith.constant 0 : index
    %202 = vector.load %arg6[%c0_114, %c0_115] : memref<8x8xf32, #tpu.memory_space<vmem>>, vector<8x8xf32>
    %203 = arith.mulf %201, %164 : vector<8x8x32xf32>
    %204 = vector.shape_cast %202 : vector<8x8xf32> to vector<8x8x1xf32>
    %205 = vector.broadcast %204 : vector<8x8x1xf32> to vector<8x8x32xf32>
    %206 = arith.mulf %203, %205 : vector<8x8x32xf32>
    %cst_116 = arith.constant dense<0.000000e+00> : vector<8x32xf32>
    %207 = vector.multi_reduction <add>, %206, %cst_116 [1] : vector<8x8x32xf32> to vector<8x32xf32>
    %c0_117 = arith.constant 0 : index
    %c0_118 = arith.constant 0 : index
    %208 = vector.load %arg24[%c0_117, %c0_118] : memref<32x32xf32, #tpu.memory_space<vmem>>, vector<32x32xf32>
    %cst_119 = arith.constant dense<0.000000e+00> : vector<8x32xf32>
    %209 = tpu.matmul %207, %208, %cst_119 {dimension_numbers = #tpu.dot_dimension_numbers<[1], [0], [0], [1], [0, 0, 1, 1], [], []>} : vector<8x32xf32>, vector<32x32xf32>, vector<8x32xf32> -> vector<8x32xf32>
    %c0_120 = arith.constant 0 : index
    %c0_121 = arith.constant 0 : index
    %210 = vector.load %arg25[%c0_120, %c0_121] : memref<32x32xf32, #tpu.memory_space<vmem>>, vector<32x32xf32>
    %cst_122 = arith.constant dense<0.000000e+00> : vector<8x32xf32>
    %211 = tpu.matmul %174, %210, %cst_122 {dimension_numbers = #tpu.dot_dimension_numbers<[1], [0], [0], [1], [0, 0, 1, 1], [], []>} : vector<8x32xf32>, vector<32x32xf32>, vector<8x32xf32> -> vector<8x32xf32>
    %212 = arith.addf %209, %211 : vector<8x32xf32>
    %c0_123 = arith.constant 0 : index
    %c0_124 = arith.constant 0 : index
    %213 = vector.load %arg26[%c0_123, %c0_124] : memref<1x32xf32, #tpu.memory_space<vmem>>, vector<1x32xf32>
    %214 = vector.broadcast %213 : vector<1x32xf32> to vector<8x32xf32>
    %215 = arith.addf %212, %214 : vector<8x32xf32>
    %c0_125 = arith.constant 0 : index
    %c0_126 = arith.constant 0 : index
    %c0_127 = arith.constant 0 : index
    %216 = vector.load %arg27[%c0_125, %c0_126, %c0_127] : memref<8x8x32xf32, #tpu.memory_space<vmem>>, vector<8x8x32xf32>
    tpu.vector_store %arg27[%c0_125, %c0_126, %c0_127], %164 {strides = array<i32>} : memref<8x8x32xf32, #tpu.memory_space<vmem>>, vector<8x8x32xf32>,
    %c0_128 = arith.constant 0 : index
    %c0_129 = arith.constant 0 : index
    %217 = vector.load %arg28[%c0_128, %c0_129] : memref<8x32xf32, #tpu.memory_space<vmem>>, vector<8x32xf32>
    tpu.vector_store %arg28[%c0_128, %c0_129], %215 {strides = array<i32>} : memref<8x32xf32, #tpu.memory_space<vmem>>, vector<8x32xf32>,
    return
  }
  func.func @transform_0(%arg0: i32) -> (i32, i32, i32) {
    %c0_i32 = arith.constant 0 : i32
    %c0_i32_0 = arith.constant 0 : i32
    %c0_i32_1 = arith.constant 0 : i32
    return %arg0, %c0_i32, %c0_i32_0 : i32, i32, i32
  }
  func.func @transform_1(%arg0: i32) -> (i32, i32, i32) {
    %c0_i32 = arith.constant 0 : i32
    %c0_i32_0 = arith.constant 0 : i32
    %c0_i32_1 = arith.constant 0 : i32
    return %arg0, %c0_i32, %c0_i32_0 : i32, i32, i32
  }
  func.func @transform_2(%arg0: i32) -> (i32, i32, i32) {
    %c0_i32 = arith.constant 0 : i32
    %c0_i32_0 = arith.constant 0 : i32
    %c0_i32_1 = arith.constant 0 : i32
    return %arg0, %c0_i32, %c0_i32_0 : i32, i32, i32
  }
  func.func @transform_3(%arg0: i32) -> (i32, i32) {
    %c0_i32 = arith.constant 0 : i32
    %c0_i32_0 = arith.constant 0 : i32
    return %arg0, %c0_i32 : i32, i32
  }
  func.func @transform_4(%arg0: i32) -> (i32, i32) {
    %c0_i32 = arith.constant 0 : i32
    %c0_i32_0 = arith.constant 0 : i32
    return %arg0, %c0_i32 : i32, i32
  }
  func.func @transform_5(%arg0: i32) -> (i32, i32) {
    %c0_i32 = arith.constant 0 : i32
    %c0_i32_0 = arith.constant 0 : i32
    return %arg0, %c0_i32 : i32, i32
  }
  func.func @transform_6(%arg0: i32) -> (i32, i32) {
    %c0_i32 = arith.constant 0 : i32
    %c0_i32_0 = arith.constant 0 : i32
    %c0_i32_1 = arith.constant 0 : i32
    return %c0_i32, %c0_i32_0 : i32, i32
  }
  func.func @transform_7(%arg0: i32) -> (i32, i32) {
    %c0_i32 = arith.constant 0 : i32
    %c0_i32_0 = arith.constant 0 : i32
    %c0_i32_1 = arith.constant 0 : i32
    return %c0_i32, %c0_i32_0 : i32, i32
  }
  func.func @transform_8(%arg0: i32) -> (i32, i32) {
    %c0_i32 = arith.constant 0 : i32
    %c0_i32_0 = arith.constant 0 : i32
    %c0_i32_1 = arith.constant 0 : i32
    return %c0_i32, %c0_i32_0 : i32, i32
  }
  func.func @transform_9(%arg0: i32) -> (i32, i32) {
    %c0_i32 = arith.constant 0 : i32
    %c0_i32_0 = arith.constant 0 : i32
    %c0_i32_1 = arith.constant 0 : i32
    return %c0_i32, %c0_i32_0 : i32, i32
  }
  func.func @transform_10(%arg0: i32) -> (i32, i32) {
    %c0_i32 = arith.constant 0 : i32
    %c0_i32_0 = arith.constant 0 : i32
    %c0_i32_1 = arith.constant 0 : i32
    return %c0_i32, %c0_i32_0 : i32, i32
  }
  func.func @transform_11(%arg0: i32) -> (i32, i32) {
    %c0_i32 = arith.constant 0 : i32
    %c0_i32_0 = arith.constant 0 : i32
    %c0_i32_1 = arith.constant 0 : i32
    return %c0_i32, %c0_i32_0 : i32, i32
  }
  func.func @transform_12(%arg0: i32) -> (i32, i32, i32) {
    %c0_i32 = arith.constant 0 : i32
    %c0_i32_0 = arith.constant 0 : i32
    %c0_i32_1 = arith.constant 0 : i32
    %c0_i32_2 = arith.constant 0 : i32
    return %c0_i32, %c0_i32_0, %c0_i32_1 : i32, i32, i32
  }
  func.func @transform_13(%arg0: i32) -> (i32, i32, i32) {
    %c0_i32 = arith.constant 0 : i32
    %c0_i32_0 = arith.constant 0 : i32
    %c0_i32_1 = arith.constant 0 : i32
    %c0_i32_2 = arith.constant 0 : i32
    return %c0_i32, %c0_i32_0, %c0_i32_1 : i32, i32, i32
  }
  func.func @transform_14(%arg0: i32) -> (i32, i32, i32) {
    %c0_i32 = arith.constant 0 : i32
    %c0_i32_0 = arith.constant 0 : i32
    %c0_i32_1 = arith.constant 0 : i32
    %c0_i32_2 = arith.constant 0 : i32
    return %c0_i32, %c0_i32_0, %c0_i32_1 : i32, i32, i32
  }
  func.func @transform_15(%arg0: i32) -> (i32, i32, i32) {
    %c0_i32 = arith.constant 0 : i32
    %c0_i32_0 = arith.constant 0 : i32
    %c0_i32_1 = arith.constant 0 : i32
    %c0_i32_2 = arith.constant 0 : i32
    return %c0_i32, %c0_i32_0, %c0_i32_1 : i32, i32, i32
  }
  func.func @transform_16(%arg0: i32) -> (i32, i32, i32) {
    %c0_i32 = arith.constant 0 : i32
    %c0_i32_0 = arith.constant 0 : i32
    %c0_i32_1 = arith.constant 0 : i32
    %c0_i32_2 = arith.constant 0 : i32
    return %c0_i32, %c0_i32_0, %c0_i32_1 : i32, i32, i32
  }
  func.func @transform_17(%arg0: i32) -> (i32, i32) {
    %c0_i32 = arith.constant 0 : i32
    %c0_i32_0 = arith.constant 0 : i32
    %c0_i32_1 = arith.constant 0 : i32
    return %c0_i32, %c0_i32_0 : i32, i32
  }
  func.func @transform_18(%arg0: i32) -> (i32, i32) {
    %c0_i32 = arith.constant 0 : i32
    %c0_i32_0 = arith.constant 0 : i32
    %c0_i32_1 = arith.constant 0 : i32
    return %c0_i32, %c0_i32_0 : i32, i32
  }
  func.func @transform_19(%arg0: i32) -> (i32, i32) {
    %c0_i32 = arith.constant 0 : i32
    %c0_i32_0 = arith.constant 0 : i32
    %c0_i32_1 = arith.constant 0 : i32
    return %c0_i32, %c0_i32_0 : i32, i32
  }
  func.func @transform_20(%arg0: i32) -> (i32, i32) {
    %c0_i32 = arith.constant 0 : i32
    %c0_i32_0 = arith.constant 0 : i32
    %c0_i32_1 = arith.constant 0 : i32
    return %c0_i32, %c0_i32_0 : i32, i32
  }
  func.func @transform_21(%arg0: i32) -> (i32, i32) {
    %c0_i32 = arith.constant 0 : i32
    %c0_i32_0 = arith.constant 0 : i32
    %c0_i32_1 = arith.constant 0 : i32
    return %c0_i32, %c0_i32_0 : i32, i32
  }
  func.func @transform_22(%arg0: i32) -> (i32, i32) {
    %c0_i32 = arith.constant 0 : i32
    %c0_i32_0 = arith.constant 0 : i32
    %c0_i32_1 = arith.constant 0 : i32
    return %c0_i32, %c0_i32_0 : i32, i32
  }
  func.func @transform_23(%arg0: i32) -> (i32, i32) {
    %c0_i32 = arith.constant 0 : i32
    %c0_i32_0 = arith.constant 0 : i32
    %c0_i32_1 = arith.constant 0 : i32
    return %c0_i32, %c0_i32_0 : i32, i32
  }
  func.func @transform_24(%arg0: i32) -> (i32, i32) {
    %c0_i32 = arith.constant 0 : i32
    %c0_i32_0 = arith.constant 0 : i32
    %c0_i32_1 = arith.constant 0 : i32
    return %c0_i32, %c0_i32_0 : i32, i32
  }
  func.func @transform_25(%arg0: i32) -> (i32, i32) {
    %c0_i32 = arith.constant 0 : i32
    %c0_i32_0 = arith.constant 0 : i32
    %c0_i32_1 = arith.constant 0 : i32
    return %c0_i32, %c0_i32_0 : i32, i32
  }
  func.func @transform_26(%arg0: i32) -> (i32, i32, i32) {
    %c0_i32 = arith.constant 0 : i32
    %c0_i32_0 = arith.constant 0 : i32
    %c0_i32_1 = arith.constant 0 : i32
    return %arg0, %c0_i32, %c0_i32_0 : i32, i32, i32
  }
  func.func @transform_27(%arg0: i32) -> (i32, i32) {
    %c0_i32 = arith.constant 0 : i32
    %c0_i32_0 = arith.constant 0 : i32
    return %arg0, %c0_i32 : i32, i32
  }
}

</mosaic_0001>

<bundles_post_ra>
// kernel: tpu_custom_call.1
= control target key start
LH: loop header
LB: loop body
LE: loop exit
PB: predicated region body
PF: predicated region fallthrough
CT: control target
= control target key end

     0   :  { %s11504_s0 = inlined_call_operand.hbm [shape: f32[8,8,8], index: 0, kind: input, shape index: {}]   ;;  %s11505_s1 = inlined_call_operand.hbm [shape: f32[8,8,8], index: 1, kind: input, shape index: {}]   ;;  %s11506_s2 = inlined_call_operand.hbm [shape: f32[8,8,32], index: 2, kind: input, shape index: {}]   ;;  %s11507_s3 = inlined_call_operand.hbm [shape: s32[8,8], index: 3, kind: input, shape index: {}]   ;;  %s11508_s4 = inlined_call_operand.vmem [shape: s32[8,1], index: 4, kind: input, shape index: {}]   ;;  %s11509_s5 = inlined_call_operand.hbm [shape: f32[8,8], index: 5, kind: input, shape index: {}]   ;;  %s11510_s6 = inlined_call_operand.hbm [shape: f32[32,32], index: 6, kind: input, shape index: {}]   ;;  %s11511_s7 = inlined_call_operand.hbm [shape: f32[1,32], index: 7, kind: input, shape index: {}]   ;;  %s11512_s8 = inlined_call_operand.vmem [shape: f32[32,32], index: 8, kind: input, shape index: {}]   ;;  %s11513_s9 = inlined_call_operand.hbm [shape: f32[1,32], index: 9, kind: input, shape index: {}]   ;;  %s11514_s10 = inlined_call_operand.hbm [shape: f32[1,32], index: 10, kind: input, shape index: {}]   ;;  %s11515_s11 = inlined_call_operand.hbm [shape: f32[1,32], index: 11, kind: input, shape index: {}]   ;;  %s11516_s12 = inlined_call_operand.hbm [shape: f32[3,32,32], index: 12, kind: input, shape index: {}]   ;;  %s11517_s13 = inlined_call_operand.hbm [shape: f32[3,32,32], index: 13, kind: input, shape index: {}]   ;;  %s11518_s14 = inlined_call_operand.hbm [shape: f32[3,1,32], index: 14, kind: input, shape index: {}]   ;;  %s11519_s15 = inlined_call_operand.hbm [shape: f32[3,32,32], index: 15, kind: input, shape index: {}]   ;;  %s11520_s16 = inlined_call_operand.hbm [shape: f32[3,1,32], index: 16, kind: input, shape index: {}]   ;;  %s11521_s17 = inlined_call_operand.vmem [shape: f32[32,32], index: 17, kind: input, shape index: {}]   ;;  %s11522_s18 = inlined_call_operand.hbm [shape: f32[1,32], index: 18, kind: input, shape index: {}]   ;;  %s11523_s19 = inlined_call_operand.hbm [shape: f32[32,32], index: 19, kind: input, shape index: {}]   ;;  %s11524_s20 = inlined_call_operand.hbm [shape: f32[1,32], index: 20, kind: input, shape index: {}]   ;;  %s11525_s21 = inlined_call_operand.hbm [shape: f32[32,32], index: 21, kind: input, shape index: {}]   ;;  %s11526_s22 = inlined_call_operand.hbm [shape: f32[1,32], index: 22, kind: input, shape index: {}]   ;;  %s11527_s23 = inlined_call_operand.vmem [shape: f32[32,32], index: 23, kind: input, shape index: {}]   ;;  %s11528_s24 = inlined_call_operand.hbm [shape: f32[32,32], index: 24, kind: input, shape index: {}]   ;;  %s11529_s25 = inlined_call_operand.vmem [shape: f32[1,32], index: 25, kind: input, shape index: {}]   ;;  %s11530_s26 = inlined_call_operand.hbm [shape: f32[8,8,32], index: 26, kind: output, shape index: {0}]   ;;  %s11531_s27 = inlined_call_operand.hbm [shape: f32[8,32], index: 27, kind: output, shape index: {1}]  }
   0x1   :  { %11549 = sst [smem:[#allocation51_spill]] %s11504_s0 }
   0x2   :  { %11550 = sst [smem:[#allocation52_spill]] %s11505_s1 }
   0x3   :  { %11551 = sst [smem:[#allocation53_spill]] %s11506_s2 }
   0x4   :  { %11552 = sst [smem:[#allocation54_spill]] %s11507_s3 }
   0x5   :  { %11553 = sst [smem:[#allocation55_spill]] %s11508_s4 }
   0x6   :  { %11554 = sst [smem:[#allocation56_spill]] %s11509_s5 }
   0x7   :  { %11555 = sst [smem:[#allocation57_spill]] %s11510_s6 }
   0x8   :  { %11556 = sst [smem:[#allocation58_spill]] %s11511_s7 }
   0x9   :  { %11557 = sst [smem:[#allocation59_spill]] %s11512_s8 }
   0xa   :  { %11558 = sst [smem:[#allocation60_spill]] %s11513_s9 }
   0xb   :  { %11559 = sst [smem:[#allocation61_spill]] %s11514_s10 }
   0xc   :  { %11560 = sst [smem:[#allocation62_spill]] %s11515_s11 }
   0xd   :  { %11561 = sst [smem:[#allocation63_spill]] %s11529_s25 }
   0xe   :  { %11562 = sst [smem:[#allocation64_spill]] %s11530_s26 }
   0xf   :  { %11563 = sst [smem:[#allocation65_spill]] %s11531_s27 }
  0x10   :  { %33 = vsyncpa [#allocation3], 0 }
  0x11   :  { %34 = vsyncpa [#allocation6], 0 }
  0x12   :  { %35 = vsyncpa [#allocation9], 0 }
  0x13   :  { %36 = vsyncpa [#allocation12], 0 }
  0x14   :  { %37 = vsyncpa [#allocation15], 0 }
  0x15   :  { %38 = vsyncpa [#allocation18], 0 }
  0x16   :  { %39 = vsyncpa [#allocation21], 0 }
  0x17   :  { %40 = vsyncpa [#allocation24], 0 }
  0x18   :  { %41 = vsyncpa [#allocation27], 0 }
  0x19   :  { %42 = vsyncpa [#allocation30], 0 }
  0x1a   :  { %43 = vsyncpa [#allocation33], 0 }
  0x1b   :  { %44 = vsyncpa [#allocation4], 0 }
  0x1c   :  { %45 = vsyncpa [#allocation37], 0  ;;  %s9857_s7 = smov [#allocation5]   ;;  %s9858_s8 = smov [#allocation8]  }
  0x1d   :  { %s63_s4 = sshll.u32 %s9857_s7, 4  ;;  %s88_s30 = sshll.u32 %s9858_s8, 4  ;;  %s64_s4 = int_to_ptr.vmem [resolvable:$true] %s63_s4  ;;  %s89_s30 = int_to_ptr.vmem [resolvable:$true] %s88_s30 }
  0x1e   :  { %s11564_s28 = sld [smem:[#allocation52_spill]] }
  0x24   :  { %s9325_s0 = scalar_lea.hbm %s11564_s28, 1024 }
  0x25   :  { %p9326_p0 = scmp.ne.s32.totalorder %s11564_s28, %s9325_s0  ;;  %p9329_p1 = scmp.lt.u32.totalorder %s9325_s0, %s11564_s28 }
  0x27   :  { %p9331_p2 = pnand %p9329_p1, %p9326_p0 }
  0x29   :  { %9334 = shalt.err (!%p9331_p2)
}
  0x2a   :  { %s9335_s11 = scalar_lea.vmem %s64_s4, 1024  ;;  %p9340_p4 = scmp.lt.s32.totalorder %s64_s4, %s64_s4 }
  0x2b   :  { %p9336_p3 = scmp.ne.s32.totalorder %s64_s4, %s9335_s11  ;;  %p9341_p5 = scmp.lt.s32.totalorder %s9335_s11, %s9335_s11 }
  0x2d   :  { %p9342_p6 = por %p9341_p5, %p9340_p4 }
  0x2f   :  { %p9343_p7 = pnand %p9342_p6, %p9336_p3 }
  0x31   :  { %9346 = shalt.err (!%p9343_p7)
}
  0x32   :  { %s11544_s2 = smov 128   ;;  %s11546_s3 = smov 8  }
  0x33   :  { %69 = dma.hbm_to_vmem [thread:$0]  %s11564_s28, 1024, %s64_s4, [#allocation6], %s11544_s2, %s11544_s2, %s11546_s3  }
  0x34   :  { %s11565_s0 = sld [smem:[#allocation54_spill]] }
  0x3a   :  { %s9347_s10 = scalar_lea.hbm %s11565_s0, 128 }
  0x3b   :  { %p9348_p8 = scmp.ne.s32.totalorder %s11565_s0, %s9347_s10  ;;  %p9351_p9 = scmp.lt.u32.totalorder %s9347_s10, %s11565_s0 }
  0x3d   :  { %p9353_p10 = pnand %p9351_p9, %p9348_p8 }
  0x3f   :  { %9356 = shalt.err (!%p9353_p10)
}
  0x40   :  { %s9357_s27 = scalar_lea.vmem %s89_s30, 128  ;;  %p9362_p12 = scmp.lt.s32.totalorder %s89_s30, %s89_s30 }
  0x41   :  { %p9358_p11 = scmp.ne.s32.totalorder %s89_s30, %s9357_s27  ;;  %p9363_p13 = scmp.lt.s32.totalorder %s9357_s27, %s9357_s27 }
  0x43   :  { %p9364_p0 = por %p9363_p13, %p9362_p12 }
  0x45   :  { %p9365_p1 = pnand %p9364_p0, %p9358_p11 }
  0x47   :  { %9368 = shalt.err (!%p9365_p1)
}
  0x48   :  { %91 = dma.hbm_to_vmem [thread:$0]  %s11565_s0, 128, %s89_s30, [#allocation9]  }
  0x49   :  { %s9861_s7 = smov [#allocation11]   ;;  %s9862_s9 = smov [#allocation14]  }
  0x4a   :  { %s109_s8 = sshll.u32 %s9861_s7, 4  ;;  %s134_s5 = sshll.u32 %s9862_s9, 4  ;;  %s110_s8 = int_to_ptr.vmem [resolvable:$true] %s109_s8  ;;  %s135_s5 = int_to_ptr.vmem [resolvable:$true] %s134_s5 }
  0x4b   :  { %s11566_s1 = sld [smem:[#allocation57_spill]] }
  0x51   :  { %s9369_s6 = scalar_lea.hbm %s11566_s1, 512 }
  0x52   :  { %p9370_p2 = scmp.ne.s32.totalorder %s11566_s1, %s9369_s6  ;;  %p9373_p3 = scmp.lt.u32.totalorder %s9369_s6, %s11566_s1 }
  0x54   :  { %p9375_p4 = pnand %p9373_p3, %p9370_p2 }
  0x56   :  { %9378 = shalt.err (!%p9375_p4)
}
  0x57   :  { %s9379_s30 = scalar_lea.vmem %s110_s8, 512  ;;  %p9384_p6 = scmp.lt.s32.totalorder %s110_s8, %s110_s8 }
  0x58   :  { %p9380_p5 = scmp.ne.s32.totalorder %s110_s8, %s9379_s30  ;;  %p9385_p7 = scmp.lt.s32.totalorder %s9379_s30, %s9379_s30 }
  0x5a   :  { %p9386_p8 = por %p9385_p7, %p9384_p6 }
  0x5c   :  { %p9387_p9 = pnand %p9386_p8, %p9380_p5 }
  0x5e   :  { %9390 = shalt.err (!%p9387_p9)
}
  0x5f   :  { %s11567_s0 = smov 8   ;;  %s11568_s4 = smov 128  }
  0x60   :  { %115 = dma.hbm_to_vmem [thread:$0]  %s11566_s1, 512, %s110_s8, [#allocation12], %s11568_s4, %s11568_s4, %s11567_s0  }
  0x61   :  { %s11569_s3 = sld [smem:[#allocation60_spill]] }
  0x67   :  { %s9391_s10 = scalar_lea.hbm %s11569_s3, 16 }
  0x68   :  { %p9392_p10 = scmp.ne.s32.totalorder %s11569_s3, %s9391_s10  ;;  %p9395_p11 = scmp.lt.u32.totalorder %s9391_s10, %s11569_s3 }
  0x6a   :  { %p9397_p12 = pnand %p9395_p11, %p9392_p10 }
  0x6c   :  { %9400 = shalt.err (!%p9397_p12)
}
  0x6d   :  { %s9401_s30 = scalar_lea.vmem %s135_s5, 16  ;;  %s9405_s25 = scalar_lea.vmem %s135_s5, 32 }
  0x6e   :  { %p9402_p13 = scmp.ne.s32.totalorder %s135_s5, %s9401_s30  ;;  %p9406_p0 = scmp.lt.s32.totalorder %s135_s5, %s135_s5 }
  0x6f   :  { %p9407_p1 = scmp.lt.s32.totalorder %s9405_s25, %s9401_s30 }
  0x71   :  { %p9408_p2 = por %p9407_p1, %p9406_p0 }
  0x73   :  { %p9409_p3 = pnand %p9408_p2, %p9402_p13 }
  0x75   :  { %9412 = shalt.err (!%p9409_p3)
}
  0x76   :  { %137 = dma.hbm_to_vmem [thread:$0]  %s11569_s3, 16, %s135_s5, [#allocation15]  }
  0x77   :  { %s9863_s28 = smov [#allocation17]   ;;  %s9864_s2 = smov [#allocation20]  }
  0x78   :  { %s154_s7 = sshll.u32 %s9863_s28, 4  ;;  %s175_s9 = sshll.u32 %s9864_s2, 4  ;;  %s155_s7 = int_to_ptr.vmem [resolvable:$true] %s154_s7  ;;  %s10083_s9 = int_to_ptr.vmem [resolvable:$true] %s175_s9 }
  0x79   :  { %s11570_s6 = sld [smem:[#allocation62_spill]] }
  0x7f   :  { %s9413_s11 = scalar_lea.hbm %s11570_s6, 16 }
  0x80   :  { %p9414_p4 = scmp.ne.s32.totalorder %s11570_s6, %s9413_s11  ;;  %p9417_p5 = scmp.lt.u32.totalorder %s9413_s11, %s11570_s6 }
  0x82   :  { %p9419_p6 = pnand %p9417_p5, %p9414_p4 }
  0x84   :  { %9422 = shalt.err (!%p9419_p6)
}
  0x85   :  { %s9423_s5 = scalar_lea.vmem %s155_s7, 16  ;;  %s9427_s3 = scalar_lea.vmem %s155_s7, 32 }
  0x86   :  { %p9424_p7 = scmp.ne.s32.totalorder %s155_s7, %s9423_s5  ;;  %p9428_p8 = scmp.lt.s32.totalorder %s155_s7, %s155_s7 }
  0x87   :  { %p9429_p9 = scmp.lt.s32.totalorder %s9427_s3, %s9423_s5 }
  0x89   :  { %p9430_p10 = por %p9429_p9, %p9428_p8 }
  0x8b   :  { %p9431_p11 = pnand %p9430_p10, %p9424_p7 }
  0x8d   :  { %9434 = shalt.err (!%p9431_p11)
}
  0x8e   :  { %157 = dma.hbm_to_vmem [thread:$0]  %s11570_s6, 16, %s155_s7, [#allocation18]  }
  0x8f   :  { %s9435_s10 = scalar_lea.hbm %s11517_s13, 1536 }
  0x90   :  { %p9436_p12 = scmp.ne.s32.totalorder %s11517_s13, %s9435_s10  ;;  %p9439_p13 = scmp.lt.u32.totalorder %s9435_s10, %s11517_s13 }
  0x92   :  { %p9441_p0 = pnand %p9439_p13, %p9436_p12 }
  0x94   :  { %9444 = shalt.err (!%p9441_p0)
}
  0x95   :  { %s9445_s25 = scalar_lea.vmem %s10083_s9, 1536  ;;  %p9450_p2 = scmp.lt.s32.totalorder %s10083_s9, %s10083_s9 }
  0x96   :  { %p9446_p1 = scmp.ne.s32.totalorder %s10083_s9, %s9445_s25  ;;  %p9451_p3 = scmp.lt.s32.totalorder %s9445_s25, %s9445_s25 }
  0x98   :  { %p9452_p4 = por %p9451_p3, %p9450_p2 }
  0x9a   :  { %p9453_p5 = pnand %p9452_p4, %p9446_p1 }
  0x9c   :  { %9456 = shalt.err (!%p9453_p5)
}
  0x9d   :  { %181 = dma.hbm_to_vmem [thread:$0]  %s11517_s13, 1536, %s10083_s9, [#allocation21], %s11568_s4, %s11568_s4, %s11567_s0  }
  0x9e   :  { %s9865_s30 = smov [#allocation23]   ;;  %s9866_s3 = smov [#allocation26]  }
  0x9f   :  { %s199_s5 = sshll.u32 %s9865_s30, 4  ;;  %s226_s8 = sshll.u32 %s9866_s3, 4  ;;  %s200_s5 = int_to_ptr.vmem [resolvable:$true] %s199_s5  ;;  %s227_s8 = int_to_ptr.vmem [resolvable:$true] %s226_s8 }
  0xa0   :  { %s9457_s2 = scalar_lea.hbm %s11519_s15, 1536 }
  0xa1   :  { %p9458_p6 = scmp.ne.s32.totalorder %s11519_s15, %s9457_s2  ;;  %p9461_p7 = scmp.lt.u32.totalorder %s9457_s2, %s11519_s15 }
  0xa3   :  { %p9463_p8 = pnand %p9461_p7, %p9458_p6 }
  0xa5   :  { %9466 = shalt.err (!%p9463_p8)
}
  0xa6   :  { %s9467_s13 = scalar_lea.vmem %s200_s5, 1536  ;;  %p9472_p10 = scmp.lt.s32.totalorder %s200_s5, %s200_s5 }
  0xa7   :  { %p9468_p9 = scmp.ne.s32.totalorder %s200_s5, %s9467_s13  ;;  %p9473_p11 = scmp.lt.s32.totalorder %s9467_s13, %s9467_s13 }
  0xa9   :  { %p9474_p12 = por %p9473_p11, %p9472_p10 }
  0xab   :  { %p9475_p13 = pnand %p9474_p12, %p9468_p9 }
  0xad   :  { %9478 = shalt.err (!%p9475_p13)
}
  0xae   :  { %205 = dma.hbm_to_vmem [thread:$0]  %s11519_s15, 1536, %s200_s5, [#allocation24], %s11568_s4, %s11568_s4, %s11567_s0  }
  0xaf   :  { %s9479_s6 = scalar_lea.hbm %s11522_s18, 16 }
  0xb0   :  { %p9480_p0 = scmp.ne.s32.totalorder %s11522_s18, %s9479_s6  ;;  %p9483_p1 = scmp.lt.u32.totalorder %s9479_s6, %s11522_s18 }
  0xb2   :  { %p9485_p2 = pnand %p9483_p1, %p9480_p0 }
  0xb4   :  { %9488 = shalt.err (!%p9485_p2)
}
  0xb5   :  { %s9489_s2 = scalar_lea.vmem %s227_s8, 16  ;;  %s9493_s10 = scalar_lea.vmem %s227_s8, 32 }
  0xb6   :  { %p9490_p3 = scmp.ne.s32.totalorder %s227_s8, %s9489_s2  ;;  %p9494_p4 = scmp.lt.s32.totalorder %s227_s8, %s227_s8 }
  0xb7   :  { %p9495_p5 = scmp.lt.s32.totalorder %s9493_s10, %s9489_s2 }
  0xb9   :  { %p9496_p6 = por %p9495_p5, %p9494_p4 }
  0xbb   :  { %p9497_p7 = pnand %p9496_p6, %p9490_p3 }
  0xbd   :  { %9500 = shalt.err (!%p9497_p7)
}
  0xbe   :  { %229 = dma.hbm_to_vmem [thread:$0]  %s11522_s18, 16, %s227_s8, [#allocation27]  }
  0xbf   :  { %s9867_s26 = smov [#allocation29]   ;;  %s9868_s11 = smov [#allocation32]  }
  0xc0   :  { %s248_s29 = sshll.u32 %s9867_s26, 4  ;;  %s270_s13 = sshll.u32 %s9868_s11, 4  ;;  %s249_s29 = int_to_ptr.vmem [resolvable:$true] %s248_s29  ;;  %s271_s13 = int_to_ptr.vmem [resolvable:$true] %s270_s13 }
  0xc1   :  { %s9501_s25 = scalar_lea.hbm %s11524_s20, 16 }
  0xc2   :  { %p9502_p8 = scmp.ne.s32.totalorder %s11524_s20, %s9501_s25  ;;  %p9505_p9 = scmp.lt.u32.totalorder %s9501_s25, %s11524_s20 }
  0xc4   :  { %p9507_p10 = pnand %p9505_p9, %p9502_p8 }
  0xc6   :  { %9510 = shalt.err (!%p9507_p10)
}
  0xc7   :  { %s9511_s18 = scalar_lea.vmem %s249_s29, 16  ;;  %s9515_s8 = scalar_lea.vmem %s249_s29, 32 }
  0xc8   :  { %p9512_p11 = scmp.ne.s32.totalorder %s249_s29, %s9511_s18  ;;  %p9516_p12 = scmp.lt.s32.totalorder %s249_s29, %s249_s29 }
  0xc9   :  { %p9517_p13 = scmp.lt.s32.totalorder %s9515_s8, %s9511_s18 }
  0xcb   :  { %p9518_p0 = por %p9517_p13, %p9516_p12 }
  0xcd   :  { %p9519_p1 = pnand %p9518_p0, %p9512_p11 }
  0xcf   :  { %9522 = shalt.err (!%p9519_p1)
}
  0xd0   :  { %251 = dma.hbm_to_vmem [thread:$0]  %s11524_s20, 16, %s249_s29, [#allocation30]  }
  0xd1   :  { %s9523_s15 = scalar_lea.hbm %s11526_s22, 16 }
  0xd2   :  { %p9524_p2 = scmp.ne.s32.totalorder %s11526_s22, %s9523_s15  ;;  %p9527_p3 = scmp.lt.u32.totalorder %s9523_s15, %s11526_s22 }
  0xd4   :  { %p9529_p4 = pnand %p9527_p3, %p9524_p2 }
  0xd6   :  { %9532 = shalt.err (!%p9529_p4)
}
  0xd7   :  { %s9533_s27 = scalar_lea.vmem %s271_s13, 16  ;;  %s9537_s25 = scalar_lea.vmem %s271_s13, 32 }
  0xd8   :  { %p9534_p5 = scmp.ne.s32.totalorder %s271_s13, %s9533_s27  ;;  %p9538_p6 = scmp.lt.s32.totalorder %s271_s13, %s271_s13 }
  0xd9   :  { %p9539_p7 = scmp.lt.s32.totalorder %s9537_s25, %s9533_s27 }
  0xdb   :  { %p9540_p8 = por %p9539_p7, %p9538_p6 }
  0xdd   :  { %p9541_p9 = pnand %p9540_p8, %p9534_p5 }
  0xdf   :  { %9544 = shalt.err (!%p9541_p9)
}
  0xe0   :  { %273 = dma.hbm_to_vmem [thread:$0]  %s11526_s22, 16, %s271_s13, [#allocation33]  }
  0xe1   :  { %s9869_s7 = smov [#allocation2]   ;;  %s9870_s30 = smov [#allocation7]  }
  0xe2   :  { %s51_s6 = sshll.u32 %s9869_s7, 4  ;;  %s75_s3 = sshll.u32 %s9870_s30, 4  ;;  %s52_s6 = int_to_ptr.vmem [resolvable:$true] %s51_s6  ;;  %s10168_s3 = int_to_ptr.vmem [resolvable:$true] %s75_s3 }
  0xe3   :  { %s11571_s1 = sld [smem:[#allocation51_spill]] }
  0xe9   :  { %s9545_s28 = scalar_lea.hbm %s11571_s1, 1024 }
  0xea   :  { %p9546_p10 = scmp.ne.s32.totalorder %s11571_s1, %s9545_s28  ;;  %p9549_p11 = scmp.lt.u32.totalorder %s9545_s28, %s11571_s1 }
  0xec   :  { %p9551_p12 = pnand %p9549_p11, %p9546_p10 }
  0xee   :  { %9554 = shalt.err (!%p9551_p12)
}
  0xef   :  { %s9555_s22 = scalar_lea.vmem %s52_s6, 1024  ;;  %p9560_p0 = scmp.lt.s32.totalorder %s52_s6, %s52_s6 }
  0xf0   :  { %p9556_p13 = scmp.ne.s32.totalorder %s52_s6, %s9555_s22  ;;  %p9561_p1 = scmp.lt.s32.totalorder %s9555_s22, %s9555_s22 }
  0xf2   :  { %p9562_p2 = por %p9561_p1, %p9560_p0 }
  0xf4   :  { %p9563_p3 = pnand %p9562_p2, %p9556_p13 }
  0xf6   :  { %9566 = shalt.err (!%p9563_p3)
}
  0xf7   :  { %57 = dma.hbm_to_vmem [thread:$0]  %s11571_s1, 1024, %s52_s6, [#allocation3], %s11568_s4, %s11568_s4, %s11567_s0  }
  0xf8   :  { %s11572_s27 = sld [smem:[#allocation53_spill]] }
  0xfe   :  { %s9567_s25 = scalar_lea.hbm %s11572_s27, 1024 }
  0xff   :  { %p9568_p4 = scmp.ne.s32.totalorder %s11572_s27, %s9567_s25  ;;  %p9571_p5 = scmp.lt.u32.totalorder %s9567_s25, %s11572_s27 }
 0x101   :  { %p9573_p6 = pnand %p9571_p5, %p9568_p4 }
 0x103   :  { %9576 = shalt.err (!%p9573_p6)
}
 0x104   :  { %s9577_s18 = scalar_lea.vmem %s10168_s3, 1024  ;;  %p9582_p8 = scmp.lt.s32.totalorder %s10168_s3, %s10168_s3 }
 0x105   :  { %p9578_p7 = scmp.ne.s32.totalorder %s10168_s3, %s9577_s18  ;;  %p9583_p9 = scmp.lt.s32.totalorder %s9577_s18, %s9577_s18 }
 0x107   :  { %p9584_p10 = por %p9583_p9, %p9582_p8 }
 0x109   :  { %p9585_p11 = pnand %p9584_p10, %p9578_p7 }
 0x10b   :  { %9588 = shalt.err (!%p9585_p11)
}
 0x10c   :  { %81 = dma.hbm_to_vmem [thread:$0]  %s11572_s27, 1024, %s10168_s3, [#allocation6], %s11568_s4, %s11568_s4, %s11567_s0  }
 0x10d   :  { %s9871_s1 = smov [#allocation10]   ;;  %s9872_s2 = smov [#allocation13]  }
 0x10e   :  { %s100_s28 = sshll.u32 %s9871_s1, 4  ;;  %s122_s10 = sshll.u32 %s9872_s2, 4  ;;  %s101_s28 = int_to_ptr.vmem [resolvable:$true] %s100_s28  ;;  %s123_s10 = int_to_ptr.vmem [resolvable:$true] %s122_s10 }
 0x10f   :  { %s11573_s22 = sld [smem:[#allocation56_spill]] }
 0x115   :  { %s9589_s13 = scalar_lea.hbm %s11573_s22, 128 }
 0x116   :  { %p9590_p12 = scmp.ne.s32.totalorder %s11573_s22, %s9589_s13  ;;  %p9593_p13 = scmp.lt.u32.totalorder %s9589_s13, %s11573_s22 }
 0x118   :  { %p9595_p0 = pnand %p9593_p13, %p9590_p12 }
 0x11a   :  { %9598 = shalt.err (!%p9595_p0)
}
 0x11b   :  { %s9599_s3 = scalar_lea.vmem %s101_s28, 128  ;;  %p9604_p2 = scmp.lt.s32.totalorder %s101_s28, %s101_s28 }
 0x11c   :  { %p9600_p1 = scmp.ne.s32.totalorder %s101_s28, %s9599_s3  ;;  %p9605_p3 = scmp.lt.s32.totalorder %s9599_s3, %s9599_s3 }
 0x11e   :  { %p9606_p4 = por %p9605_p3, %p9604_p2 }
 0x120   :  { %p9607_p5 = pnand %p9606_p4, %p9600_p1 }
 0x122   :  { %9610 = shalt.err (!%p9607_p5)
}
 0x123   :  { %103 = dma.hbm_to_vmem [thread:$0]  %s11573_s22, 128, %s101_s28, [#allocation9]  }
 0x124   :  { %s11574_s30 = sld [smem:[#allocation58_spill]] }
 0x12a   :  { %s9611_s18 = scalar_lea.hbm %s11574_s30, 16 }
 0x12b   :  { %p9612_p6 = scmp.ne.s32.totalorder %s11574_s30, %s9611_s18  ;;  %p9615_p7 = scmp.lt.u32.totalorder %s9611_s18, %s11574_s30 }
 0x12d   :  { %p9617_p8 = pnand %p9615_p7, %p9612_p6 }
 0x12f   :  { %9620 = shalt.err (!%p9617_p8)
}
 0x130   :  { %s9621_s15 = scalar_lea.vmem %s123_s10, 16  ;;  %s9625_s5 = scalar_lea.vmem %s123_s10, 32 }
 0x131   :  { %p9622_p9 = scmp.ne.s32.totalorder %s123_s10, %s9621_s15  ;;  %p9626_p10 = scmp.lt.s32.totalorder %s123_s10, %s123_s10 }
 0x132   :  { %p9627_p11 = scmp.lt.s32.totalorder %s9625_s5, %s9621_s15 }
 0x134   :  { %p9628_p12 = por %p9627_p11, %p9626_p10 }
 0x136   :  { %p9629_p13 = pnand %p9628_p12, %p9622_p9 }
 0x138   :  { %9632 = shalt.err (!%p9629_p13)
}
 0x139   :  { %125 = dma.hbm_to_vmem [thread:$0]  %s11574_s30, 16, %s123_s10, [#allocation12]  }
 0x13a   :  { %s9873_s13 = smov [#allocation16]   ;;  %s9874_s11 = smov [#allocation19]  }
 0x13b   :  { %s144_s26 = sshll.u32 %s9873_s13, 4  ;;  %s163_s9 = sshll.u32 %s9874_s11, 4  ;;  %s145_s26 = int_to_ptr.vmem [resolvable:$true] %s144_s26  ;;  %s10229_s9 = int_to_ptr.vmem [resolvable:$true] %s163_s9 }
 0x13c   :  { %s11575_s27 = sld [smem:[#allocation61_spill]] }
 0x142   :  { %s9633_s20 = scalar_lea.hbm %s11575_s27, 16 }
 0x143   :  { %p9634_p0 = scmp.ne.s32.totalorder %s11575_s27, %s9633_s20  ;;  %p9637_p1 = scmp.lt.u32.totalorder %s9633_s20, %s11575_s27 }
 0x145   :  { %p9639_p2 = pnand %p9637_p1, %p9634_p0 }
 0x147   :  { %9642 = shalt.err (!%p9639_p2)
}
 0x148   :  { %s9643_s10 = scalar_lea.vmem %s145_s26, 16  ;;  %s9647_s30 = scalar_lea.vmem %s145_s26, 32 }
 0x149   :  { %p9644_p3 = scmp.ne.s32.totalorder %s145_s26, %s9643_s10  ;;  %p9648_p4 = scmp.lt.s32.totalorder %s145_s26, %s145_s26 }
 0x14a   :  { %p9649_p5 = scmp.lt.s32.totalorder %s9647_s30, %s9643_s10 }
 0x14c   :  { %p9650_p6 = por %p9649_p5, %p9648_p4 }
 0x14e   :  { %p9651_p7 = pnand %p9650_p6, %p9644_p3 }
 0x150   :  { %9654 = shalt.err (!%p9651_p7)
}
 0x151   :  { %147 = dma.hbm_to_vmem [thread:$0]  %s11575_s27, 16, %s145_s26, [#allocation15]  }
 0x152   :  { %s9655_s5 = scalar_lea.hbm %s11516_s12, 1536 }
 0x153   :  { %p9656_p8 = scmp.ne.s32.totalorder %s11516_s12, %s9655_s5  ;;  %p9659_p9 = scmp.lt.u32.totalorder %s9655_s5, %s11516_s12 }
 0x155   :  { %p9661_p10 = pnand %p9659_p9, %p9656_p8 }
 0x157   :  { %9664 = shalt.err (!%p9661_p10)
}
 0x158   :  { %s9665_s25 = scalar_lea.vmem %s10229_s9, 1536  ;;  %p9670_p12 = scmp.lt.s32.totalorder %s10229_s9, %s10229_s9 }
 0x159   :  { %p9666_p11 = scmp.ne.s32.totalorder %s10229_s9, %s9665_s25  ;;  %p9671_p13 = scmp.lt.s32.totalorder %s9665_s25, %s9665_s25 }
 0x15b   :  { %p9672_p0 = por %p9671_p13, %p9670_p12 }
 0x15d   :  { %p9673_p1 = pnand %p9672_p0, %p9666_p11 }
 0x15f   :  { %9676 = shalt.err (!%p9673_p1)
}
 0x160   :  { %169 = dma.hbm_to_vmem [thread:$0]  %s11516_s12, 1536, %s10229_s9, [#allocation18], %s11568_s4, %s11568_s4, %s11567_s0  }
 0x161   :  { %s9875_s27 = smov [#allocation22]   ;;  %s9677_s18 = scalar_lea.hbm %s11518_s14, 48 }
 0x162   :  { %s187_s20 = sshll.u32 %s9875_s27, 4  ;;  %p9678_p2 = scmp.ne.s32.totalorder %s11518_s14, %s9677_s18  ;;  %s188_s20 = int_to_ptr.vmem [resolvable:$true] %s187_s20 }
 0x163   :  { %p9681_p3 = scmp.lt.u32.totalorder %s9677_s18, %s11518_s14 }
 0x165   :  { %p9683_p4 = pnand %p9681_p3, %p9678_p2 }
 0x167   :  { %9686 = shalt.err (!%p9683_p4)
}
 0x168   :  { %s9687_s1 = scalar_lea.vmem %s188_s20, 48  ;;  %s9691_s12 = scalar_lea.vmem %s188_s20, 64 }
 0x169   :  { %p9688_p5 = scmp.ne.s32.totalorder %s188_s20, %s9687_s1  ;;  %p9692_p6 = scmp.lt.s32.totalorder %s188_s20, %s188_s20 }
 0x16a   :  { %p9693_p7 = scmp.lt.s32.totalorder %s9691_s12, %s9687_s1 }
 0x16c   :  { %p9694_p8 = por %p9693_p7, %p9692_p6 }
 0x16e   :  { %p9695_p9 = pnand %p9694_p8, %p9688_p5 }
 0x170   :  { %9698 = shalt.err (!%p9695_p9)
}
 0x171   :  { %s9876_s9 = smov 16   ;;  %s9877_s2 = smov 1  }
 0x172   :  { %193 = dma.hbm_to_vmem [thread:$0]  %s11518_s14, 48, %s188_s20, [#allocation21], %s9876_s9, %s9876_s9, %s9877_s2  }
 0x173   :  { %s9878_s28 = smov [#allocation25]   ;;  %s9879_s13 = smov [#allocation28]  }
 0x174   :  { %s211_s22 = sshll.u32 %s9878_s28, 4  ;;  %s235_s11 = sshll.u32 %s9879_s13, 4  ;;  %s212_s22 = int_to_ptr.vmem [resolvable:$true] %s211_s22  ;;  %s236_s11 = int_to_ptr.vmem [resolvable:$true] %s235_s11 }
 0x175   :  { %s9699_s3 = scalar_lea.hbm %s11520_s16, 48 }
 0x176   :  { %p9700_p10 = scmp.ne.s32.totalorder %s11520_s16, %s9699_s3  ;;  %p9703_p11 = scmp.lt.u32.totalorder %s9699_s3, %s11520_s16 }
 0x178   :  { %p9705_p12 = pnand %p9703_p11, %p9700_p10 }
 0x17a   :  { %9708 = shalt.err (!%p9705_p12)
}
 0x17b   :  { %s9709_s14 = scalar_lea.vmem %s212_s22, 48  ;;  %s9713_s20 = scalar_lea.vmem %s212_s22, 64 }
 0x17c   :  { %p9710_p13 = scmp.ne.s32.totalorder %s212_s22, %s9709_s14  ;;  %p9714_p0 = scmp.lt.s32.totalorder %s212_s22, %s212_s22 }
 0x17d   :  { %p9715_p1 = scmp.lt.s32.totalorder %s9713_s20, %s9709_s14 }
 0x17f   :  { %p9716_p2 = por %p9715_p1, %p9714_p0 }
 0x181   :  { %p9717_p3 = pnand %p9716_p2, %p9710_p13 }
 0x183   :  { %9720 = shalt.err (!%p9717_p3)
}
 0x184   :  { %217 = dma.hbm_to_vmem [thread:$0]  %s11520_s16, 48, %s212_s22, [#allocation24], %s9876_s9, %s9876_s9, %s9877_s2  }
 0x185   :  { %s9721_s1 = scalar_lea.hbm %s11523_s19, 512 }
 0x186   :  { %p9722_p4 = scmp.ne.s32.totalorder %s11523_s19, %s9721_s1  ;;  %p9725_p5 = scmp.lt.u32.totalorder %s9721_s1, %s11523_s19 }
 0x188   :  { %p9727_p6 = pnand %p9725_p5, %p9722_p4 }
 0x18a   :  { %9730 = shalt.err (!%p9727_p6)
}
 0x18b   :  { %s9731_s13 = scalar_lea.vmem %s236_s11, 512  ;;  %p9736_p8 = scmp.lt.s32.totalorder %s236_s11, %s236_s11 }
 0x18c   :  { %p9732_p7 = scmp.ne.s32.totalorder %s236_s11, %s9731_s13  ;;  %p9737_p9 = scmp.lt.s32.totalorder %s9731_s13, %s9731_s13 }
 0x18e   :  { %p9738_p10 = por %p9737_p9, %p9736_p8 }
 0x190   :  { %p9739_p11 = pnand %p9738_p10, %p9732_p7 }
 0x192   :  { %9742 = shalt.err (!%p9739_p11)
}
 0x193   :  { %241 = dma.hbm_to_vmem [thread:$0]  %s11523_s19, 512, %s236_s11, [#allocation27], %s11568_s4, %s11568_s4, %s11567_s0  }
 0x194   :  { %s9880_s2 = smov [#allocation31]   ;;  %s9881_s25 = smov [#allocation34]  }
 0x195   :  { %s257_s22 = sshll.u32 %s9880_s2, 4  ;;  %s281_s26 = sshll.u32 %s9881_s25, 4  ;;  %s258_s22 = int_to_ptr.vmem [resolvable:$true] %s257_s22  ;;  %s282_s26 = int_to_ptr.vmem [resolvable:$true] %s281_s26 }
 0x196   :  { %s9743_s29 = scalar_lea.hbm %s11525_s21, 512 }
 0x197   :  { %p9744_p12 = scmp.ne.s32.totalorder %s11525_s21, %s9743_s29  ;;  %p9747_p13 = scmp.lt.u32.totalorder %s9743_s29, %s11525_s21 }
 0x199   :  { %p9749_p0 = pnand %p9747_p13, %p9744_p12 }
 0x19b   :  { %9752 = shalt.err (!%p9749_p0)
}
 0x19c   :  { %s9753_s19 = scalar_lea.vmem %s258_s22, 512  ;;  %p9758_p2 = scmp.lt.s32.totalorder %s258_s22, %s258_s22 }
 0x19d   :  { %p9754_p1 = scmp.ne.s32.totalorder %s258_s22, %s9753_s19  ;;  %p9759_p3 = scmp.lt.s32.totalorder %s9753_s19, %s9753_s19 }
 0x19f   :  { %p9760_p4 = por %p9759_p3, %p9758_p2 }
 0x1a1   :  { %p9761_p5 = pnand %p9760_p4, %p9754_p1 }
 0x1a3   :  { %9764 = shalt.err (!%p9761_p5)
}
 0x1a4   :  { %263 = dma.hbm_to_vmem [thread:$0]  %s11525_s21, 512, %s258_s22, [#allocation30], %s11568_s4, %s11568_s4, %s11567_s0  }
 0x1a5   :  { %s9765_s8 = scalar_lea.hbm %s11528_s24, 512 }
 0x1a6   :  { %p9766_p6 = scmp.ne.s32.totalorder %s11528_s24, %s9765_s8  ;;  %p9769_p7 = scmp.lt.u32.totalorder %s9765_s8, %s11528_s24 }
 0x1a8   :  { %p9771_p8 = pnand %p9769_p7, %p9766_p6 }
 0x1aa   :  { %9774 = shalt.err (!%p9771_p8)
}
 0x1ab   :  { %s9775_s28 = scalar_lea.vmem %s282_s26, 512  ;;  %p9780_p10 = scmp.lt.s32.totalorder %s282_s26, %s282_s26 }
 0x1ac   :  { %p9776_p9 = scmp.ne.s32.totalorder %s282_s26, %s9775_s28  ;;  %p9781_p11 = scmp.lt.s32.totalorder %s9775_s28, %s9775_s28 }
 0x1ae   :  { %p9782_p12 = por %p9781_p11, %p9780_p10 }
 0x1b0   :  { %p9783_p13 = pnand %p9782_p12, %p9776_p9 }
 0x1b2   :  { %9786 = shalt.err (!%p9783_p13)
}
 0x1b3   :  { %287 = dma.hbm_to_vmem [thread:$0]  %s11528_s24, 512, %s282_s26, [#allocation33], %s11568_s4, %s11568_s4, %s11567_s0  }
 0x1b4   :  { %9831 = dma.done.wait [#allocation3], 1024  }
 0x1b5   :  { %9832 = vsyncadd [#allocation3], 4294966272 }
 0x1b6   :  { %9833 = dma.done.wait [#allocation6], 2048  }
 0x1b7   :  { %9834 = vsyncadd [#allocation6], 4294965248 }
 0x1b8   :  { %9835 = dma.done.wait [#allocation9], 256  }
 0x1b9   :  { %9836 = vsyncadd [#allocation9], 4294967040 }
 0x1ba   :  { %9837 = dma.done.wait [#allocation12], 528  }
 0x1bb   :  { %9838 = vsyncadd [#allocation12], 4294966768 }
 0x1bc   :  { %9839 = dma.done.wait [#allocation15], 32  }
 0x1bd   :  { %9840 = vsyncadd [#allocation15], 4294967264 }
 0x1be   :  { %9841 = dma.done.wait [#allocation18], 1552  }
 0x1bf   :  { %9842 = vsyncadd [#allocation18], 4294965744 }
 0x1c0   :  { %9843 = dma.done.wait [#allocation21], 1584  }
 0x1c1   :  { %9844 = vsyncadd [#allocation21], 4294965712 }
 0x1c2   :  { %9845 = dma.done.wait [#allocation24], 1584  }
 0x1c3   :  { %9846 = vsyncadd [#allocation24], 4294965712 }
 0x1c4   :  { %9847 = dma.done.wait [#allocation27], 528  }
 0x1c5   :  { %9848 = vsyncadd [#allocation27], 4294966768 }
 0x1c6   :  { %9849 = dma.done.wait [#allocation30], 528  }
 0x1c7   :  { %9850 = vsyncadd [#allocation30], 4294966768 }
 0x1c8   :  { %9851 = dma.done.wait [#allocation33], 528  }
 0x1c9   :  { %9852 = vsyncadd [#allocation33], 4294966768  ;;  %vm447_vm0 = vcmask 261120   ;;  %v369_v0 = vld [vmem:[#allocation11] sm:$0xff]  ;;  %v370_v1 = vld [vmem:[#allocation11 + $0x8] sm:$0xff]  ;;  %s11576_s9 = sld [smem:[#allocation59_spill]] }
 0x1ca   :  { %v371_v2 = vld [vmem:[#allocation11 + $0x10] sm:$0xff]  ;;  %v10332_v3 = vpack.c.bf16 %v370_v1, %v369_v0  ;;  %v372_v4 = vld [vmem:[#allocation11 + $0x18] sm:$0xff]  ;;  %v10367_v14 = vld [vmem:[#allocation7 + $0x10] sm:$0xff]  ;;  %v9882_v20 = vmov 0.0   ;;  %vm9883_vm1 = vmmov 0   ;;  %vm688_vm2 = vcmask 64512  }
 0x1cb   :  { %v10334_v5 = vld [vmem:[#allocation7] sm:$0xff]  ;;  %v10336_v6 = vpack.c.bf16 %v372_v4, %v371_v2  ;;  %v10364_v13 = vld [vmem:[#allocation7 + $0x8] sm:$0xff]  ;;  %v10374_v15 = vld [vmem:[#allocation7 + $0x18] sm:$0xff]  ;;  %s11577_s18 = sld [smem:[#allocation55_spill]]  ;;  %vm6458_vm12 = vcmask 1041409   ;;  %vm6460_vm13 = vcmask 1042434  }
 0x1cc   :  { %8011 = vmatprep.mubr.msk.f32.mxu0 %vm447_vm0, %v10334_v5  ;;  %8031 = vmatprep.mubr.msk.f32.mxu1 %vm447_vm0, %v10334_v5  ;;  %v10376_v16 = vld [vmem:[#allocation7 + $0x20] sm:$0xff]  ;;  %v10386_v17 = vld [vmem:[#allocation7 + $0x28] sm:$0xff]  ;;  %v10388_v18 = vld [vmem:[#allocation7 + $0x30] sm:$0xff]  ;;  %vm6462_vm14 = vcmask 1043459   ;;  %vm6464_vm15 = vcmask 1044484  }
 0x1cd   :  { %8717 = vmatprep.subr.bf16.mxu0 %v10332_v3  ;;  %v10398_v19 = vld [vmem:[#allocation7 + $0x38] sm:$0xff]  ;;  %v7322_v21 = vld [vmem:[#allocation13] ss:$0 sm:$0xff]  ;;  %v353_v25 = vld [vmem:[#allocation2] sm:$0xff] }
 0x1ce   :  { %8719 = vmatpush3.bf16.msra.mxu0 %v10332_v3  ;;  %v354_v33 = vld [vmem:[#allocation2 + $0x8] sm:$0xff]  ;;  %v355_v34 = vld [vmem:[#allocation2 + $0x10] sm:$0xff]  ;;  %v356_v41 = vld [vmem:[#allocation2 + $0x18] sm:$0xff] }
 0x1cf   :  { %v374_v7 = vld [vmem:[%s11576_s9] sm:$0xff]  ;;  %v375_v8 = vld [vmem:[%s11576_s9 + $0x8] sm:$0xff]  ;;  %v376_v10 = vld [vmem:[%s11576_s9 + $0x10] sm:$0xff]  ;;  %8721 = vmatprep.subr.bf16.mxu0 %v10336_v6 }
 0x1d0   :  { %v10350_v9 = vpack.c.bf16 %v375_v8, %v374_v7  ;;  %v377_v11 = vld [vmem:[%s11576_s9 + $0x18] sm:$0xff]  ;;  %v357_v42 = vld [vmem:[#allocation2 + $0x20] sm:$0xff]  ;;  %v7331_v47 = vld [vmem:[#allocation14] ss:$0 sm:$0xff] }
 0x1d1   :  { %v10360_v12 = vpack.c.bf16 %v377_v11, %v376_v10  ;;  %v358_v50 = vld [vmem:[#allocation2 + $0x28] sm:$0xff]  ;;  %v359_v51 = vld [vmem:[#allocation2 + $0x30] sm:$0xff]  ;;  %v360_v56 = vld [vmem:[#allocation2 + $0x38] sm:$0xff] }
 0x1d2   :  { %8725 = vmatprep.subr.bf16.mxu1 %v10350_v9  ;;  %8723 = vmatpush3.bf16.msra.mxu0 %v10336_v6  ;;  %v361_v57 = vld [vmem:[#allocation5] sm:$0xff]  ;;  %v362_v60 = vld [vmem:[#allocation5 + $0x8] sm:$0xff]  ;;  %v363_v61 = vld [vmem:[#allocation5 + $0x10] sm:$0xff] }
 0x1d3   :  { %8727 = vmatpush3.bf16.msra.mxu1 %v10350_v9  ;;  %8053 = vmatprep.subr.mxu0 %v9882_v20  ;;  %v364_v0 = vld [vmem:[#allocation5 + $0x18] sm:$0xff]  ;;  %v365_v1 = vld [vmem:[#allocation5 + $0x20] sm:$0xff]  ;;  %v366_v7 = vld [vmem:[#allocation5 + $0x28] sm:$0xff] }
 0x1d4   :  { %8729 = vmatprep.subr.bf16.mxu1 %v10360_v12  ;;  %v367_v8 = vld [vmem:[#allocation5 + $0x30] sm:$0xff]  ;;  %v368_v10 = vld [vmem:[#allocation5 + $0x38] sm:$0xff] }
 0x1d5   :  { %8012 = vmatmul.mubr.msk.f32.vlgmr.msra.gmra.mrb[0].mxu0 %vm447_vm0, %v10364_v13  ;;  %v395_v11 = vld [vmem:[#allocation20] sm:$0xff] }
 0x1d6   :  { %8014 = vmatprep.mubr.msk.f32.mxu0 %vm447_vm0, %v10367_v14 }
 0x1d7   :  { %8731 = vmatpush3.bf16.msra.mxu1 %v10360_v12 }
 0x1d8   :  { %8043 = vmatprep.subr.mxu1 %v9882_v20 }
 0x1d9   :  { %8015 = vmatmul.mubr.msk.f32.gmra.mrb[2].mxu0 %vm447_vm0, %v10374_v15 }
 0x1da   :  { %8032 = vmatmul.mubr.msk.f32.vlgmr.msra.gmra.mrb[0].mxu1 %vm447_vm0, %v10364_v13  ;;  %8017 = vmatprep.mubr.msk.f32.mxu0 %vm447_vm0, %v10376_v16 }
 0x1db   :  { %8034 = vmatprep.mubr.msk.f32.mxu1 %vm447_vm0, %v10367_v14 }
 0x1dd   :  { %8018 = vmatmul.mubr.msk.f32.gmra.mrb[4].mxu0 %vm447_vm0, %v10386_v17 }
 0x1de   :  { %8035 = vmatmul.mubr.msk.f32.gmra.mrb[2].mxu1 %vm447_vm0, %v10374_v15  ;;  %8020 = vmatprep.mubr.msk.f32.mxu0 %vm447_vm0, %v10388_v18 }
 0x1df   :  { %8037 = vmatprep.mubr.msk.f32.mxu1 %vm447_vm0, %v10376_v16 }
 0x1e1   :  { %8021 = vmatmul.mubr.msk.f32.gmra.mrb[6].mxu0 %vm447_vm0, %v10398_v19 }
 0x1e2   :  { %8038 = vmatmul.mubr.msk.f32.gmra.mrb[4].mxu1 %vm447_vm0, %v10386_v17  ;;  %8055 = vmatprep.mubr.msk.f32.mxu0 %vm9883_vm1, %v9882_v20 }
 0x1e3   :  { %8040 = vmatprep.mubr.msk.f32.mxu1 %vm447_vm0, %v10388_v18 }
 0x1e6   :  { %8041 = vmatmul.mubr.msk.f32.gmra.mrb[6].mxu1 %vm447_vm0, %v10398_v19 }
 0x1e7   :  { %8045 = vmatprep.mubr.msk.f32.mxu1 %vm9883_vm1, %v9882_v20 }
 0x2a8   :  { %v8013_v22 = vpop.f32.mrb[0].mxu0 }
 0x2a9   :  { %v538_v23 = vpop.f32.mrb[1].mxu0  ;;  %v544_v27 = vadd.f32 %v8013_v22, %v7322_v21  ;;  %v400_v22 = vld [vmem:[#allocation20 + $0x20] sm:$0xff] }
 0x2aa   :  { %v539_v24 = vadd.f32 %v7322_v21, %v538_v23 }
 0x2ac   :  { %8044 = vmatpush3.msra.mxu1 %v539_v24  ;;  %v8016_v28 = vpop.f32.mrb[2].mxu0  ;;  %v401_v24 = vld [vmem:[#allocation20 + $0x28] sm:$0xff] }
 0x2ad   :  { %v8033_v26 = vpop.f32.mrb[0].mxu1  ;;  %8046 = vmatmul.mubr.msk.f32.vlgmr.msra.gmra.mrb[8].mxu1 %vm688_vm2, %v353_v25  ;;  %8048 = vmatprep.subr.mxu1 %v9882_v20  ;;  %v548_v30 = vpop.f32.mrb[3].mxu0  ;;  %v554_v31 = vadd.f32 %v8016_v28, %v7322_v21  ;;  %v10474_v25 = vpack.c.bf16 %v401_v24, %v400_v22  ;;  %v402_v28 = vld [vmem:[#allocation20 + $0x30] sm:$0xff] }
 0x2ae   :  { %v649_v29 = vpop.f32.mrb[1].mxu1  ;;  %8049 = vmatpush3.msra.mxu1 %v544_v27  ;;  %v549_v32 = vadd.f32 %v7322_v21, %v548_v30  ;;  %8050 = vmatprep.mubr.msk.f32.mxu1 %vm9883_vm1, %v9882_v20  ;;  %v655_v55 = vadd.f32 %v8033_v26, %v7331_v47  ;;  %v397_v26 = vld [vmem:[#allocation20 + $0x10] sm:$0xff]  ;;  %v398_v27 = vld [vmem:[#allocation20 + $0x18] sm:$0xff] }
 0x2af   :  { %8058 = vmatprep.subr.mxu1 %v9882_v20  ;;  %v650_v53 = vadd.f32 %v7331_v47, %v649_v29  ;;  %v10480_v29 = vpack.c.bf16 %v398_v27, %v397_v26  ;;  %v403_v30 = vld [vmem:[#allocation20 + $0x38] sm:$0xff]  ;;  %v420_v22 = vld [vmem:[#allocation23 + $0x28] sm:$0xff] }
 0x2b0   :  { %v8019_v36 = vpop.f32.mrb[4].mxu0  ;;  %8054 = vmatpush3.msra.mxu0 %v549_v32  ;;  %v381_v32 = vld [vmem:[#allocation19] sm:$0xff] }
 0x2b1   :  { %v8036_v35 = vpop.f32.mrb[2].mxu1  ;;  %8051 = vmatmul.mubr.msk.f32.vlgmr.msra.gmra.mrb[10].mxu1 %vm688_vm2, %v354_v33  ;;  %v558_v38 = vpop.f32.mrb[5].mxu0  ;;  %8056 = vmatmul.mubr.msk.f32.vlgmr.msra.gmra.mrb[8].mxu0 %vm688_vm2, %v355_v34  ;;  %v564_v39 = vadd.f32 %v8019_v36, %v7322_v21  ;;  %v382_v33 = vld [vmem:[#allocation19 + $0x8] sm:$0xff]  ;;  %v386_v34 = vld [vmem:[#allocation19 + $0x20] sm:$0xff] }
 0x2b2   :  { %v659_v37 = vpop.f32.mrb[3].mxu1  ;;  %8059 = vmatpush3.msra.mxu1 %v554_v31  ;;  %v559_v40 = vadd.f32 %v7322_v21, %v558_v38  ;;  %8060 = vmatprep.mubr.msk.f32.mxu1 %vm9883_vm1, %v9882_v20  ;;  %v665_v59 = vadd.f32 %v8036_v35, %v7331_v47  ;;  %v10482_v31 = vpack.c.bf16 %v403_v30, %v402_v28  ;;  %v387_v36 = vld [vmem:[#allocation19 + $0x28] sm:$0xff] }
 0x2b3   :  { %8063 = vmatprep.subr.mxu0 %v9882_v20  ;;  %8068 = vmatprep.subr.mxu1 %v9882_v20  ;;  %v660_v58 = vadd.f32 %v7331_v47, %v659_v37  ;;  %v10488_v35 = vpack.c.bf16 %v382_v33, %v381_v32  ;;  %v10490_v37 = vpack.c.bf16 %v387_v36, %v386_v34 }
 0x2b4   :  { %v8022_v44 = vpop.f32.mrb[6].mxu0  ;;  %8064 = vmatpush3.msra.mxu0 %v559_v40  ;;  %8065 = vmatprep.mubr.msk.f32.mxu0 %vm9883_vm1, %v9882_v20 }
 0x2b5   :  { %v8039_v43 = vpop.f32.mrb[4].mxu1  ;;  %8061 = vmatmul.mubr.msk.f32.vlgmr.msra.gmra.mrb[12].mxu1 %vm688_vm2, %v356_v41  ;;  %v568_v46 = vpop.f32.mrb[7].mxu0  ;;  %8066 = vmatmul.mubr.msk.f32.vlgmr.msra.gmra.mrb[10].mxu0 %vm688_vm2, %v357_v42  ;;  %v574_v48 = vadd.f32 %v8022_v44, %v7322_v21 }
 0x2b6   :  { %v669_v45 = vpop.f32.mrb[5].mxu1  ;;  %8069 = vmatpush3.msra.mxu1 %v564_v39  ;;  %v569_v49 = vadd.f32 %v7322_v21, %v568_v46  ;;  %8070 = vmatprep.mubr.msk.f32.mxu1 %vm9883_vm1, %v9882_v20  ;;  %v675_v63 = vadd.f32 %v8039_v43, %v7331_v47  ;;  %v396_v21 = vld [vmem:[#allocation20 + $0x8] sm:$0xff] }
 0x2b7   :  { %8073 = vmatprep.subr.mxu0 %v9882_v20  ;;  %8078 = vmatprep.subr.mxu1 %v9882_v20  ;;  %v670_v62 = vadd.f32 %v7331_v47, %v669_v45  ;;  %v10472_v23 = vpack.c.bf16 %v396_v21, %v395_v11  ;;  %v415_v11 = vld [vmem:[#allocation23 + $0x8] sm:$0xff]  ;;  %v419_v21 = vld [vmem:[#allocation23 + $0x20] sm:$0xff] }
 0x2b8   :  { %8074 = vmatpush3.msra.mxu0 %v569_v49  ;;  %8075 = vmatprep.mubr.msk.f32.mxu0 %vm9883_vm1, %v9882_v20  ;;  %v10542_v34 = vpack.c.bf16 %v420_v22, %v419_v21 }
 0x2b9   :  { %v8042_v52 = vpop.f32.mrb[6].mxu1  ;;  %8071 = vmatmul.mubr.msk.f32.vlgmr.msra.gmra.mrb[14].mxu1 %vm688_vm2, %v358_v50  ;;  %8076 = vmatmul.mubr.msk.f32.vlgmr.msra.gmra.mrb[12].mxu0 %vm688_vm2, %v359_v51 }
 0x2ba   :  { %v679_v54 = vpop.f32.mrb[7].mxu1  ;;  %8079 = vmatpush3.msra.mxu1 %v574_v48  ;;  %8080 = vmatprep.mubr.msk.f32.mxu1 %vm9883_vm1, %v9882_v20  ;;  %v685_v4 = vadd.f32 %v8042_v52, %v7331_v47  ;;  %v7357_v52 = vld [vmem:[#allocation17] ss:$0 sm:$0xff] }
 0x2bb   :  { %8083 = vmatprep.subr.mxu0 %v9882_v20  ;;  %8088 = vmatprep.subr.mxu1 %v9882_v20  ;;  %v680_v2 = vadd.f32 %v7331_v47, %v679_v54 }
 0x2bc   :  { %8084 = vmatpush3.msra.mxu0 %v650_v53  ;;  %8085 = vmatprep.mubr.msk.f32.mxu0 %vm9883_vm1, %v9882_v20 }
 0x2bd   :  { %8081 = vmatmul.mubr.msk.f32.vlgmr.msra.gmra.mrb[16].mxu1 %vm688_vm2, %v360_v56  ;;  %8086 = vmatmul.mubr.msk.f32.vlgmr.msra.gmra.mrb[14].mxu0 %vm688_vm2, %v361_v57 }
 0x2be   :  { %8089 = vmatpush3.msra.mxu1 %v655_v55  ;;  %8090 = vmatprep.mubr.msk.f32.mxu1 %vm9883_vm1, %v9882_v20 }
 0x2bf   :  { %8093 = vmatprep.subr.mxu0 %v9882_v20  ;;  %8098 = vmatprep.subr.mxu1 %v9882_v20 }
 0x2c0   :  { %8094 = vmatpush3.msra.mxu0 %v660_v58  ;;  %8095 = vmatprep.mubr.msk.f32.mxu0 %vm9883_vm1, %v9882_v20  ;;  %v383_v58 = vld [vmem:[#allocation19 + $0x10] sm:$0xff] }
 0x2c1   :  { %8091 = vmatmul.mubr.msk.f32.vlgmr.msra.gmra.mrb[18].mxu1 %vm688_vm2, %v362_v60  ;;  %8096 = vmatmul.mubr.msk.f32.vlgmr.msra.gmra.mrb[16].mxu0 %vm688_vm2, %v363_v61  ;;  %v388_v60 = vld [vmem:[#allocation19 + $0x30] sm:$0xff]  ;;  %v389_v61 = vld [vmem:[#allocation19 + $0x38] sm:$0xff] }
 0x2c2   :  { %8099 = vmatpush3.msra.mxu1 %v665_v59  ;;  %8100 = vmatprep.mubr.msk.f32.mxu1 %vm9883_vm1, %v9882_v20  ;;  %v384_v59 = vld [vmem:[#allocation19 + $0x18] sm:$0xff] }
 0x2c3   :  { %8103 = vmatprep.subr.mxu0 %v9882_v20  ;;  %8108 = vmatprep.subr.mxu1 %v9882_v20 }
 0x2c4   :  { %8104 = vmatpush3.msra.mxu0 %v670_v62  ;;  %8105 = vmatprep.mubr.msk.f32.mxu0 %vm9883_vm1, %v9882_v20 }
 0x2c5   :  { %8101 = vmatmul.mubr.msk.f32.vlgmr.msra.gmra.mrb[20].mxu1 %vm688_vm2, %v364_v0  ;;  %8106 = vmatmul.mubr.msk.f32.vlgmr.msra.gmra.mrb[18].mxu0 %vm688_vm2, %v365_v1 }
 0x2c6   :  { %8109 = vmatpush3.msra.mxu1 %v675_v63  ;;  %8110 = vmatprep.mubr.msk.f32.mxu1 %vm9883_vm1, %v9882_v20 }
 0x2c7   :  { %8113 = vmatprep.subr.mxu0 %v9882_v20  ;;  %8118 = vmatprep.subr.mxu1 %v9882_v20 }
 0x2c8   :  { %8114 = vmatpush3.msra.mxu0 %v680_v2  ;;  %8115 = vmatprep.mubr.msk.f32.mxu0 %vm9883_vm1, %v9882_v20 }
 0x2c9   :  { %8111 = vmatmul.mubr.msk.f32.vlgmr.msra.gmra.mrb[22].mxu1 %vm688_vm2, %v366_v7  ;;  %8116 = vmatmul.mubr.msk.f32.vlgmr.msra.gmra.mrb[20].mxu0 %vm688_vm2, %v367_v8  ;;  %v10520_v7 = vpack.c.bf16 %v384_v59, %v383_v58  ;;  %v10522_v8 = vpack.c.bf16 %v389_v61, %v388_v60  ;;  %v416_v58 = vld [vmem:[#allocation23 + $0x10] sm:$0xff]  ;;  %v417_v59 = vld [vmem:[#allocation23 + $0x18] sm:$0xff] }
 0x2ca   :  { %8119 = vmatpush3.msra.mxu1 %v685_v4  ;;  %8120 = vmatprep.mubr.msk.f32.mxu1 %vm9883_vm1, %v9882_v20  ;;  %v421_v60 = vld [vmem:[#allocation23 + $0x30] sm:$0xff]  ;;  %v422_v61 = vld [vmem:[#allocation23 + $0x38] sm:$0xff] }
 0x2cb   :  { %8733 = vmatprep.subr.bf16.mxu0 %v10472_v23  ;;  %8757 = vmatprep.subr.bf16.mxu1 %v10474_v25 }
 0x2cc   :  { %8735 = vmatpush3.bf16.msra.mxu0 %v10472_v23 }
 0x2cd   :  { %8121 = vmatmul.mubr.msk.f32.vlgmr.msra.gmra.mrb[24].mxu1 %vm688_vm2, %v368_v10  ;;  %8737 = vmatprep.subr.bf16.mxu0 %v10480_v29  ;;  %v414_v10 = vld [vmem:[#allocation23] sm:$0xff] }
 0x2ce   :  { %8759 = vmatpush3.bf16.msra.mxu1 %v10474_v25  ;;  %v10540_v33 = vpack.c.bf16 %v415_v11, %v414_v10  ;;  %v424_v10 = vld [vmem:[#allocation23 + $0x40] sm:$0xff]  ;;  %v425_v11 = vld [vmem:[#allocation23 + $0x48] sm:$0xff] }
 0x2cf   :  { %8761 = vmatprep.subr.bf16.mxu1 %v10482_v31  ;;  %v10611_v22 = vpack.c.bf16 %v425_v11, %v424_v10 }
 0x2d0   :  { %8739 = vmatpush3.bf16.msra.mxu0 %v10480_v29 }
 0x2d1   :  { %8741 = vmatprep.subr.bf16.mxu0 %v10488_v35 }
 0x2d2   :  { %8763 = vmatpush3.bf16.msra.mxu1 %v10482_v31 }
 0x2d3   :  { %8765 = vmatprep.subr.bf16.mxu1 %v10490_v37 }
 0x380   :  { %v10494_v38 = vpop.f32.mrb[8].mxu1 }
 0x381   :  { %v8047_v39 = vpop.f32.mrb[9].mxu1 }
 0x384   :  { %v10496_v40 = vpop.f32.mrb[10].mxu1  ;;  %v10498_v41 = vpop.f32.mrb[8].mxu0 }
 0x385   :  { %v8052_v42 = vpop.f32.mrb[11].mxu1  ;;  %v8057_v43 = vpop.f32.mrb[9].mxu0 }
 0x388   :  { %v10500_v44 = vpop.f32.mrb[12].mxu1  ;;  %v10502_v45 = vpop.f32.mrb[10].mxu0 }
 0x389   :  { %v8062_v46 = vpop.f32.mrb[13].mxu1  ;;  %v8067_v47 = vpop.f32.mrb[11].mxu0 }
 0x38c   :  { %v10504_v48 = vpop.f32.mrb[14].mxu1  ;;  %v10506_v49 = vpop.f32.mrb[12].mxu0 }
 0x38d   :  { %v8072_v50 = vpop.f32.mrb[15].mxu1  ;;  %v8077_v51 = vpop.f32.mrb[13].mxu0 }
 0x38e   :  { %v7348_v50 = vld [vmem:[#allocation16] ss:$0 sm:$0xff] }
 0x390   :  { %v10508_v53 = vpop.f32.mrb[16].mxu1  ;;  %v1356_v54 = vpop.f32.mrb[14].mxu0 }
 0x391   :  { %v8082_v55 = vpop.f32.mrb[17].mxu1  ;;  %v10510_v56 = vadd.f32 %v7357_v52, %v1356_v54  ;;  %v8087_v57 = vpop.f32.mrb[15].mxu0 }
 0x392   :  { %v10571_v57 = vadd.f32 %v7348_v50, %v10494_v38  ;;  %v10585_v38 = vadd.f32 %v7348_v50, %v10498_v41  ;;  %v10605_v41 = vadd.f32 %v7348_v50, %v10502_v45  ;;  %v10627_v45 = vadd.f32 %v7348_v50, %v10506_v49  ;;  %v407_v49 = vld [vmem:[#allocation20 + $0x50] sm:$0xff] }
 0x393   :  { %8131 = vmatprep.mubr.msk.f32.mxu0 %vm447_vm0, %v10510_v56  ;;  %8191 = vmatprep.mubr.msk.f32.mxu1 %vm447_vm0, %v10510_v56 }
 0x394   :  { %v1429_v62 = vpop.f32.mrb[18].mxu1  ;;  %v1502_v63 = vpop.f32.mrb[16].mxu0 }
 0x395   :  { %v10516_v0 = vadd.f32 %v7357_v52, %v1429_v62  ;;  %v8092_v1 = vpop.f32.mrb[19].mxu1  ;;  %v10518_v2 = vadd.f32 %v7357_v52, %v1502_v63  ;;  %v8097_v4 = vpop.f32.mrb[17].mxu0  ;;  %v10587_v62 = vpack.c.bf16 %v417_v59, %v416_v58  ;;  %v10589_v63 = vpack.c.bf16 %v422_v61, %v421_v60 }
 0x396   :  { %v405_v1 = vld [vmem:[#allocation20 + $0x40] sm:$0xff]  ;;  %v406_v4 = vld [vmem:[#allocation20 + $0x48] sm:$0xff] }
 0x397   :  { %8132 = vmatmul.mubr.msk.f32.vlgmr.msra.gmra.mrb[22].mxu0 %vm447_vm0, %v10516_v0  ;;  %8192 = vmatmul.mubr.msk.f32.vlgmr.msra.gmra.mrb[26].mxu1 %vm447_vm0, %v10516_v0  ;;  %v10609_v21 = vpack.c.bf16 %v406_v4, %v405_v1 }
 0x398   :  { %v1575_v24 = vpop.f32.mrb[20].mxu1  ;;  %v1648_v26 = vpop.f32.mrb[18].mxu0  ;;  %8134 = vmatprep.mubr.msk.f32.mxu0 %vm447_vm0, %v10518_v2  ;;  %8194 = vmatprep.mubr.msk.f32.mxu1 %vm447_vm0, %v10518_v2 }
 0x399   :  { %v10532_v27 = vadd.f32 %v7357_v52, %v1575_v24  ;;  %v8102_v28 = vpop.f32.mrb[21].mxu1  ;;  %v10534_v30 = vadd.f32 %v7357_v52, %v1648_v26  ;;  %v8107_v32 = vpop.f32.mrb[19].mxu0  ;;  %8743 = vmatpush3.bf16.msra.mxu0 %v10488_v35  ;;  %8767 = vmatpush3.bf16.msra.mxu1 %v10490_v37  ;;  %v408_v24 = vld [vmem:[#allocation20 + $0x58] sm:$0xff] }
 0x39a   :  { %8745 = vmatprep.subr.bf16.mxu0 %v10520_v7  ;;  %8769 = vmatprep.subr.bf16.mxu1 %v10522_v8  ;;  %v426_v26 = vld [vmem:[#allocation23 + $0x50] sm:$0xff]  ;;  %v427_v28 = vld [vmem:[#allocation23 + $0x58] sm:$0xff]  ;;  %v10650_v32 = vpack.c.bf16 %v408_v24, %v407_v49 }
 0x39b   :  { %8135 = vmatmul.mubr.msk.f32.gmra.mrb[24].mxu0 %vm447_vm0, %v10532_v27  ;;  %8195 = vmatmul.mubr.msk.f32.gmra.mrb[28].mxu1 %vm447_vm0, %v10532_v27 }
 0x39c   :  { %v1721_v36 = vpop.f32.mrb[22].mxu1  ;;  %v1794_v39 = vpop.f32.mrb[20].mxu0  ;;  %8137 = vmatprep.mubr.msk.f32.mxu0 %vm447_vm0, %v10534_v30  ;;  %8197 = vmatprep.mubr.msk.f32.mxu1 %vm447_vm0, %v10534_v30 }
 0x39d   :  { %v10552_v42 = vadd.f32 %v7357_v52, %v1721_v36  ;;  %v8112_v43 = vpop.f32.mrb[23].mxu1  ;;  %v10554_v46 = vadd.f32 %v7357_v52, %v1794_v39  ;;  %v8117_v47 = vpop.f32.mrb[21].mxu0  ;;  %8747 = vmatpush3.bf16.msra.mxu0 %v10520_v7  ;;  %8771 = vmatpush3.bf16.msra.mxu1 %v10522_v8  ;;  %v391_v36 = vld [vmem:[#allocation19 + $0x40] sm:$0xff]  ;;  %v392_v39 = vld [vmem:[#allocation19 + $0x48] sm:$0xff] }
 0x39e   :  { %8749 = vmatprep.subr.bf16.mxu0 %v10540_v33  ;;  %8773 = vmatprep.subr.bf16.mxu1 %v10542_v34  ;;  %v10666_v43 = vpack.c.bf16 %v392_v39, %v391_v36  ;;  %v393_v47 = vld [vmem:[#allocation19 + $0x50] sm:$0xff] }
 0x39f   :  { %8138 = vmatmul.mubr.msk.f32.gmra.mrb[26].mxu0 %vm447_vm0, %v10552_v42  ;;  %8198 = vmatmul.mubr.msk.f32.gmra.mrb[30].mxu1 %vm447_vm0, %v10552_v42 }
 0x3a0   :  { %v1867_v51 = vpop.f32.mrb[24].mxu1  ;;  %8140 = vmatprep.mubr.msk.f32.mxu0 %vm447_vm0, %v10554_v46  ;;  %8200 = vmatprep.mubr.msk.f32.mxu1 %vm447_vm0, %v10554_v46 }
 0x3a1   :  { %v10568_v54 = vadd.f32 %v7357_v52, %v1867_v51  ;;  %v8122_v55 = vpop.f32.mrb[25].mxu1  ;;  %v10582_v52 = vadd.f32 %v7348_v50, %v10496_v40  ;;  %v10600_v40 = vadd.f32 %v7348_v50, %v10500_v44  ;;  %v10622_v44 = vadd.f32 %v7348_v50, %v10504_v48 }
 0x3a2   :  { %v10640_v48 = vadd.f32 %v7348_v50, %v10508_v53  ;;  %v10652_v53 = vpack.c.bf16 %v427_v28, %v426_v26  ;;  %v394_v50 = vld [vmem:[#allocation19 + $0x58] sm:$0xff] }
 0x3a3   :  { %8141 = vmatmul.mubr.msk.f32.gmra.mrb[28].mxu0 %vm447_vm0, %v10568_v54  ;;  %8201 = vmatmul.mubr.msk.f32.gmra.mrb[32].mxu1 %vm447_vm0, %v10568_v54  ;;  %v10696_v51 = vpack.c.bf16 %v394_v50, %v393_v47 }
 0x3a4   :  { %8151 = vmatprep.mubr.msk.f32.mxu0 %vm447_vm0, %v10571_v57  ;;  %8211 = vmatprep.mubr.msk.f32.mxu1 %vm447_vm0, %v10571_v57 }
 0x3a7   :  { %8152 = vmatmul.mubr.msk.f32.vlgmr.msra.gmra.mrb[22].mxu0 %vm447_vm0, %v10582_v52  ;;  %8212 = vmatmul.mubr.msk.f32.vlgmr.msra.gmra.mrb[26].mxu1 %vm447_vm0, %v10582_v52 }
 0x3a8   :  { %8154 = vmatprep.mubr.msk.f32.mxu0 %vm447_vm0, %v10585_v38  ;;  %8214 = vmatprep.mubr.msk.f32.mxu1 %vm447_vm0, %v10585_v38 }
 0x3a9   :  { %8751 = vmatpush3.bf16.msra.mxu0 %v10540_v33  ;;  %8775 = vmatpush3.bf16.msra.mxu1 %v10542_v34 }
 0x3aa   :  { %8753 = vmatprep.subr.bf16.mxu0 %v10587_v62  ;;  %8777 = vmatprep.subr.bf16.mxu1 %v10589_v63 }
 0x3ab   :  { %8155 = vmatmul.mubr.msk.f32.gmra.mrb[24].mxu0 %vm447_vm0, %v10600_v40  ;;  %8215 = vmatmul.mubr.msk.f32.gmra.mrb[28].mxu1 %vm447_vm0, %v10600_v40 }
 0x3ac   :  { %8157 = vmatprep.mubr.msk.f32.mxu0 %vm447_vm0, %v10605_v41  ;;  %8217 = vmatprep.mubr.msk.f32.mxu1 %vm447_vm0, %v10605_v41 }
 0x3ad   :  { %8755 = vmatpush3.bf16.msra.mxu0 %v10587_v62  ;;  %8779 = vmatpush3.bf16.msra.mxu1 %v10589_v63 }
 0x3ae   :  { %8781 = vmatprep.subr.bf16.mxu0 %v10609_v21  ;;  %8797 = vmatprep.subr.bf16.mxu1 %v10611_v22 }
 0x3af   :  { %8158 = vmatmul.mubr.msk.f32.gmra.mrb[26].mxu0 %vm447_vm0, %v10622_v44  ;;  %8218 = vmatmul.mubr.msk.f32.gmra.mrb[30].mxu1 %vm447_vm0, %v10622_v44 }
 0x3b0   :  { %8160 = vmatprep.mubr.msk.f32.mxu0 %vm447_vm0, %v10627_v45  ;;  %8220 = vmatprep.mubr.msk.f32.mxu1 %vm447_vm0, %v10627_v45 }
 0x3b3   :  { %8161 = vmatmul.mubr.msk.f32.gmra.mrb[28].mxu0 %vm447_vm0, %v10640_v48  ;;  %8221 = vmatmul.mubr.msk.f32.gmra.mrb[32].mxu1 %vm447_vm0, %v10640_v48 }
 0x3b4   :  { %8171 = vmatprep.mubr.msk.f32.mxu0 %vm447_vm0, %v10334_v5  ;;  %8231 = vmatprep.mubr.msk.f32.mxu1 %vm447_vm0, %v10334_v5 }
 0x3b7   :  { %8172 = vmatmul.mubr.msk.f32.vlgmr.msra.gmra.mrb[22].mxu0 %vm447_vm0, %v10364_v13  ;;  %8232 = vmatmul.mubr.msk.f32.vlgmr.msra.gmra.mrb[26].mxu1 %vm447_vm0, %v10364_v13 }
 0x3b8   :  { %8174 = vmatprep.mubr.msk.f32.mxu0 %vm447_vm0, %v10367_v14  ;;  %8234 = vmatprep.mubr.msk.f32.mxu1 %vm447_vm0, %v10367_v14 }
 0x3b9   :  { %8783 = vmatpush3.bf16.msra.mxu0 %v10609_v21  ;;  %8799 = vmatpush3.bf16.msra.mxu1 %v10611_v22 }
 0x3ba   :  { %8785 = vmatprep.subr.bf16.mxu0 %v10650_v32  ;;  %8801 = vmatprep.subr.bf16.mxu1 %v10652_v53 }
 0x3bb   :  { %8175 = vmatmul.mubr.msk.f32.gmra.mrb[24].mxu0 %vm447_vm0, %v10374_v15  ;;  %8235 = vmatmul.mubr.msk.f32.gmra.mrb[28].mxu1 %vm447_vm0, %v10374_v15 }
 0x3bc   :  { %8177 = vmatprep.mubr.msk.f32.mxu0 %vm447_vm0, %v10376_v16  ;;  %8237 = vmatprep.mubr.msk.f32.mxu1 %vm447_vm0, %v10376_v16 }
 0x3bd   :  { %8787 = vmatpush3.bf16.msra.mxu0 %v10650_v32  ;;  %8803 = vmatpush3.bf16.msra.mxu1 %v10652_v53 }
 0x3be   :  { %8789 = vmatprep.subr.bf16.mxu0 %v10666_v43  ;;  %8805 = vmatprep.subr.bf16.mxu1 %v10332_v3 }
 0x3bf   :  { %8178 = vmatmul.mubr.msk.f32.gmra.mrb[26].mxu0 %vm447_vm0, %v10386_v17  ;;  %8238 = vmatmul.mubr.msk.f32.gmra.mrb[30].mxu1 %vm447_vm0, %v10386_v17 }
 0x3c0   :  { %8180 = vmatprep.mubr.msk.f32.mxu0 %vm447_vm0, %v10388_v18  ;;  %8240 = vmatprep.mubr.msk.f32.mxu1 %vm447_vm0, %v10388_v18 }
 0x3c3   :  { %8181 = vmatmul.mubr.msk.f32.gmra.mrb[28].mxu0 %vm447_vm0, %v10398_v19  ;;  %8241 = vmatmul.mubr.msk.f32.gmra.mrb[32].mxu1 %vm447_vm0, %v10398_v19 }
 0x3c4   :  { %8251 = vmatprep.mubr.msk.f32.mxu0 %vm447_vm0, %v10510_v56  ;;  %8291 = vmatprep.mubr.msk.f32.mxu1 %vm447_vm0, %v10334_v5  ;;  %v7375_v5 = vld [vmem:[#allocation25] ss:$0 sm:$0xff] }
 0x3c7   :  { %8252 = vmatmul.mubr.msk.f32.vlgmr.msra.gmra.mrb[30].mxu0 %vm447_vm0, %v10516_v0  ;;  %8292 = vmatmul.mubr.msk.f32.vlgmr.msra.gmra.mrb[34].mxu1 %vm447_vm0, %v10364_v13 }
 0x3c8   :  { %8254 = vmatprep.mubr.msk.f32.mxu0 %vm447_vm0, %v10518_v2  ;;  %8791 = vmatpush3.bf16.msra.mxu0 %v10666_v43 }
 0x3c9   :  { %8793 = vmatprep.subr.bf16.mxu0 %v10696_v51  ;;  %8294 = vmatprep.mubr.msk.f32.mxu1 %vm447_vm0, %v10367_v14 }
 0x3ca   :  { %8807 = vmatpush3.bf16.msra.mxu1 %v10332_v3  ;;  %v7374_v3 = vld [vmem:[#allocation22] ss:$0 sm:$0xff] }
 0x3cb   :  { %8255 = vmatmul.mubr.msk.f32.gmra.mrb[32].mxu0 %vm447_vm0, %v10532_v27  ;;  %8295 = vmatmul.mubr.msk.f32.gmra.mrb[36].mxu1 %vm447_vm0, %v10374_v15  ;;  %v10754_v14 = vadd.f32 %v7375_v5, %v7374_v3  ;;  %v7400_v15 = vld [vmem:[#allocation22 + $0x1] ss:$0 sm:$0xff] }
 0x3cc   :  { %8257 = vmatprep.mubr.msk.f32.mxu0 %vm447_vm0, %v10534_v30  ;;  %8795 = vmatpush3.bf16.msra.mxu0 %v10696_v51  ;;  %v7401_v30 = vld [vmem:[#allocation25 + $0x1] ss:$0 sm:$0xff] }
 0x3cd   :  { %8297 = vmatprep.mubr.msk.f32.mxu1 %vm447_vm0, %v10376_v16  ;;  %8813 = vmatprep.subr.bf16.mxu0 %v10350_v9 }
 0x3ce   :  { %8809 = vmatprep.subr.bf16.mxu1 %v10336_v6 }
 0x3cf   :  { %8258 = vmatmul.mubr.msk.f32.gmra.mrb[34].mxu0 %vm447_vm0, %v10552_v42  ;;  %8298 = vmatmul.mubr.msk.f32.gmra.mrb[38].mxu1 %vm447_vm0, %v10386_v17 }
 0x3d0   :  { %8260 = vmatprep.mubr.msk.f32.mxu0 %vm447_vm0, %v10554_v46  ;;  %8300 = vmatprep.mubr.msk.f32.mxu1 %vm447_vm0, %v10388_v18 }
 0x3d1   :  { %8811 = vmatpush3.bf16.msra.mxu1 %v10336_v6 }
 0x3d2   :  { %8343 = vmatprep.subr.mxu1 %v9882_v20 }
 0x3d3   :  { %8261 = vmatmul.mubr.msk.f32.gmra.mrb[36].mxu0 %vm447_vm0, %v10568_v54  ;;  %8301 = vmatmul.mubr.msk.f32.gmra.mrb[40].mxu1 %vm447_vm0, %v10398_v19 }
 0x3d4   :  { %8271 = vmatprep.mubr.msk.f32.mxu0 %vm447_vm0, %v10571_v57 }
 0x3d7   :  { %8272 = vmatmul.mubr.msk.f32.vlgmr.msra.gmra.mrb[30].mxu0 %vm447_vm0, %v10582_v52 }
 0x3d8   :  { %8274 = vmatprep.mubr.msk.f32.mxu0 %vm447_vm0, %v10585_v38  ;;  %8815 = vmatpush3.bf16.msra.mxu0 %v10350_v9 }
 0x3d9   :  { %8817 = vmatprep.subr.bf16.mxu0 %v10360_v12 }
 0x3db   :  { %8275 = vmatmul.mubr.msk.f32.gmra.mrb[32].mxu0 %vm447_vm0, %v10600_v40 }
 0x3dc   :  { %8277 = vmatprep.mubr.msk.f32.mxu0 %vm447_vm0, %v10605_v41  ;;  %8819 = vmatpush3.bf16.msra.mxu0 %v10360_v12  ;;  %v10760_v41 = vadd.f32 %v7401_v30, %v7400_v15 }
 0x3dd   :  { %8363 = vmatprep.subr.mxu0 %v9882_v20 }
 0x3df   :  { %8278 = vmatmul.mubr.msk.f32.gmra.mrb[34].mxu0 %vm447_vm0, %v10622_v44 }
 0x3e0   :  { %8280 = vmatprep.mubr.msk.f32.mxu0 %vm447_vm0, %v10627_v45 }
 0x3e3   :  { %8281 = vmatmul.mubr.msk.f32.gmra.mrb[36].mxu0 %vm447_vm0, %v10640_v48 }
 0x48a   :  { %v8173_v6 = vpop.f32.mrb[22].mxu0  ;;  %v8233_v9 = vpop.f32.mrb[26].mxu1 }
 0x48b   :  { %v8926_v13 = vadd.f32 %v8173_v6, %v7374_v3  ;;  %v2229_v12 = vpop.f32.mrb[23].mxu0  ;;  %v2564_v16 = vpop.f32.mrb[27].mxu1  ;;  %v8942_v19 = vadd.f32 %v8233_v9, %v7400_v15 }
 0x48c   :  { %v8928_v17 = vadd.f32 %v7374_v3, %v2229_v12  ;;  %v8944_v57 = vadd.f32 %v7400_v15, %v2564_v16 }
 0x48d   :  { %v8927_v18 = vadd.f32 %v8926_v13, %v7375_v5  ;;  %v8943_v60 = vadd.f32 %v8942_v19, %v7401_v30 }
 0x48e   :  { %v8929_v56 = vadd.f32 %v8928_v17, %v7375_v5  ;;  %v8176_v0 = vpop.f32.mrb[24].mxu0  ;;  %v8236_v2 = vpop.f32.mrb[28].mxu1  ;;  %v8945_v11 = vadd.f32 %v8944_v57, %v7401_v30 }
 0x48f   :  { %v7437_v27 = vmul.f32 -1.442695, %v8927_v18  ;;  %v8931_v42 = vadd.f32 %v10754_v14, %v8176_v0  ;;  %v2239_v46 = vpop.f32.mrb[25].mxu0  ;;  %v2574_v54 = vpop.f32.mrb[29].mxu1  ;;  %v7445_v45 = vmul.f32 -1.442695, %v8943_v60  ;;  %v8947_v47 = vadd.f32 %v10760_v41, %v8236_v2 }
 0x490   :  { %v7436_v55 = vmul.f32 -1.442695, %v8929_v56  ;;  %v8933_v58 = vadd.f32 %v10754_v14, %v2239_v46  ;;  %v7444_v39 = vmul.f32 -1.442695, %v8945_v11  ;;  %v8949_v6 = vadd.f32 %v10760_v41, %v2574_v54  ;;  %v10769_v54 = vld [vmem:[#allocation25 + $0x2] ss:$0 sm:$0xff] }
 0x491   :  { %9103 = vpow2.f32 %v7437_v27  ;;  %v7439_v59 = vmul.f32 -1.442695, %v8931_v42  ;;  %v7447_v12 = vmul.f32 -1.442695, %v8947_v47  ;;  %v10777_v47 = vld [vmem:[#allocation22 + $0x2] ss:$0 sm:$0xff] }
 0x492   :  { %v8179_v61 = vpop.f32.mrb[26].mxu0  ;;  %v8239_v52 = vpop.f32.mrb[30].mxu1  ;;  %9105 = vpow2.f32 %v7436_v55  ;;  %v7438_v38 = vmul.f32 -1.442695, %v8933_v58  ;;  %v7446_v56 = vmul.f32 -1.442695, %v8949_v6 }
 0x493   :  { %v8935_v1 = vadd.f32 %v10754_v14, %v8179_v61  ;;  %v2249_v4 = vpop.f32.mrb[27].mxu0  ;;  %v2584_v10 = vpop.f32.mrb[31].mxu1  ;;  %9107 = vpow2.f32 %v7439_v59  ;;  %v8951_v16 = vadd.f32 %v10760_v41, %v8239_v52 }
 0x494   :  { %v8937_v40 = vadd.f32 %v10754_v14, %v2249_v4  ;;  %9109 = vpow2.f32 %v7438_v38  ;;  %v8953_v42 = vadd.f32 %v10760_v41, %v2584_v10 }
 0x495   :  { %v7441_v44 = vmul.f32 -1.442695, %v8935_v1  ;;  %v7449_v30 = vmul.f32 -1.442695, %v8951_v16 }
 0x496   :  { %v8182_v48 = vpop.f32.mrb[28].mxu0  ;;  %v8242_v49 = vpop.f32.mrb[32].mxu1  ;;  %v7440_v24 = vmul.f32 -1.442695, %v8937_v40  ;;  %v7448_v38 = vmul.f32 -1.442695, %v8953_v42 }
 0x497   :  { %v8939_v26 = vadd.f32 %v10754_v14, %v8182_v48  ;;  %v2259_v28 = vpop.f32.mrb[29].mxu0  ;;  %v10763_v36 = vpop.f32.mrb[33].mxu1  ;;  %9111 = vpow2.f32 %v7441_v44  ;;  %v8955_v1 = vadd.f32 %v10760_v41, %v8242_v49 }
 0x498   :  { %9113 = vpow2.f32 %v7445_v45  ;;  %v8941_v61 = vadd.f32 %v10754_v14, %v2259_v28 }
 0x499   :  { %v7443_v50 = vmul.f32 -1.442695, %v8939_v26  ;;  %9115 = vpow2.f32 %v7440_v24  ;;  %v7451_v49 = vmul.f32 -1.442695, %v8955_v1 }
 0x49a   :  { %v8293_v3 = vpop.f32.mrb[34].mxu1  ;;  %9117 = vpow2.f32 %v7444_v39  ;;  %v7442_v39 = vmul.f32 -1.442695, %v8941_v61 }
 0x49b   :  { %v9104_v5 = vpop.eup %9103  ;;  %v2899_v9 = vpop.f32.mrb[35].mxu1  ;;  %9119 = vpow2.f32 %v7443_v50  ;;  %v2905_v4 = vadd.f32 %v8293_v3, %v10769_v54 }
 0x49c   :  { %v2971_v13 = vadd.f32 1.0, %v9104_v5  ;;  %v9106_v15 = vpop.eup %9105  ;;  %v2900_v48 = vadd.f32 %v10769_v54, %v2899_v9 }
 0x49d   :  { %v2970_v17 = vadd.f32 1.0, %v9106_v15  ;;  %v9108_v19 = vpop.eup %9107 }
 0x49e   :  { %9121 = vrcp.f32 %v2971_v13  ;;  %v8296_v18 = vpop.f32.mrb[36].mxu1  ;;  %v2973_v2 = vadd.f32 1.0, %v9108_v19  ;;  %v9110_v27 = vpop.eup %9109 }
 0x49f   :  { %v2909_v0 = vpop.f32.mrb[37].mxu1  ;;  %9123 = vrcp.f32 %v2970_v17  ;;  %v2972_v46 = vadd.f32 1.0, %v9110_v27  ;;  %v2915_v3 = vadd.f32 %v8296_v18, %v10769_v54 }
 0x4a0   :  { %9125 = vpow2.f32 %v7447_v12  ;;  %v2910_v12 = vadd.f32 %v10769_v54, %v2909_v0 }
 0x4a1   :  { %9127 = vrcp.f32 %v2973_v2  ;;  %v9112_v57 = vpop.eup %9111 }
 0x4a2   :  { %v8299_v55 = vpop.f32.mrb[38].mxu1  ;;  %9129 = vpow2.f32 %v7446_v56  ;;  %v9114_v59 = vpop.eup %9113  ;;  %v2975_v60 = vadd.f32 1.0, %v9112_v57 }
 0x4a3   :  { %v2919_v58 = vpop.f32.mrb[39].mxu1  ;;  %9131 = vrcp.f32 %v2972_v46  ;;  %v9116_v52 = vpop.eup %9115  ;;  %v3027_v45 = vadd.f32 1.0, %v9114_v59 }
 0x4a4   :  { %9133 = vpow2.f32 %v7449_v30  ;;  %v9118_v10 = vpop.eup %9117  ;;  %v2974_v11 = vadd.f32 1.0, %v9116_v52  ;;  %v2925_v30 = vadd.f32 %v8299_v55, %v10769_v54  ;;  %v2920_v61 = vadd.f32 %v10769_v54, %v2919_v58 }
 0x4a5   :  { %9135 = vrcp.f32 %v2975_v60  ;;  %v9120_v44 = vpop.eup %9119  ;;  %v3026_v6 = vadd.f32 1.0, %v9118_v10 }
 0x4a6   :  { %v8302_v40 = vpop.f32.mrb[40].mxu1  ;;  %9137 = vrcp.f32 %v2974_v11  ;;  %v2977_v28 = vadd.f32 1.0, %v9120_v44 }
 0x4a7   :  { %v10775_v24 = vpop.f32.mrb[41].mxu1  ;;  %9139 = vpow2.f32 %v7448_v38 }
 0x4a8   :  { %v9122_v26 = vpop.eup %9121  ;;  %9141 = vrcp.f32 %v2977_v28 }
 0x4a9   :  { %v3051_v50 = vmul.f32 %v9122_v26, %v2905_v4  ;;  %v9124_v5 = vpop.eup %9123  ;;  %9143 = vrcp.f32 %v3027_v45  ;;  %v8957_v4 = vadd.f32 %v10760_v41, %v10763_v36  ;;  %v2935_v45 = vadd.f32 %v8302_v40, %v10769_v54 }
 0x4aa   :  { %v8273_v13 = vpop.f32.mrb[30].mxu0  ;;  %v9126_v15 = vpop.eup %9125  ;;  %v3050_v9 = vmul.f32 %v9124_v5, %v2900_v48  ;;  %9145 = vpow2.f32 %v7442_v39 }
 0x4ab   :  { %v2820_v16 = vadd.f32 %v8273_v13, %v10777_v47  ;;  %v2774_v17 = vpop.f32.mrb[31].mxu0  ;;  %v9128_v19 = vpop.eup %9127  ;;  %9147 = vpow2.f32 %v7451_v49  ;;  %v3029_v46 = vadd.f32 1.0, %v9126_v15  ;;  %v7450_v5 = vmul.f32 -1.442695, %v8957_v4 }
 0x4ac   :  { %v2819_v56 = vadd.f32 %v10777_v47, %v2774_v17  ;;  %v9130_v2 = vpop.eup %9129  ;;  %v3053_v27 = vmul.f32 %v9128_v19, %v2915_v3  ;;  %9149 = vrcp.f32 %v3026_v6 }
 0x4ad   :  { %v3059_v18 = vadd.f32 %v3051_v50, %v2820_v16  ;;  %v9132_v42 = vpop.eup %9131  ;;  %v3028_v10 = vadd.f32 1.0, %v9130_v2 }
 0x4ae   :  { %v3058_v57 = vadd.f32 %v3050_v9, %v2819_v56  ;;  %v8276_v59 = vpop.f32.mrb[32].mxu0  ;;  %v9134_v60 = vpop.eup %9133  ;;  %v3052_v0 = vmul.f32 %v9132_v42, %v2910_v12 }
 0x4af   :  { %9151 = vtanh.f32 %v3059_v18  ;;  %v2822_v52 = vadd.f32 %v8276_v59, %v10777_v47  ;;  %v2784_v38 = vpop.f32.mrb[33].mxu0  ;;  %v9136_v1 = vpop.eup %9135  ;;  %v3031_v26 = vadd.f32 1.0, %v9134_v60  ;;  %v9295_v59 = vld [vmem:[#allocation7 + $0x8] sm:$0xff] }
 0x4b0   :  { %9153 = vtanh.f32 %v3058_v57  ;;  %v2821_v55 = vadd.f32 %v10777_v47, %v2784_v38  ;;  %v3055_v11 = vmul.f32 %v9136_v1, %v2925_v30  ;;  %v9138_v48 = vpop.eup %9137 }
 0x4b1   :  { %v3061_v44 = vadd.f32 %v3053_v27, %v2822_v52  ;;  %9155 = vrcp.f32 %v3029_v46  ;;  %v9140_v39 = vpop.eup %9139  ;;  %v3054_v49 = vmul.f32 %v9138_v48, %v2920_v61 }
 0x4b2   :  { %v3060_v28 = vadd.f32 %v3052_v0, %v2821_v55  ;;  %v8279_v58 = vpop.f32.mrb[34].mxu0  ;;  %v9142_v36 = vpop.eup %9141  ;;  %v3030_v30 = vadd.f32 1.0, %v9140_v39  ;;  %v9296_v0 = vld [vmem:[#allocation7] sm:$0xff] }
 0x4b3   :  { %9157 = vtanh.f32 %v3061_v44  ;;  %v2824_v50 = vadd.f32 %v8279_v58, %v10777_v47  ;;  %v2794_v3 = vpop.f32.mrb[35].mxu0  ;;  %v9144_v13 = vpop.eup %9143  ;;  %v3057_v15 = vmul.f32 %v9142_v36, %v2935_v45 }
 0x4b4   :  { %9159 = vtanh.f32 %v3060_v28  ;;  %v2823_v6 = vadd.f32 %v10777_v47, %v2794_v3  ;;  %v9146_v9 = vpop.eup %9145 }
 0x4b5   :  { %9161 = vrcp.f32 %v3028_v10  ;;  %v3063_v40 = vadd.f32 %v3055_v11, %v2824_v50  ;;  %v9148_v17 = vpop.eup %9147  ;;  %v2976_v19 = vadd.f32 1.0, %v9146_v9  ;;  %v9297_v11 = vld [vmem:[#allocation7 + $0x18] sm:$0xff] }
 0x4b6   :  { %9163 = vrcp.f32 %v3031_v26  ;;  %v3062_v12 = vadd.f32 %v3054_v49, %v2823_v6  ;;  %v8282_v16 = vpop.f32.mrb[36].mxu0  ;;  %v9150_v27 = vpop.eup %9149  ;;  %v3033_v57 = vadd.f32 1.0, %v9148_v17  ;;  %v9298_v26 = vld [vmem:[#allocation7 + $0x10] sm:$0xff]  ;;  %v2930_v49 = vadd.f32 %v10769_v54, %v10775_v24  ;;  %v9299_v6 = vld [vmem:[#allocation7 + $0x28] sm:$0xff] }
 0x4b7   :  { %9165 = vtanh.f32 %v3063_v40  ;;  %v2826_v56 = vadd.f32 %v8282_v16, %v10777_v47  ;;  %v2804_v2 = vpop.f32.mrb[37].mxu0 }
 0x4b8   :  { %9167 = vpow2.f32 %v7450_v5 }
 0x4b9   :  { %v9152_v18 = vpop.eup %9151  ;;  %9169 = vrcp.f32 %v2976_v19  ;;  %v3065_v42 = vadd.f32 %v3057_v15, %v2826_v56  ;;  %v2825_v15 = vadd.f32 %v10777_v47, %v2804_v2  ;;  %v9300_v19 = vld [vmem:[#allocation7 + $0x20] sm:$0xff] }
 0x4ba   :  { %v9154_v46 = vpop.eup %9153  ;;  %v3075_v60 = vsub.f32 %v9295_v59, %v9152_v18  ;;  %9171 = vtanh.f32 %v3062_v12 }
 0x4bb   :  { %v3074_v61 = vsub.f32 %v9296_v0, %v9154_v46  ;;  %v9156_v52 = vpop.eup %9155  ;;  %9173 = vtanh.f32 %v3065_v42 }
 0x4bc   :  { %v3083_v38 = vmul.f32 %v9144_v13, %v3075_v60  ;;  %9175 = vrcp.f32 %v3030_v30 }
 0x4bd   :  { %v9158_v1 = vpop.eup %9157  ;;  %v3082_v4 = vmul.f32 %v9150_v27, %v3074_v61  ;;  %9177 = vrcp.f32 %v3033_v57  ;;  %v9302_v61 = vld [vmem:[#allocation7 + $0x30] sm:$0xff] }
 0x4be   :  { %v9160_v55 = vpop.eup %9159  ;;  %v10793_v10 = vadd.f32 %v9152_v18, %v3083_v38  ;;  %v3077_v44 = vsub.f32 %v9297_v11, %v9158_v1  ;;  %v9301_v18 = vld [vmem:[#allocation7 + $0x38] sm:$0xff] }
 0x4bf   :  { %v9162_v45 = vpop.eup %9161  ;;  %v10795_v48 = vadd.f32 %v9154_v46, %v3082_v4  ;;  %v3076_v28 = vsub.f32 %v9298_v26, %v9160_v55  ;;  %v9303_v26 = vld [vmem:[#allocation13] ss:$0 sm:$0xff] }
 0x4c0   :  { %v9164_v58 = vpop.eup %9163  ;;  %v3085_v39 = vmul.f32 %v9156_v52, %v3077_v44 }
 0x4c1   :  { %v9166_v50 = vpop.eup %9165  ;;  %v3084_v3 = vmul.f32 %v9162_v45, %v3076_v28  ;;  %8311 = vmatprep.mubr.msk.f32.mxu1 %vm447_vm0, %v10795_v48  ;;  %8331 = vmatprep.mubr.msk.f32.mxu0 %vm447_vm0, %v10795_v48 }
 0x4c2   :  { %v9168_v36 = vpop.eup %9167  ;;  %v10803_v5 = vadd.f32 %v9158_v1, %v3085_v39  ;;  %v3079_v13 = vsub.f32 %v9299_v6, %v9166_v50  ;;  %8312 = vmatmul.mubr.msk.f32.vlgmr.msra.gmra.mrb[42].mxu1 %vm447_vm0, %v10793_v10  ;;  %8332 = vmatmul.mubr.msk.f32.vlgmr.msra.gmra.mrb[38].mxu0 %vm447_vm0, %v10793_v10 }
 0x4c3   :  { %v9170_v54 = vpop.eup %9169  ;;  %v10810_v24 = vadd.f32 %v9160_v55, %v3084_v3  ;;  %v3032_v47 = vadd.f32 1.0, %v9168_v36  ;;  %v9304_v36 = vld [vmem:[#allocation2] sm:$0xff] }
 0x4c4   :  { %v3056_v40 = vmul.f32 %v9170_v54, %v2930_v49  ;;  %v3087_v9 = vmul.f32 %v9164_v58, %v3079_v13  ;;  %v9172_v12 = vpop.eup %9171  ;;  %v9305_v13 = vld [vmem:[#allocation2 + $0x8] sm:$0xff] }
 0x4c5   :  { %8314 = vmatprep.mubr.msk.f32.mxu1 %vm447_vm0, %v10810_v24  ;;  %8334 = vmatprep.mubr.msk.f32.mxu0 %vm447_vm0, %v10810_v24  ;;  %v9174_v16 = vpop.eup %9173  ;;  %v3078_v56 = vsub.f32 %v9300_v19, %v9172_v12 }
 0x4c6   :  { %v10816_v17 = vadd.f32 %v9166_v50, %v3087_v9  ;;  %v3064_v2 = vadd.f32 %v3056_v40, %v2825_v15  ;;  %8315 = vmatmul.mubr.msk.f32.gmra.mrb[44].mxu1 %vm447_vm0, %v10803_v5  ;;  %8335 = vmatmul.mubr.msk.f32.gmra.mrb[40].mxu0 %vm447_vm0, %v10803_v5  ;;  %v9176_v27 = vpop.eup %9175  ;;  %v3081_v30 = vsub.f32 %v9301_v18, %v9174_v16 }
 0x4c7   :  { %v9178_v42 = vpop.eup %9177  ;;  %v3086_v46 = vmul.f32 %v9176_v27, %v3078_v56  ;;  %v9307_v56 = vld [vmem:[#allocation2 + $0x20] sm:$0xff]  ;;  %v9309_v27 = vld [vmem:[#allocation2 + $0x28] sm:$0xff] }
 0x4c8   :  { %9179 = vtanh.f32 %v3064_v2  ;;  %v3089_v57 = vmul.f32 %v9178_v42, %v3081_v30  ;;  %v9308_v2 = vld [vmem:[#allocation2 + $0x18] sm:$0xff] }
 0x4c9   :  { %9181 = vrcp.f32 %v3032_v47  ;;  %v10822_v59 = vadd.f32 %v9172_v12, %v3086_v46  ;;  %v9306_v47 = vld [vmem:[#allocation2 + $0x10] sm:$0xff] }
 0x4ca   :  { %v10824_v60 = vadd.f32 %v9174_v16, %v3089_v57 }
 0x4cb   :  { %8317 = vmatprep.mubr.msk.f32.mxu1 %vm447_vm0, %v10822_v59  ;;  %8337 = vmatprep.mubr.msk.f32.mxu0 %vm447_vm0, %v10822_v59 }
 0x4cc   :  { %8318 = vmatmul.mubr.msk.f32.gmra.mrb[46].mxu1 %vm447_vm0, %v10816_v17  ;;  %8338 = vmatmul.mubr.msk.f32.gmra.mrb[42].mxu0 %vm447_vm0, %v10816_v17 }
 0x4d2   :  { %v9180_v0 = vpop.eup %9179 }
 0x4d3   :  { %v3080_v52 = vsub.f32 %v9302_v61, %v9180_v0  ;;  %v9182_v38 = vpop.eup %9181  ;;  %v9310_v61 = vld [vmem:[#allocation14] ss:$0 sm:$0xff] }
 0x4d5   :  { %v3088_v1 = vmul.f32 %v9182_v38, %v3080_v52  ;;  %v9311_v38 = vld [vmem:[#allocation2 + $0x30] sm:$0xff] }
 0x4d7   :  { %v10834_v4 = vadd.f32 %v9180_v0, %v3088_v1 }
 0x4d9   :  { %8320 = vmatprep.mubr.msk.f32.mxu1 %vm447_vm0, %v10834_v4  ;;  %8340 = vmatprep.mubr.msk.f32.mxu0 %vm447_vm0, %v10834_v4 }
 0x4da   :  { %8321 = vmatmul.mubr.msk.f32.gmra.mrb[48].mxu1 %vm447_vm0, %v10824_v60  ;;  %8341 = vmatmul.mubr.msk.f32.gmra.mrb[44].mxu0 %vm447_vm0, %v10824_v60 }
 0x4db   :  { %8345 = vmatprep.mubr.msk.f32.mxu1 %vm9883_vm1, %v9882_v20  ;;  %8365 = vmatprep.mubr.msk.f32.mxu0 %vm9883_vm1, %v9882_v20 }
 0x595   :  { %v8313_v55 = vpop.f32.mrb[42].mxu1  ;;  %v8333_v11 = vpop.f32.mrb[38].mxu0 }
 0x596   :  { %v3188_v44 = vpop.f32.mrb[43].mxu1  ;;  %v3293_v45 = vpop.f32.mrb[39].mxu0  ;;  %v3194_v58 = vadd.f32 %v9303_v26, %v8313_v55  ;;  %v3299_v1 = vadd.f32 %v9310_v61, %v8333_v11  ;;  %v9312_v55 = vld [vmem:[#allocation2 + $0x38] sm:$0xff] }
 0x597   :  { %v3189_v28 = vadd.f32 %v9303_v26, %v3188_v44  ;;  %v3294_v52 = vadd.f32 %v9310_v61, %v3293_v45  ;;  %v9313_v45 = vld [vmem:[#allocation5] sm:$0xff] }
 0x599   :  { %v8316_v39 = vpop.f32.mrb[44].mxu1  ;;  %v10848_v49 = vpop.f32.mrb[40].mxu0  ;;  %8344 = vmatpush3.msra.mxu1 %v3189_v28 }
 0x59a   :  { %v3198_v50 = vpop.f32.mrb[45].mxu1  ;;  %v3303_v3 = vpop.f32.mrb[41].mxu0  ;;  %8346 = vmatmul.mubr.msk.f32.vlgmr.msra.gmra.mrb[50].mxu1 %vm688_vm2, %v9304_v36  ;;  %8348 = vmatprep.subr.mxu1 %v9882_v20  ;;  %v3204_v40 = vadd.f32 %v9303_v26, %v8316_v39  ;;  %v3309_v11 = vadd.f32 %v9310_v61, %v10848_v49  ;;  %v9316_v49 = vld [vmem:[#allocation5 + $0x18] sm:$0xff] }
 0x59b   :  { %v3199_v6 = vadd.f32 %v9303_v26, %v3198_v50  ;;  %8349 = vmatpush3.msra.mxu1 %v3194_v58  ;;  %8350 = vmatprep.mubr.msk.f32.mxu1 %vm9883_vm1, %v9882_v20  ;;  %v3304_v44 = vadd.f32 %v9310_v61, %v3303_v3  ;;  %v9315_v58 = vld [vmem:[#allocation5 + $0x10] sm:$0xff]  ;;  %v9317_v3 = vld [vmem:[#allocation5 + $0x20] sm:$0xff] }
 0x59c   :  { %8353 = vmatprep.subr.mxu1 %v9882_v20 }
 0x59e   :  { %8351 = vmatmul.mubr.msk.f32.vlgmr.msra.gmra.mrb[52].mxu1 %vm688_vm2, %v9305_v13  ;;  %v9319_v13 = vld [vmem:[#allocation5 + $0x30] sm:$0xff] }
 0x59f   :  { %8354 = vmatpush3.msra.mxu1 %v3199_v6  ;;  %8355 = vmatprep.mubr.msk.f32.mxu1 %vm9883_vm1, %v9882_v20  ;;  %v8319_v15 = vpop.f32.mrb[46].mxu1  ;;  %v10858_v54 = vpop.f32.mrb[42].mxu0  ;;  %v9318_v6 = vld [vmem:[#allocation5 + $0x28] sm:$0xff] }
 0x5a0   :  { %8358 = vmatprep.subr.mxu1 %v9882_v20  ;;  %v3208_v9 = vpop.f32.mrb[47].mxu1  ;;  %v3313_v12 = vpop.f32.mrb[43].mxu0  ;;  %v3214_v19 = vadd.f32 %v9303_v26, %v8319_v15  ;;  %v3319_v39 = vadd.f32 %v9310_v61, %v10858_v54  ;;  %v9320_v15 = vld [vmem:[#allocation5 + $0x38] sm:$0xff]  ;;  %v5646_v54 = vlaneseq }
 0x5a1   :  { %v3209_v16 = vadd.f32 %v9303_v26, %v3208_v9  ;;  %v3314_v28 = vadd.f32 %v9310_v61, %v3313_v12 }
 0x5a2   :  { %8356 = vmatmul.mubr.msk.f32.vlgmr.msra.gmra.mrb[54].mxu1 %vm688_vm2, %v9306_v47 }
 0x5a3   :  { %8359 = vmatpush3.msra.mxu1 %v3204_v40  ;;  %8360 = vmatprep.mubr.msk.f32.mxu1 %vm9883_vm1, %v9882_v20  ;;  %v5645_v40 = vld [vmem:[#allocation8] sm:$0xff] }
 0x5a4   :  { %8364 = vmatpush3.msra.mxu0 %v3209_v16  ;;  %8368 = vmatprep.subr.mxu1 %v9882_v20 }
 0x5a5   :  { %8366 = vmatmul.mubr.msk.f32.vlgmr.msra.gmra.mrb[46].mxu0 %vm688_vm2, %v9307_v56  ;;  %8373 = vmatprep.subr.mxu0 %v9882_v20 }
 0x5a6   :  { %8375 = vmatprep.mubr.msk.f32.mxu0 %vm9883_vm1, %v9882_v20  ;;  %8361 = vmatmul.mubr.msk.f32.vlgmr.msra.gmra.mrb[56].mxu1 %vm688_vm2, %v9308_v2 }
 0x5a7   :  { %8369 = vmatpush3.msra.mxu1 %v3214_v19  ;;  %8370 = vmatprep.mubr.msk.f32.mxu1 %vm9883_vm1, %v9882_v20 }
 0x5a8   :  { %8378 = vmatprep.subr.mxu1 %v9882_v20 }
 0x5aa   :  { %8371 = vmatmul.mubr.msk.f32.vlgmr.msra.gmra.mrb[58].mxu1 %vm688_vm2, %v9309_v27 }
 0x5ab   :  { %8380 = vmatprep.mubr.msk.f32.mxu1 %vm9883_vm1, %v9882_v20 }
 0x5ad   :  { %v8322_v18 = vpop.f32.mrb[48].mxu1  ;;  %v8342_v30 = vpop.f32.mrb[44].mxu0 }
 0x5ae   :  { %v3224_v42 = vadd.f32 %v9303_v26, %v8322_v18  ;;  %v3218_v46 = vpop.f32.mrb[49].mxu1  ;;  %v3323_v57 = vpop.f32.mrb[45].mxu0  ;;  %v3329_v36 = vadd.f32 %v9310_v61, %v8342_v30 }
 0x5af   :  { %v3219_v0 = vadd.f32 %v9303_v26, %v3218_v46  ;;  %v9314_v26 = vld [vmem:[#allocation5 + $0x8] sm:$0xff]  ;;  %v3324_v50 = vadd.f32 %v9310_v61, %v3323_v57 }
 0x5b0   :  { %8379 = vmatpush3.msra.mxu1 %v3224_v42 }
 0x5b1   :  { %8374 = vmatpush3.msra.mxu0 %v3219_v0  ;;  %8388 = vmatprep.subr.mxu1 %v9882_v20 }
 0x5b2   :  { %8376 = vmatmul.mubr.msk.f32.vlgmr.msra.gmra.mrb[48].mxu0 %vm688_vm2, %v9311_v38  ;;  %8383 = vmatprep.subr.mxu0 %v9882_v20 }
 0x5b3   :  { %8384 = vmatpush3.msra.mxu0 %v3294_v52  ;;  %8385 = vmatprep.mubr.msk.f32.mxu0 %vm9883_vm1, %v9882_v20 }
 0x5b4   :  { %8393 = vmatprep.subr.mxu0 %v9882_v20  ;;  %8381 = vmatmul.mubr.msk.f32.vlgmr.msra.gmra.mrb[60].mxu1 %vm688_vm2, %v9312_v55 }
 0x5b5   :  { %8389 = vmatpush3.msra.mxu1 %v3299_v1  ;;  %8390 = vmatprep.mubr.msk.f32.mxu1 %vm9883_vm1, %v9882_v20 }
 0x5b6   :  { %8386 = vmatmul.mubr.msk.f32.vlgmr.msra.gmra.mrb[50].mxu0 %vm688_vm2, %v9313_v45  ;;  %8398 = vmatprep.subr.mxu1 %v9882_v20 }
 0x5b7   :  { %8394 = vmatpush3.msra.mxu0 %v3304_v44  ;;  %8395 = vmatprep.mubr.msk.f32.mxu0 %vm9883_vm1, %v9882_v20 }
 0x5b8   :  { %8403 = vmatprep.subr.mxu0 %v9882_v20  ;;  %8391 = vmatmul.mubr.msk.f32.vlgmr.msra.gmra.mrb[62].mxu1 %vm688_vm2, %v9314_v26 }
 0x5b9   :  { %8399 = vmatpush3.msra.mxu1 %v3309_v11  ;;  %8400 = vmatprep.mubr.msk.f32.mxu1 %vm9883_vm1, %v9882_v20 }
 0x5ba   :  { %8396 = vmatmul.mubr.msk.f32.vlgmr.msra.gmra.mrb[52].mxu0 %vm688_vm2, %v9315_v58  ;;  %8408 = vmatprep.subr.mxu1 %v9882_v20 }
 0x5bb   :  { %8404 = vmatpush3.msra.mxu0 %v3314_v28  ;;  %8405 = vmatprep.mubr.msk.f32.mxu0 %vm9883_vm1, %v9882_v20 }
 0x5bc   :  { %8413 = vmatprep.subr.mxu0 %v9882_v20  ;;  %8401 = vmatmul.mubr.msk.f32.vlgmr.msra.gmra.mrb[64].mxu1 %vm688_vm2, %v9316_v49 }
 0x5bd   :  { %8409 = vmatpush3.msra.mxu1 %v3319_v39  ;;  %8410 = vmatprep.mubr.msk.f32.mxu1 %vm9883_vm1, %v9882_v20 }
 0x5be   :  { %8406 = vmatmul.mubr.msk.f32.vlgmr.msra.gmra.mrb[54].mxu0 %vm688_vm2, %v9317_v3  ;;  %8418 = vmatprep.subr.mxu1 %v9882_v20 }
 0x5bf   :  { %8414 = vmatpush3.msra.mxu0 %v3324_v50  ;;  %8415 = vmatprep.mubr.msk.f32.mxu0 %vm9883_vm1, %v9882_v20 }
 0x5c0   :  { %8411 = vmatmul.mubr.msk.f32.vlgmr.msra.gmra.mrb[66].mxu1 %vm688_vm2, %v9318_v6  ;;  %8821 = vmatprep.subr.bf16.mxu0 %v10472_v23  ;;  %v9321_v6 = vld [vmem:[#allocation17] ss:$0 sm:$0xff] }
 0x5c1   :  { %8419 = vmatpush3.msra.mxu1 %v3329_v36  ;;  %8420 = vmatprep.mubr.msk.f32.mxu1 %vm9883_vm1, %v9882_v20 }
 0x5c2   :  { %8416 = vmatmul.mubr.msk.f32.vlgmr.msra.gmra.mrb[56].mxu0 %vm688_vm2, %v9319_v13  ;;  %8845 = vmatprep.subr.bf16.mxu1 %v10474_v25 }
 0x5c3   :  { %8823 = vmatpush3.bf16.msra.mxu0 %v10472_v23  ;;  %v10923_v23 = vshrl.u32 %v5646_v54, 7 }
 0x5c4   :  { %8421 = vmatmul.mubr.msk.f32.vlgmr.msra.gmra.mrb[68].mxu1 %vm688_vm2, %v9320_v15  ;;  %8825 = vmatprep.subr.bf16.mxu0 %v10480_v29 }
 0x5c5   :  { %8847 = vmatpush3.bf16.msra.mxu1 %v10474_v25  ;;  %v10926_v9 = vsub.s32 0, %v10923_v23  ;;  %v10929_v25 = vsub.s32 1, %v10923_v23  ;;  %v10932_v12 = vsub.s32 2, %v10923_v23  ;;  %v10941_v19 = vsub.s32 4, %v10923_v23 }
 0x5c6   :  { %8849 = vmatprep.subr.bf16.mxu1 %v10482_v31  ;;  %v10945_v2 = vsub.s32 5, %v10923_v23  ;;  %v10949_v18 = vsub.s32 6, %v10923_v23  ;;  %v10953_v42 = vsub.s32 7, %v10923_v23 }
 0x5c7   :  { %8827 = vmatpush3.bf16.msra.mxu0 %v10480_v29  ;;  %v10935_v29 = vsub.s32 3, %v10923_v23  ;;  %v5665_v16 = vrot.slane %v5645_v40, %v10932_v12  ;;  %v5658_v47 = vrot.slane %v5645_v40, %v10929_v25  ;;  %v5679_v27 = vrot.slane %v5645_v40, %v10941_v19 }
 0x5c8   :  { %8829 = vmatprep.subr.bf16.mxu0 %v10488_v35  ;;  %v5686_v30 = vrot.slane %v5645_v40, %v10945_v2  ;;  %v5693_v46 = vrot.slane %v5645_v40, %v10949_v18  ;;  %v5700_v57 = vrot.slane %v5645_v40, %v10953_v42 }
 0x5c9   :  { %8851 = vmatpush3.bf16.msra.mxu1 %v10482_v31  ;;  %v5651_v31 = vrot.slane %v5645_v40, %v10926_v9  ;;  %5667 = vbcast.lane.b32.xlu1 %v5665_v16, 256  ;;  %v5672_v56 = vrot.slane %v5645_v40, %v10935_v29 }
 0x5ca   :  { %8853 = vmatprep.subr.bf16.mxu1 %v10490_v37 }
 0x5cb   :  { %5653 = vbcast.lane.b32.xlu0 %v5651_v31, 256 }
 0x5cd   :  { %5674 = vbcast.lane.b32.xlu1 %v5672_v56, 256 }
 0x5cf   :  { %5660 = vbcast.lane.b32.xlu0 %v5658_v47, 256 }
 0x5d1   :  { %5688 = vbcast.lane.b32.xlu1 %v5686_v30, 256 }
 0x5d3   :  { %5681 = vbcast.lane.b32.xlu0 %v5679_v27, 256 }
 0x5d5   :  { %5702 = vbcast.lane.b32.xlu1 %v5700_v57, 256 }
 0x5d7   :  { %5695 = vbcast.lane.b32.xlu0 %v5693_v46, 256 }
 0x66d   :  { %v10957_v0 = vpop.f32.mrb[50].mxu1 }
 0x66e   :  { %v8347_v61 = vpop.f32.mrb[51].mxu1 }
 0x671   :  { %v10959_v52 = vpop.f32.mrb[52].mxu1 }
 0x672   :  { %v8352_v38 = vpop.f32.mrb[53].mxu1 }
 0x675   :  { %v10961_v1 = vpop.f32.mrb[54].mxu1 }
 0x676   :  { %v8357_v55 = vpop.f32.mrb[55].mxu1 }
 0x678   :  { %v10963_v44 = vpop.f32.mrb[46].mxu0 }
 0x679   :  { %v10965_v45 = vpop.f32.mrb[56].mxu1  ;;  %v8367_v11 = vpop.f32.mrb[47].mxu0 }
 0x67a   :  { %v8362_v26 = vpop.f32.mrb[57].mxu1 }
 0x67d   :  { %v10967_v28 = vpop.f32.mrb[58].mxu1 }
 0x67e   :  { %v8372_v58 = vpop.f32.mrb[59].mxu1 }
 0x685   :  { %v10969_v39 = vpop.f32.mrb[48].mxu0 }
 0x686   :  { %v8377_v49 = vpop.f32.mrb[49].mxu0 }
 0x687   :  { %v10971_v50 = vpop.f32.mrb[60].mxu1 }
 0x688   :  { %v8382_v3 = vpop.f32.mrb[61].mxu1 }
 0x689   :  { %v3966_v36 = vpop.f32.mrb[50].mxu0 }
 0x68a   :  { %v10973_v13 = vadd.f32 %v9321_v6, %v3966_v36  ;;  %v8387_v15 = vpop.f32.mrb[51].mxu0  ;;  %v9322_v36 = vld [vmem:[#allocation16] ss:$0 sm:$0xff] }
 0x68b   :  { %v4036_v40 = vpop.f32.mrb[62].mxu1  ;;  %v11026_v15 = vadd.f32 %v9322_v36, %v10957_v0  ;;  %v11051_v0 = vadd.f32 %v9322_v36, %v10965_v45 }
 0x68c   :  { %v10975_v31 = vadd.f32 %v9321_v6, %v4036_v40  ;;  %v8392_v16 = vpop.f32.mrb[63].mxu1  ;;  %8431 = vmatprep.mubr.msk.f32.mxu0 %vm447_vm0, %v10973_v13  ;;  %8491 = vmatprep.mubr.msk.f32.mxu1 %vm447_vm0, %v10973_v13  ;;  %v11040_v40 = vadd.f32 %v9322_v36, %v10961_v1 }
 0x68d   :  { %v4106_v47 = vpop.f32.mrb[52].mxu0 }
 0x68e   :  { %v10981_v56 = vadd.f32 %v9321_v6, %v4106_v47  ;;  %v8397_v27 = vpop.f32.mrb[53].mxu0  ;;  %8432 = vmatmul.mubr.msk.f32.vlgmr.msra.gmra.mrb[58].mxu0 %vm447_vm0, %v10975_v31  ;;  %8492 = vmatmul.mubr.msk.f32.vlgmr.msra.gmra.mrb[70].mxu1 %vm447_vm0, %v10975_v31 }
 0x68f   :  { %v4176_v30 = vpop.f32.mrb[64].mxu1  ;;  %8831 = vmatpush3.bf16.msra.mxu0 %v10488_v35  ;;  %8855 = vmatpush3.bf16.msra.mxu1 %v10490_v37 }
 0x690   :  { %v10989_v46 = vadd.f32 %v9321_v6, %v4176_v30  ;;  %v8402_v57 = vpop.f32.mrb[65].mxu1  ;;  %8434 = vmatprep.mubr.msk.f32.mxu0 %vm447_vm0, %v10981_v56  ;;  %8494 = vmatprep.mubr.msk.f32.mxu1 %vm447_vm0, %v10981_v56 }
 0x691   :  { %v4246_v61 = vpop.f32.mrb[54].mxu0  ;;  %8833 = vmatprep.subr.bf16.mxu0 %v10520_v7  ;;  %8857 = vmatprep.subr.bf16.mxu1 %v10522_v8 }
 0x692   :  { %v10997_v38 = vadd.f32 %v9321_v6, %v4246_v61  ;;  %v8407_v55 = vpop.f32.mrb[55].mxu0  ;;  %8435 = vmatmul.mubr.msk.f32.gmra.mrb[60].mxu0 %vm447_vm0, %v10989_v46  ;;  %8495 = vmatmul.mubr.msk.f32.gmra.mrb[72].mxu1 %vm447_vm0, %v10989_v46 }
 0x693   :  { %v4316_v35 = vpop.f32.mrb[66].mxu1  ;;  %8835 = vmatpush3.bf16.msra.mxu0 %v10520_v7  ;;  %8859 = vmatpush3.bf16.msra.mxu1 %v10522_v8 }
 0x694   :  { %v11005_v37 = vadd.f32 %v9321_v6, %v4316_v35  ;;  %v8412_v11 = vpop.f32.mrb[67].mxu1  ;;  %8437 = vmatprep.mubr.msk.f32.mxu0 %vm447_vm0, %v10997_v38  ;;  %8497 = vmatprep.mubr.msk.f32.mxu1 %vm447_vm0, %v10997_v38 }
 0x695   :  { %v4386_v26 = vpop.f32.mrb[56].mxu0  ;;  %8837 = vmatprep.subr.bf16.mxu0 %v10540_v33  ;;  %8861 = vmatprep.subr.bf16.mxu1 %v10542_v34 }
 0x696   :  { %v11013_v58 = vadd.f32 %v9321_v6, %v4386_v26  ;;  %v8417_v49 = vpop.f32.mrb[57].mxu0  ;;  %8438 = vmatmul.mubr.msk.f32.gmra.mrb[62].mxu0 %vm447_vm0, %v11005_v37  ;;  %8498 = vmatmul.mubr.msk.f32.gmra.mrb[74].mxu1 %vm447_vm0, %v11005_v37 }
 0x697   :  { %v4456_v7 = vpop.f32.mrb[68].mxu1 }
 0x698   :  { %v11019_v8 = vadd.f32 %v9321_v6, %v4456_v7  ;;  %v8422_v3 = vpop.f32.mrb[69].mxu1  ;;  %8440 = vmatprep.mubr.msk.f32.mxu0 %vm447_vm0, %v11013_v58  ;;  %8500 = vmatprep.mubr.msk.f32.mxu1 %vm447_vm0, %v11013_v58  ;;  %v11037_v6 = vadd.f32 %v9322_v36, %v10959_v52  ;;  %v11056_v52 = vadd.f32 %v9322_v36, %v10963_v44 }
 0x69a   :  { %8441 = vmatmul.mubr.msk.f32.gmra.mrb[64].mxu0 %vm447_vm0, %v11019_v8  ;;  %8501 = vmatmul.mubr.msk.f32.gmra.mrb[76].mxu1 %vm447_vm0, %v11019_v8 }
 0x69b   :  { %8451 = vmatprep.mubr.msk.f32.mxu0 %vm447_vm0, %v11026_v15  ;;  %8511 = vmatprep.mubr.msk.f32.mxu1 %vm447_vm0, %v11026_v15 }
 0x69e   :  { %8452 = vmatmul.mubr.msk.f32.vlgmr.msra.gmra.mrb[58].mxu0 %vm447_vm0, %v11037_v6  ;;  %8512 = vmatmul.mubr.msk.f32.vlgmr.msra.gmra.mrb[70].mxu1 %vm447_vm0, %v11037_v6 }
 0x69f   :  { %8454 = vmatprep.mubr.msk.f32.mxu0 %vm447_vm0, %v11040_v40  ;;  %8514 = vmatprep.mubr.msk.f32.mxu1 %vm447_vm0, %v11040_v40 }
 0x6a0   :  { %8839 = vmatpush3.bf16.msra.mxu0 %v10540_v33  ;;  %8863 = vmatpush3.bf16.msra.mxu1 %v10542_v34  ;;  %v11069_v33 = vadd.f32 %v9322_v36, %v10967_v28  ;;  %v3898_v34 = vadd.f32 %v9322_v36, %v10969_v39 }
 0x6a1   :  { %8841 = vmatprep.subr.bf16.mxu0 %v10587_v62  ;;  %8865 = vmatprep.subr.bf16.mxu1 %v10589_v63 }
 0x6a2   :  { %8455 = vmatmul.mubr.msk.f32.gmra.mrb[60].mxu0 %vm447_vm0, %v11051_v0  ;;  %8515 = vmatmul.mubr.msk.f32.gmra.mrb[72].mxu1 %vm447_vm0, %v11051_v0 }
 0x6a3   :  { %8457 = vmatprep.mubr.msk.f32.mxu0 %vm447_vm0, %v11056_v52  ;;  %8517 = vmatprep.mubr.msk.f32.mxu1 %vm447_vm0, %v11056_v52 }
 0x6a4   :  { %8843 = vmatpush3.bf16.msra.mxu0 %v10587_v62  ;;  %8867 = vmatpush3.bf16.msra.mxu1 %v10589_v63  ;;  %v3899_v62 = vadd.f32 %v9322_v36, %v10971_v50  ;;  %v9884_v63 = vmov 0  }
 0x6a5   :  { %8869 = vmatprep.subr.bf16.mxu0 %v10609_v21  ;;  %8885 = vmatprep.subr.bf16.mxu1 %v10611_v22 }
 0x6a6   :  { %8458 = vmatmul.mubr.msk.f32.gmra.mrb[62].mxu0 %vm447_vm0, %v11069_v33  ;;  %8518 = vmatmul.mubr.msk.f32.gmra.mrb[74].mxu1 %vm447_vm0, %v11069_v33 }
 0x6a7   :  { %8460 = vmatprep.mubr.msk.f32.mxu0 %vm447_vm0, %v3898_v34  ;;  %8520 = vmatprep.mubr.msk.f32.mxu1 %vm447_vm0, %v3898_v34 }
 0x6a8   :  { %9102 = vset.pattern.permute.xlu0 %v9884_v63 }
 0x6aa   :  { %8461 = vmatmul.mubr.msk.f32.gmra.mrb[64].mxu0 %vm447_vm0, %v3899_v62  ;;  %8521 = vmatmul.mubr.msk.f32.gmra.mrb[76].mxu1 %vm447_vm0, %v3899_v62 }
 0x6ab   :  { %8471 = vmatprep.mubr.msk.f32.mxu0 %vm447_vm0, %v10795_v48  ;;  %8531 = vmatprep.mubr.msk.f32.mxu1 %vm447_vm0, %v10795_v48 }
 0x6ae   :  { %8472 = vmatmul.mubr.msk.f32.vlgmr.msra.gmra.mrb[58].mxu0 %vm447_vm0, %v10793_v10  ;;  %8532 = vmatmul.mubr.msk.f32.vlgmr.msra.gmra.mrb[70].mxu1 %vm447_vm0, %v10793_v10 }
 0x6af   :  { %8474 = vmatprep.mubr.msk.f32.mxu0 %vm447_vm0, %v10810_v24  ;;  %8534 = vmatprep.mubr.msk.f32.mxu1 %vm447_vm0, %v10810_v24 }
 0x6b0   :  { %8871 = vmatpush3.bf16.msra.mxu0 %v10609_v21  ;;  %8887 = vmatpush3.bf16.msra.mxu1 %v10611_v22  ;;  %v6312_v21 = vld [vmem:[%s11577_s18] sm:$0xff]  ;;  %v11182_v22 = vpop.permute.xlu0 %5653 }
 0x6b1   :  { %8873 = vmatprep.subr.bf16.mxu0 %v10650_v32  ;;  %8889 = vmatprep.subr.bf16.mxu1 %v10652_v53 }
 0x6b2   :  { %8475 = vmatmul.mubr.msk.f32.gmra.mrb[60].mxu0 %vm447_vm0, %v10803_v5  ;;  %8535 = vmatmul.mubr.msk.f32.gmra.mrb[72].mxu1 %vm447_vm0, %v10803_v5 }
 0x6b3   :  { %8477 = vmatprep.mubr.msk.f32.mxu0 %vm447_vm0, %v10822_v59  ;;  %8537 = vmatprep.mubr.msk.f32.mxu1 %vm447_vm0, %v10822_v59 }
 0x6b4   :  { %8875 = vmatpush3.bf16.msra.mxu0 %v10650_v32  ;;  %8891 = vmatpush3.bf16.msra.mxu1 %v10652_v53  ;;  %v11186_v28 = vpop.permute.xlu0 %5660 }
 0x6b5   :  { %8877 = vmatprep.subr.bf16.mxu0 %v10666_v43  ;;  %8603 = vmatprep.subr.mxu1 %v9882_v20 }
 0x6b6   :  { %8478 = vmatmul.mubr.msk.f32.gmra.mrb[62].mxu0 %vm447_vm0, %v10816_v17  ;;  %8538 = vmatmul.mubr.msk.f32.gmra.mrb[74].mxu1 %vm447_vm0, %v10816_v17 }
 0x6b7   :  { %8480 = vmatprep.mubr.msk.f32.mxu0 %vm447_vm0, %v10834_v4  ;;  %8540 = vmatprep.mubr.msk.f32.mxu1 %vm447_vm0, %v10834_v4 }
 0x6b8   :  { %6314 = vperm.xlu0 %9102, %v6312_v21  }
 0x6ba   :  { %8481 = vmatmul.mubr.msk.f32.gmra.mrb[64].mxu0 %vm447_vm0, %v10824_v60  ;;  %8541 = vmatmul.mubr.msk.f32.gmra.mrb[76].mxu1 %vm447_vm0, %v10824_v60 }
 0x6bb   :  { %8551 = vmatprep.mubr.msk.f32.mxu0 %vm447_vm0, %v10973_v13  ;;  %8591 = vmatprep.mubr.msk.f32.mxu1 %vm447_vm0, %v10795_v48 }
 0x6be   :  { %8552 = vmatmul.mubr.msk.f32.vlgmr.msra.gmra.mrb[66].mxu0 %vm447_vm0, %v10975_v31  ;;  %8592 = vmatmul.mubr.msk.f32.vlgmr.msra.gmra.mrb[78].mxu1 %vm447_vm0, %v10793_v10 }
 0x6bf   :  { %8554 = vmatprep.mubr.msk.f32.mxu0 %vm447_vm0, %v10981_v56  ;;  %8594 = vmatprep.mubr.msk.f32.mxu1 %vm447_vm0, %v10810_v24 }
 0x6c0   :  { %8879 = vmatpush3.bf16.msra.mxu0 %v10666_v43 }
 0x6c1   :  { %8881 = vmatprep.subr.bf16.mxu0 %v10696_v51 }
 0x6c2   :  { %8555 = vmatmul.mubr.msk.f32.gmra.mrb[68].mxu0 %vm447_vm0, %v10989_v46  ;;  %8595 = vmatmul.mubr.msk.f32.gmra.mrb[80].mxu1 %vm447_vm0, %v10803_v5 }
 0x6c3   :  { %8557 = vmatprep.mubr.msk.f32.mxu0 %vm447_vm0, %v10997_v38  ;;  %8597 = vmatprep.mubr.msk.f32.mxu1 %vm447_vm0, %v10822_v59 }
 0x6c4   :  { %8883 = vmatpush3.bf16.msra.mxu0 %v10696_v51 }
 0x6c5   :  { %8623 = vmatprep.subr.mxu0 %v9882_v20 }
 0x6c6   :  { %8558 = vmatmul.mubr.msk.f32.gmra.mrb[70].mxu0 %vm447_vm0, %v11005_v37  ;;  %8598 = vmatmul.mubr.msk.f32.gmra.mrb[82].mxu1 %vm447_vm0, %v10816_v17 }
 0x6c7   :  { %8560 = vmatprep.mubr.msk.f32.mxu0 %vm447_vm0, %v11013_v58  ;;  %8600 = vmatprep.mubr.msk.f32.mxu1 %vm447_vm0, %v10834_v4  ;;  %v11194_v58 = vpop.permute.xlu0 %5681 }
 0x6ca   :  { %8561 = vmatmul.mubr.msk.f32.gmra.mrb[72].mxu0 %vm447_vm0, %v11019_v8  ;;  %8601 = vmatmul.mubr.msk.f32.gmra.mrb[84].mxu1 %vm447_vm0, %v10824_v60 }
 0x6cb   :  { %8571 = vmatprep.mubr.msk.f32.mxu0 %vm447_vm0, %v11026_v15  ;;  %8605 = vmatprep.mubr.msk.f32.mxu1 %vm9883_vm1, %v9882_v20 }
 0x6ce   :  { %8572 = vmatmul.mubr.msk.f32.vlgmr.msra.gmra.mrb[66].mxu0 %vm447_vm0, %v11037_v6 }
 0x6cf   :  { %8574 = vmatprep.mubr.msk.f32.mxu0 %vm447_vm0, %v11040_v40 }
 0x6d2   :  { %8575 = vmatmul.mubr.msk.f32.gmra.mrb[68].mxu0 %vm447_vm0, %v11051_v0 }
 0x6d3   :  { %8577 = vmatprep.mubr.msk.f32.mxu0 %vm447_vm0, %v11056_v52 }
 0x6d6   :  { %8578 = vmatmul.mubr.msk.f32.gmra.mrb[70].mxu0 %vm447_vm0, %v11069_v33 }
 0x6d7   :  { %8580 = vmatprep.mubr.msk.f32.mxu0 %vm447_vm0, %v3898_v34 }
 0x6da   :  { %8581 = vmatmul.mubr.msk.f32.gmra.mrb[72].mxu0 %vm447_vm0, %v3899_v62 }
 0x6db   :  { %8625 = vmatprep.mubr.msk.f32.mxu0 %vm9883_vm1, %v9882_v20 }
 0x781   :  { %v8473_v32 = vpop.f32.mrb[58].mxu0  ;;  %v8533_v53 = vpop.f32.mrb[70].mxu1 }
 0x782   :  { %v8959_v43 = vadd.f32 %v10754_v14, %v8473_v32  ;;  %v4800_v51 = vpop.f32.mrb[59].mxu0  ;;  %v5123_v1 = vpop.f32.mrb[71].mxu1  ;;  %v8975_v30 = vadd.f32 %v10760_v41, %v8533_v53 }
 0x783   :  { %v8961_v44 = vadd.f32 %v10754_v14, %v4800_v51  ;;  %v8977_v11 = vadd.f32 %v10760_v41, %v5123_v1  ;;  %v11201_v1 = vpop.permute.xlu0 %5695 }
 0x784   :  { %v7557_v45 = vmul.f32 -1.442695, %v8959_v43  ;;  %v7565_v49 = vmul.f32 -1.442695, %v8975_v30 }
 0x785   :  { %v7556_v39 = vmul.f32 -1.442695, %v8961_v44  ;;  %v8476_v50 = vpop.f32.mrb[60].mxu0  ;;  %v8536_v13 = vpop.f32.mrb[72].mxu1  ;;  %v7564_v0 = vmul.f32 -1.442695, %v8977_v11 }
 0x786   :  { %9183 = vpow2.f32 %v7557_v45  ;;  %v8963_v31 = vadd.f32 %v10754_v14, %v8476_v50  ;;  %v4810_v16 = vpop.f32.mrb[61].mxu0  ;;  %v5133_v47 = vpop.f32.mrb[73].mxu1  ;;  %v8979_v52 = vadd.f32 %v10760_v41, %v8536_v13 }
 0x787   :  { %v8965_v56 = vadd.f32 %v10754_v14, %v4810_v16  ;;  %9185 = vpow2.f32 %v7556_v39  ;;  %v8981_v21 = vadd.f32 %v10760_v41, %v5133_v47  ;;  %v11205_v47 = vand.u32 127, %v5646_v54  ;;  %v6315_v30 = vpop.permute.xlu0 %6314 }
 0x788   :  { %v7559_v27 = vmul.f32 -1.442695, %v8963_v31  ;;  %v7567_v51 = vmul.f32 -1.442695, %v8979_v52 }
 0x789   :  { %v7558_v46 = vmul.f32 -1.442695, %v8965_v56  ;;  %v8479_v57 = vpop.f32.mrb[62].mxu0  ;;  %v8539_v61 = vpop.f32.mrb[74].mxu1  ;;  %v7566_v50 = vmul.f32 -1.442695, %v8981_v21  ;;  %vm6316_vm3 = vcmp.eq.s32.totalorder %v6315_v30, %v11205_v47  ;;  %vm5704_vm4 = vcmp.eq.s32.totalorder %v11182_v22, %v11205_v47 }
 0x78a   :  { %9187 = vpow2.f32 %v7559_v27  ;;  %v8967_v38 = vadd.f32 %v10754_v14, %v8479_v57  ;;  %v4820_v55 = vpop.f32.mrb[63].mxu0  ;;  %v5143_v35 = vpop.f32.mrb[75].mxu1  ;;  %v8983_v13 = vadd.f32 %v10760_v41, %v8539_v61  ;;  %v11213_v54 = vsel %vm6316_vm3, 1.0, %v9882_v20 }
 0x78b   :  { %v8969_v37 = vadd.f32 %v10754_v14, %v4820_v55  ;;  %9189 = vpow2.f32 %v7558_v46  ;;  %v8985_v27 = vadd.f32 %v10760_v41, %v5143_v35  ;;  %vm5705_vm5 = vcmp.eq.s32.totalorder %v11186_v28, %v11205_v47 }
 0x78c   :  { %v7561_v26 = vmul.f32 -1.442695, %v8967_v38  ;;  %v7569_v61 = vmul.f32 -1.442695, %v8983_v13  ;;  %vm5708_vm7 = vcmp.eq.s32.totalorder %v11194_v58, %v11205_v47  ;;  %vm5710_vm11 = vcmp.eq.s32.totalorder %v11201_v1, %v11205_v47  ;;  %v6545_v1 = vld [vmem:[#allocation28 + $0x8] sm:$0xff] }
 0x78d   :  { %v7560_v7 = vmul.f32 -1.442695, %v8969_v37  ;;  %v8482_v8 = vpop.f32.mrb[64].mxu0  ;;  %v8542_v3 = vpop.f32.mrb[76].mxu1  ;;  %v7576_v58 = vsel %vm5708_vm7, 1.0, %v9882_v20  ;;  %vm6468_vm3 = vcmask 1046534  }
 0x78e   :  { %9191 = vpow2.f32 %v7561_v26  ;;  %v8971_v36 = vadd.f32 %v10754_v14, %v8482_v8  ;;  %v4830_v15 = vpop.f32.mrb[65].mxu0  ;;  %v11197_v6 = vpop.f32.mrb[77].mxu1  ;;  %v8987_v35 = vadd.f32 %v10760_v41, %v8542_v3  ;;  %v11218_v8 = vld [vmem:[#allocation25 + $0x2] ss:$0 sm:$0xff]  ;;  %v6329_v3 = vrot.slane %v11213_v54, %v10929_v25 }
 0x78f   :  { %9193 = vpow2.f32 %v7560_v7  ;;  %v8973_v57 = vadd.f32 %v10754_v14, %v4830_v15  ;;  %v7568_v7 = vmul.f32 -1.442695, %v8985_v27  ;;  %v6336_v15 = vrot.slane %v11213_v54, %v10932_v12 }
 0x790   :  { %v9184_v40 = vpop.eup %9183  ;;  %v7563_v33 = vmul.f32 -1.442695, %v8971_v36  ;;  %9195 = vpow2.f32 %v7565_v49  ;;  %v6322_v49 = vrot.slane %v11213_v54, %v10926_v9 }
 0x791   :  { %v5518_v34 = vadd.f32 1.0, %v9184_v40  ;;  %v8593_v62 = vpop.f32.mrb[78].mxu1  ;;  %v9186_v63 = vpop.eup %9185  ;;  %v7562_v52 = vmul.f32 -1.442695, %v8973_v57  ;;  %6338 = vbcast.lane.b32.xlu0 %v6336_v15, 256 }
 0x792   :  { %9197 = vpow2.f32 %v7563_v33  ;;  %v5446_v32 = vpop.f32.mrb[79].mxu1  ;;  %v5517_v53 = vadd.f32 1.0, %v9186_v63  ;;  %v5452_v36 = vadd.f32 %v11218_v8, %v8593_v62  ;;  %6324 = vbcast.lane.b32.xlu1 %v6322_v49, 256  ;;  %v6350_v62 = vrot.slane %v11213_v54, %v10941_v19  ;;  %v11234_v57 = vld [vmem:[#allocation22 + $0x2] ss:$0 sm:$0xff] }
 0x793   :  { %9199 = vrcp.f32 %v5518_v34  ;;  %v5447_v21 = vadd.f32 %v11218_v8, %v5446_v32  ;;  %v6343_v32 = vrot.slane %v11213_v54, %v10935_v29 }
 0x794   :  { %v9188_v43 = vpop.eup %9187  ;;  %9201 = vpow2.f32 %v7564_v0 }
 0x795   :  { %9203 = vrcp.f32 %v5517_v53  ;;  %v5520_v44 = vadd.f32 1.0, %v9188_v43  ;;  %v8596_v45 = vpop.f32.mrb[80].mxu1  ;;  %v9190_v39 = vpop.eup %9189  ;;  %6352 = vbcast.lane.b32.xlu0 %v6350_v62, 256 }
 0x796   :  { %v5456_v31 = vpop.f32.mrb[81].mxu1  ;;  %v5519_v16 = vadd.f32 1.0, %v9190_v39  ;;  %6331 = vbcast.lane.b32.xlu1 %v6329_v3, 256 }
 0x797   :  { %9205 = vrcp.f32 %v5520_v44 }
 0x798   :  { %v9192_v56 = vpop.eup %9191  ;;  %9207 = vpow2.f32 %v7567_v51  ;;  %v7571_v51 = vmul.f32 -1.442695, %v8987_v35 }
 0x799   :  { %9209 = vrcp.f32 %v5519_v16  ;;  %v5522_v46 = vadd.f32 1.0, %v9192_v56  ;;  %v8599_v38 = vpop.f32.mrb[82].mxu1  ;;  %v9194_v55 = vpop.eup %9193 }
 0x79a   :  { %9211 = vpow2.f32 %v7566_v50  ;;  %v11210_v37 = vpop.f32.mrb[83].mxu1  ;;  %v9196_v11 = vpop.eup %9195  ;;  %v5521_v26 = vadd.f32 1.0, %v9194_v55  ;;  %v5462_v50 = vadd.f32 %v11218_v8, %v8596_v45  ;;  %v6364_v45 = vrot.slane %v11213_v54, %v10949_v18  ;;  %6345 = vbcast.lane.b32.xlu1 %v6343_v32, 256 }
 0x79b   :  { %9213 = vrcp.f32 %v5522_v46  ;;  %v5574_v44 = vadd.f32 1.0, %v9196_v11  ;;  %v5457_v46 = vadd.f32 %v11218_v8, %v5456_v31  ;;  %v5472_v31 = vadd.f32 %v11218_v8, %v8599_v38 }
 0x79c   :  { %v9198_v14 = vpop.eup %9197  ;;  %9215 = vrcp.f32 %v5521_v26  ;;  %v8989_v26 = vadd.f32 %v10760_v41, %v11197_v6  ;;  %v5467_v41 = vadd.f32 %v11218_v8, %v11210_v37  ;;  %6366 = vbcast.lane.b32.xlu0 %v6364_v45, 256 }
 0x79d   :  { %v9200_v40 = vpop.eup %9199  ;;  %v5524_v0 = vadd.f32 1.0, %v9198_v14  ;;  %v8602_v33 = vpop.f32.mrb[84].mxu1  ;;  %9217 = vpow2.f32 %v7569_v61 }
 0x79e   :  { %v9202_v34 = vpop.eup %9201  ;;  %v5598_v63 = vmul.f32 %v9200_v40, %v5452_v36  ;;  %v11226_v53 = vpop.f32.mrb[85].mxu1 }
 0x79f   :  { %v9204_v43 = vpop.eup %9203  ;;  %9219 = vrcp.f32 %v5524_v0  ;;  %v5573_v16 = vadd.f32 1.0, %v9202_v34 }
 0x7a0   :  { %9221 = vpow2.f32 %v7568_v7  ;;  %v5597_v39 = vmul.f32 %v9204_v43, %v5447_v21 }
 0x7a1   :  { %v9206_v13 = vpop.eup %9205  ;;  %9223 = vpow2.f32 %v7562_v52  ;;  %v8573_v56 = vpop.f32.mrb[66].mxu0  ;;  %v6357_v52 = vrot.slane %v11213_v54, %v10945_v2 }
 0x7a2   :  { %v9208_v27 = vpop.eup %9207  ;;  %v5600_v30 = vmul.f32 %v9206_v13, %v5462_v50  ;;  %v5373_v55 = vadd.f32 %v11234_v57, %v8573_v56  ;;  %v5333_v61 = vpop.f32.mrb[67].mxu0  ;;  %9225 = vpow2.f32 %v7571_v51  ;;  %v5482_v51 = vadd.f32 %v11218_v8, %v8602_v33 }
 0x7a3   :  { %v9210_v11 = vpop.eup %9209  ;;  %v5372_v35 = vadd.f32 %v11234_v57, %v5333_v61  ;;  %9227 = vrcp.f32 %v5574_v44  ;;  %v5576_v15 = vadd.f32 1.0, %v9208_v27  ;;  %v7570_v50 = vmul.f32 -1.442695, %v8989_v26  ;;  %6359 = vbcast.lane.b32.xlu1 %v6357_v52, 256 }
 0x7a4   :  { %v9212_v49 = vpop.eup %9211  ;;  %v5599_v14 = vmul.f32 %v9210_v11, %v5457_v46  ;;  %v5606_v7 = vadd.f32 %v5598_v63, %v5373_v55  ;;  %9229 = vrcp.f32 %v5573_v16  ;;  %v6371_v16 = vrot.slane %v11213_v54, %v10953_v42 }
 0x7a5   :  { %v9214_v36 = vpop.eup %9213  ;;  %v5605_v40 = vadd.f32 %v5597_v39, %v5372_v35  ;;  %v8576_v0 = vpop.f32.mrb[68].mxu0  ;;  %v5575_v62 = vadd.f32 1.0, %v9212_v49 }
 0x7a6   :  { %v5602_v3 = vmul.f32 %v9214_v36, %v5472_v31  ;;  %9231 = vtanh.f32 %v5606_v7  ;;  %v5375_v6 = vadd.f32 %v11234_v57, %v8576_v0  ;;  %v5343_v34 = vpop.f32.mrb[69].mxu0  ;;  %v9216_v38 = vpop.eup %9215 }
 0x7a7   :  { %9233 = vtanh.f32 %v5605_v40  ;;  %v5374_v63 = vadd.f32 %v11234_v57, %v5343_v34  ;;  %v9218_v21 = vpop.eup %9217  ;;  %v5601_v43 = vmul.f32 %v9216_v38, %v5467_v41  ;;  %6373 = vbcast.lane.b32.xlu1 %v6371_v16, 256  ;;  %v5668_v41 = vpop.permute.xlu1 %5667 }
 0x7a8   :  { %v5608_v44 = vadd.f32 %v5600_v30, %v5375_v6  ;;  %9235 = vrcp.f32 %v5576_v15  ;;  %v5578_v61 = vadd.f32 1.0, %v9218_v21  ;;  %vm5706_vm6 = vcmp.eq.s32.totalorder %v5668_v41, %v11205_v47 }
 0x7a9   :  { %v9220_v39 = vpop.eup %9219  ;;  %v5607_v13 = vadd.f32 %v5599_v14, %v5374_v63  ;;  %v8579_v37 = vpop.f32.mrb[70].mxu0  ;;  %v7578_v41 = vsel %vm5710_vm11, 1.0, %v9882_v20 }
 0x7aa   :  { %v9222_v56 = vpop.eup %9221  ;;  %v5604_v32 = vmul.f32 %v9220_v39, %v5482_v51  ;;  %9237 = vtanh.f32 %v5608_v44  ;;  %v5377_v27 = vadd.f32 %v11234_v57, %v8579_v37  ;;  %v5353_v46 = vpop.f32.mrb[71].mxu0 }
 0x7ab   :  { %v9224_v55 = vpop.eup %9223  ;;  %9239 = vtanh.f32 %v5607_v13  ;;  %v5376_v33 = vadd.f32 %v11234_v57, %v5353_v46  ;;  %v5577_v7 = vadd.f32 1.0, %v9222_v56 }
 0x7ac   :  { %9241 = vrcp.f32 %v5575_v62  ;;  %v5523_v30 = vadd.f32 1.0, %v9224_v55  ;;  %v5610_v45 = vadd.f32 %v5602_v3, %v5377_v27  ;;  %v9226_v11 = vpop.eup %9225 }
 0x7ad   :  { %9243 = vpow2.f32 %v7570_v50  ;;  %v5609_v26 = vadd.f32 %v5601_v43, %v5376_v33  ;;  %v8582_v35 = vpop.f32.mrb[72].mxu0  ;;  %v9228_v54 = vpop.eup %9227  ;;  %v5580_v15 = vadd.f32 1.0, %v9226_v11  ;;  %v5477_v50 = vadd.f32 %v11218_v8, %v11226_v53 }
 0x7ae   :  { %9245 = vrcp.f32 %v5523_v30  ;;  %v5379_v49 = vadd.f32 %v11234_v57, %v8582_v35  ;;  %v5363_v14 = vpop.f32.mrb[73].mxu0  ;;  %v9230_v31 = vpop.eup %9229  ;;  %v7573_v8 = vsel %vm5705_vm5, 1.0, %v9882_v20  ;;  %v7574_v35 = vsel %vm5706_vm6, 1.0, %v9882_v20 }
 0x7af   :  { %9247 = vrcp.f32 %v5578_v61  ;;  %v5378_v22 = vadd.f32 %v11234_v57, %v5363_v14 }
 0x7b0   :  { %v9232_v36 = vpop.eup %9231  ;;  %9249 = vtanh.f32 %v5610_v45  ;;  %v5612_v40 = vadd.f32 %v5604_v32, %v5379_v49 }
 0x7b1   :  { %v9234_v0 = vpop.eup %9233  ;;  %9251 = vtanh.f32 %v5609_v26  ;;  %v5622_v52 = vsub.f32 %v10793_v10, %v9232_v36  ;;  %v7572_v10 = vsel %vm5704_vm4, 1.0, %v9882_v20  ;;  %vm6470_vm4 = vcmask 1047559  }
 0x7b2   :  { %9253 = vtanh.f32 %v5612_v40  ;;  %v5621_v3 = vsub.f32 %v10795_v48, %v9234_v0  ;;  %v9236_v6 = vpop.eup %9235 }
 0x7b3   :  { %9255 = vrcp.f32 %v5577_v7  ;;  %v5630_v34 = vmul.f32 %v9228_v54, %v5622_v52 }
 0x7b4   :  { %v9238_v38 = vpop.eup %9237  ;;  %9257 = vrcp.f32 %v5580_v15  ;;  %v5629_v63 = vmul.f32 %v9230_v31, %v5621_v3 }
 0x7b5   :  { %v9240_v21 = vpop.eup %9239  ;;  %v5638_v62 = vadd.f32 %v9232_v36, %v5630_v34  ;;  %v5624_v43 = vsub.f32 %v10803_v5, %v9238_v38  ;;  %v5675_v5 = vpop.permute.xlu1 %5674  ;;  %v6546_v34 = vld [vmem:[#allocation28 + $0x10] sm:$0xff] }
 0x7b6   :  { %v9242_v51 = vpop.eup %9241  ;;  %v5637_v44 = vadd.f32 %v9234_v0, %v5629_v63  ;;  %v5623_v48 = vsub.f32 %v10810_v24, %v9240_v21  ;;  %vm5707_vm8 = vcmp.eq.s32.totalorder %v5675_v5, %v11205_v47 }
 0x7b7   :  { %v9244_v39 = vpop.eup %9243  ;;  %v5632_v13 = vmul.f32 %v9236_v6, %v5624_v43  ;;  %v7575_v31 = vsel %vm5707_vm8, 1.0, %v9882_v20  ;;  %v9885_v43 = vmov 0.0|0.0  }
 0x7b8   :  { %v9246_v37 = vpop.eup %9245  ;;  %8604 = vmatpush3.msra.mxu1 %v5637_v44  ;;  %v5631_v16 = vmul.f32 %v9242_v51, %v5623_v48  ;;  %v5579_v57 = vadd.f32 1.0, %v9244_v39  ;;  %v6442_v44 = vld [vmem:[%s11521_s17 + $0x18] sm:$0xff] }
 0x7b9   :  { %v9248_v56 = vpop.eup %9247  ;;  %v5603_v32 = vmul.f32 %v9246_v37, %v5477_v50  ;;  %8606 = vmatmul.mubr.msk.f32.vlgmr.msra.gmra.mrb[86].mxu1 %vm688_vm2, %v7572_v10  ;;  %8608 = vmatprep.subr.mxu1 %v9882_v20  ;;  %v5640_v24 = vadd.f32 %v9238_v38, %v5632_v13  ;;  %v5689_v54 = vpop.permute.xlu1 %5688  ;;  %v6547_v38 = vld [vmem:[#allocation28 + $0x18] sm:$0xff]  ;;  %v6441_v10 = vld [vmem:[%s11521_s17 + $0x10] sm:$0xff]  ;;  %v7103_v50 = vld [vmem:[#allocation34] sm:$0xff] }
 0x7ba   :  { %v9250_v27 = vpop.eup %9249  ;;  %8609 = vmatpush3.msra.mxu1 %v5638_v62  ;;  %8610 = vmatprep.mubr.msk.f32.mxu1 %vm9883_vm1, %v9882_v20  ;;  %v5639_v28 = vadd.f32 %v9240_v21, %v5631_v16  ;;  %vm5709_vm9 = vcmp.eq.s32.totalorder %v5689_v54, %v11205_v47  ;;  %v8902_v63 = vpack.c.bf16 %v6547_v38, %v6546_v34  ;;  %v6439_v21 = vld [vmem:[%s11521_s17] sm:$0xff]  ;;  %v6440_v62 = vld [vmem:[%s11521_s17 + $0x8] sm:$0xff] }
 0x7bb   :  { %v9252_v53 = vpop.eup %9251  ;;  %v5611_v46 = vadd.f32 %v5603_v32, %v5378_v22  ;;  %8613 = vmatprep.subr.mxu1 %v9882_v20  ;;  %v5626_v55 = vsub.f32 %v10816_v17, %v9250_v27  ;;  %v7577_v36 = vsel %vm5709_vm9, 1.0, %v9882_v20  ;;  %v8893_v51 = vpack.c.bf16 %v6440_v62, %v6439_v21  ;;  %v7104_v22 = vld [vmem:[#allocation34 + $0x8] sm:$0xff] }
 0x7bc   :  { %v9254_v61 = vpop.eup %9253  ;;  %v5625_v33 = vsub.f32 %v10822_v59, %v9252_v53  ;;  %v8896_v48 = vpack.c.bf16 %v6442_v44, %v6441_v10 }
 0x7bd   :  { %v9256_v30 = vpop.eup %9255  ;;  %9259 = vtanh.f32 %v5611_v46  ;;  %8611 = vmatmul.mubr.msk.f32.vlgmr.msra.gmra.mrb[88].mxu1 %vm688_vm2, %v7573_v8  ;;  %v5634_v45 = vmul.f32 %v9248_v56, %v5626_v55  ;;  %v5628_v11 = vsub.f32 %v10824_v60, %v9254_v61  ;;  %v5703_v7 = vpop.permute.xlu1 %5702  ;;  %v8915_v56 = vpack.c.bf16 %v7104_v22, %v7103_v50 }
 0x7be   :  { %v9258_v26 = vpop.eup %9257  ;;  %8614 = vmatpush3.msra.mxu1 %v5639_v28  ;;  %8615 = vmatprep.mubr.msk.f32.mxu1 %vm9883_vm1, %v9882_v20  ;;  %v5633_v17 = vmul.f32 %v9256_v30, %v5625_v33  ;;  %9261 = vrcp.f32 %v5579_v57  ;;  %vm5711_vm10 = vcmp.eq.s32.totalorder %v5703_v7, %v11205_v47 }
 0x7bf   :  { %8618 = vmatprep.subr.mxu1 %v9882_v20  ;;  %v5642_v59 = vadd.f32 %v9250_v27, %v5634_v45  ;;  %v5636_v49 = vmul.f32 %v9258_v26, %v5628_v11  ;;  %v7579_v3 = vsel %vm5711_vm10, 1.0, %v9882_v20  ;;  %v7106_v27 = vld [vmem:[#allocation34 + $0x18] sm:$0xff] }
 0x7c0   :  { %v5641_v14 = vadd.f32 %v9252_v53, %v5633_v17 }
 0x7c1   :  { %8616 = vmatmul.mubr.msk.f32.vlgmr.msra.gmra.mrb[90].mxu1 %vm688_vm2, %v7574_v35  ;;  %v5644_v60 = vadd.f32 %v9254_v61, %v5636_v49 }
 0x7c2   :  { %8624 = vmatpush3.msra.mxu0 %v5641_v14  ;;  %8619 = vmatpush3.msra.mxu1 %v5640_v24  ;;  %v7105_v24 = vld [vmem:[#allocation34 + $0x10] sm:$0xff] }
 0x7c3   :  { %8626 = vmatmul.mubr.msk.f32.vlgmr.msra.gmra.mrb[74].mxu0 %vm688_vm2, %v7576_v58  ;;  %8633 = vmatprep.subr.mxu0 %v9882_v20  ;;  %v8918_v61 = vpack.c.bf16 %v7106_v27, %v7105_v24 }
 0x7c4   :  { %8620 = vmatprep.mubr.msk.f32.mxu1 %vm9883_vm1, %v9882_v20  ;;  %8628 = vmatprep.subr.mxu1 %v9882_v20 }
 0x7c5   :  { %8621 = vmatmul.mubr.msk.f32.vlgmr.msra.gmra.mrb[92].mxu1 %vm688_vm2, %v7575_v31  ;;  %8635 = vmatprep.mubr.msk.f32.mxu0 %vm9883_vm1, %v9882_v20 }
 0x7c6   :  { %8629 = vmatpush3.msra.mxu1 %v5642_v59  ;;  %8630 = vmatprep.mubr.msk.f32.mxu1 %vm9883_vm1, %v9882_v20 }
 0x7c7   :  { %v9260_v15 = vpop.eup %9259  ;;  %8638 = vmatprep.subr.mxu1 %v9882_v20 }
 0x7c8   :  { %v5627_v40 = vsub.f32 %v10834_v4, %v9260_v15  ;;  %v9262_v0 = vpop.eup %9261  ;;  %v6544_v4 = vld [vmem:[#allocation28] sm:$0xff] }
 0x7c9   :  { %8631 = vmatmul.mubr.msk.f32.vlgmr.msra.gmra.mrb[94].mxu1 %vm688_vm2, %v7577_v36  ;;  %v8898_v47 = vpack.c.bf16 %v6545_v1, %v6544_v4 }
 0x7ca   :  { %v5635_v52 = vmul.f32 %v9262_v0, %v5627_v40  ;;  %8639 = vmatpush3.msra.mxu1 %v5644_v60  ;;  %8640 = vmatprep.mubr.msk.f32.mxu1 %vm9883_vm1, %v9882_v20 }
 0x7cb   :  { %8899 = vmatprep.subr.bf16.mxu1 %v8898_v47 }
 0x7cc   :  { %v5643_v6 = vadd.f32 %v9260_v15, %v5635_v52 }
 0x7cd   :  { %8641 = vmatmul.mubr.msk.f32.vlgmr.msra.gmra.mrb[96].mxu1 %vm688_vm2, %v7579_v3 }
 0x7ce   :  { %8634 = vmatpush3.msra.mxu0 %v5643_v6  ;;  %8901 = vmatpush3.bf16.msra.mxu1 %v8898_v47 }
 0x7cf   :  { %8636 = vmatmul.mubr.msk.f32.vlgmr.msra.gmra.mrb[76].mxu0 %vm688_vm2, %v7578_v41  ;;  %8903 = vmatprep.subr.bf16.mxu1 %v8902_v63  ;;  %vm6466_vm2 = vcmask 1045509  }
 0x7d0   :  { %8651 = vmatprep.mubr.msk.f32.mxu0 %vm9883_vm1, %v9882_v20  ;;  %8892 = vmatprep.subr.bf16.mxu0 %v9885_v43 }
 0x7d1   :  { %8894 = vmatpush3.bf16.msra.mxu0 %v8893_v51 }
 0x7d2   :  { %8905 = vmatpush3.bf16.msra.mxu1 %v8902_v63  ;;  %8895 = vmatprep.subr.bf16.mxu0 %v9885_v43 }
 0x7d3   :  { %8914 = vmatprep.subr.bf16.mxu1 %v9885_v43 }
 0x7d5   :  { %8897 = vmatpush3.bf16.msra.mxu0 %v8896_v48 }
 0x803   :  { %v6339_v8 = vpop.permute.xlu0 %6338 }
 0x804   :  { %v6325_v39 = vpop.permute.xlu1 %6324 }
 0x807   :  { %v6353_v49 = vpop.permute.xlu0 %6352 }
 0x808   :  { %v6332_v5 = vpop.permute.xlu1 %6331 }
 0x80c   :  { %v6346_v26 = vpop.permute.xlu1 %6345 }
 0x815   :  { %v6360_v1 = vpop.permute.xlu1 %6359 }
 0x819   :  { %v6374_v24 = vpop.permute.xlu1 %6373 }
 0x88c   :  { %v11329_v13 = vpop.f32.mrb[86].mxu1 }
 0x88d   :  { %v6375_v37 = vmul.f32 %v6325_v39, %v11329_v13  ;;  %7272 = vst.msk [vmem:[#allocation35] sm:$0xff] %vm447_vm0, %v11329_v13  ;;  %v8607_v16 = vpop.f32.mrb[87].mxu1  ;;  %8662 = vmatprep.mubr.msk.f32.mxu1 %vm447_vm0, %v11329_v13 }
 0x88f   :  { %v6383_v32 = vsel %vm447_vm0, %v6375_v37, 0.0 }
 0x890   :  { %v6384_v28 = vrot.slane %v6383_v32, 4  ;;  %v11337_v53 = vpop.f32.mrb[88].mxu1 }
 0x891   :  { %v6376_v57 = vmul.f32 %v6332_v5, %v11337_v53  ;;  %7273 = vst.msk [vmem:[#allocation35 + $0x8] sm:$0xff] %vm447_vm0, %v11337_v53  ;;  %v8612_v46 = vpop.f32.mrb[89].mxu1  ;;  %8663 = vmatmul.mubr.msk.f32.vlgmr.msra.gmra.mrb[98].mxu1 %vm447_vm0, %v11337_v53 }
 0x892   :  { %v6385_v55 = vadd.f32 %v6384_v28, %v6383_v32  ;;  %8916 = vmatpush3.bf16.msra.mxu1 %v8915_v56 }
 0x893   :  { %v6390_v33 = vsel %vm447_vm0, %v6376_v57, 0.0  ;;  %8917 = vmatprep.subr.bf16.mxu1 %v9885_v43 }
 0x894   :  { %v6386_v30 = vrot.slane %v6385_v55, 2  ;;  %v6391_v45 = vrot.slane %v6390_v33, 4  ;;  %v11346_v11 = vpop.f32.mrb[90].mxu1 }
 0x895   :  { %v6377_v35 = vmul.f32 %v6339_v8, %v11346_v11  ;;  %7274 = vst.msk [vmem:[#allocation35 + $0x10] sm:$0xff] %vm447_vm0, %v11346_v11  ;;  %v8617_v17 = vpop.f32.mrb[91].mxu1  ;;  %8665 = vmatprep.mubr.msk.f32.mxu1 %vm447_vm0, %v11346_v11 }
 0x896   :  { %v6387_v54 = vadd.f32 %v6386_v30, %v6385_v55  ;;  %v6392_v59 = vadd.f32 %v6391_v45, %v6390_v33  ;;  %v11353_v58 = vpop.f32.mrb[74].mxu0  ;;  %8919 = vmatpush3.bf16.msra.mxu1 %v8918_v61  ;;  %v6367_v61 = vpop.permute.xlu0 %6366 }
 0x897   :  { %v6397_v14 = vsel %vm447_vm0, %v6377_v35, 0.0  ;;  %v6379_v60 = vmul.f32 %v6353_v49, %v11353_v58  ;;  %7276 = vst.msk [vmem:[#allocation35 + $0x20] sm:$0xff] %vm447_vm0, %v11353_v58  ;;  %v8627_v31 = vpop.f32.mrb[75].mxu0 }
 0x898   :  { %v6393_v7 = vrot.slane %v6392_v59, 2  ;;  %v6398_v36 = vrot.slane %v6397_v14, 4  ;;  %v11359_v15 = vpop.f32.mrb[92].mxu1  ;;  %v6388_v40 = vrot.slane %v6387_v54, 1 }
 0x899   :  { %v6411_v0 = vsel %vm447_vm0, %v6379_v60, 0.0  ;;  %v6378_v52 = vmul.f32 %v6346_v26, %v11359_v15  ;;  %7275 = vst.msk [vmem:[#allocation35 + $0x18] sm:$0xff] %vm447_vm0, %v11359_v15  ;;  %v8622_v3 = vpop.f32.mrb[93].mxu1  ;;  %8666 = vmatmul.mubr.msk.f32.gmra.mrb[100].mxu1 %vm447_vm0, %v11359_v15 }
 0x89a   :  { %v6394_v41 = vadd.f32 %v6393_v7, %v6392_v59  ;;  %v6399_v6 = vadd.f32 %v6398_v36, %v6397_v14  ;;  %v6412_v4 = vrot.slane %v6411_v0, 4  ;;  %8668 = vmatprep.mubr.msk.f32.mxu1 %vm447_vm0, %v11353_v58  ;;  %v6389_v51 = vadd.f32 %v6388_v40, %v6387_v54 }
 0x89b   :  { %v6404_v47 = vsel %vm447_vm0, %v6378_v52, 0.0 }
 0x89c   :  { %v6395_v34 = vrot.slane %v6394_v41, 1  ;;  %v6400_v38 = vrot.slane %v6399_v6, 2  ;;  %v6413_v63 = vadd.f32 %v6412_v4, %v6411_v0  ;;  %v6405_v21 = vrot.slane %v6404_v47, 4  ;;  %v11370_v62 = vpop.f32.mrb[94].mxu1 }
 0x89d   :  { %v6380_v10 = vmul.f32 %v6360_v1, %v11370_v62  ;;  %7277 = vst.msk [vmem:[#allocation35 + $0x28] sm:$0xff] %vm447_vm0, %v11370_v62  ;;  %v8632_v44 = vpop.f32.mrb[95].mxu1  ;;  %8669 = vmatmul.mubr.msk.f32.gmra.mrb[102].mxu1 %vm447_vm0, %v11370_v62 }
 0x89e   :  { %v6396_v48 = vadd.f32 %v6395_v34, %v6394_v41  ;;  %v6401_v39 = vadd.f32 %v6400_v38, %v6399_v6  ;;  %v6414_v50 = vrot.slane %v6413_v63, 2  ;;  %v6406_v22 = vadd.f32 %v6405_v21, %v6404_v47 }
 0x89f   :  { %v6418_v37 = vsel %vm447_vm0, %v6380_v10, 0.0 }
 0x8a0   :  { %v6459_v16 = vsel %vm6458_vm12, %v6396_v48, %v6389_v51  ;;  %v6402_v5 = vrot.slane %v6401_v39, 1  ;;  %v6415_v56 = vadd.f32 %v6414_v50, %v6413_v63  ;;  %v6407_v32 = vrot.slane %v6406_v22, 2  ;;  %v11379_v27 = vpop.f32.mrb[96].mxu1  ;;  %v6830_v50 = vld [vmem:[#allocation31] sm:$0xff] }
 0x8a1   :  { %v6419_v8 = vrot.slane %v6418_v37, 4  ;;  %v6382_v28 = vmul.f32 %v6374_v24, %v11379_v27  ;;  %7279 = vst.msk [vmem:[#allocation35 + $0x38] sm:$0xff] %vm447_vm0, %v11379_v27  ;;  %v8642_v57 = vpop.f32.mrb[97].mxu1 }
 0x8a2   :  { %v6403_v46 = vadd.f32 %v6402_v5, %v6401_v39  ;;  %v6408_v55 = vadd.f32 %v6407_v32, %v6406_v22  ;;  %v11384_v33 = vpop.f32.mrb[76].mxu0  ;;  %v6416_v30 = vrot.slane %v6415_v56, 1  ;;  %v6831_v22 = vld [vmem:[#allocation31 + $0x8] sm:$0xff]  ;;  %v6833_v5 = vld [vmem:[#allocation31 + $0x18] sm:$0xff] }
 0x8a3   :  { %v6381_v45 = vmul.f32 %v6367_v61, %v11384_v33  ;;  %7278 = vst.msk [vmem:[#allocation35 + $0x30] sm:$0xff] %vm447_vm0, %v11384_v33  ;;  %v6420_v26 = vadd.f32 %v6419_v8, %v6418_v37  ;;  %v6432_v35 = vsel %vm447_vm0, %v6382_v28, 0.0  ;;  %8671 = vmatprep.mubr.msk.f32.mxu1 %vm447_vm0, %v11384_v33  ;;  %v8637_v17 = vpop.f32.mrb[77].mxu0  ;;  %v6832_v37 = vld [vmem:[#allocation31 + $0x10] sm:$0xff]  ;;  %v6970_v32 = vld [vmem:[#allocation10] sm:$0xff] }
 0x8a4   :  { %v6409_v54 = vrot.slane %v6408_v55, 1  ;;  %v6433_v59 = vrot.slane %v6432_v35, 4  ;;  %8672 = vmatmul.mubr.msk.f32.gmra.mrb[104].mxu1 %vm447_vm0, %v11379_v27  ;;  %v6461_v49 = vsel %vm6460_vm13, %v6403_v46, %v6459_v16  ;;  %v6417_v40 = vadd.f32 %v6416_v30, %v6415_v56 }
 0x8a5   :  { %v6425_v14 = vsel %vm447_vm0, %v6381_v45, 0.0  ;;  %v6421_v60 = vrot.slane %v6420_v26, 2  ;;  %8702 = vmatprep.mubr.msk.f32.mxu1 %vm9883_vm1, %v9882_v20  ;;  %v8906_v16 = vpack.c.bf16 %v6831_v22, %v6830_v50  ;;  %v8910_v56 = vpack.c.bf16 %v6833_v5, %v6832_v37 }
 0x8a6   :  { %v6410_v31 = vadd.f32 %v6409_v54, %v6408_v55  ;;  %v6426_v7 = vrot.slane %v6425_v14, 4  ;;  %v6434_v36 = vadd.f32 %v6433_v59, %v6432_v35  ;;  %v6989_v24 = vrot.slane %v6970_v32, %v10929_v25 }
 0x8a7   :  { %v6422_v0 = vadd.f32 %v6421_v60, %v6420_v26  ;;  %8907 = vmatprep.subr.bf16.mxu0 %v8906_v16  ;;  %v6982_v8 = vrot.slane %v6970_v32, %v10926_v9  ;;  %v7003_v28 = vrot.slane %v6970_v32, %v10935_v29  ;;  %v6996_v57 = vrot.slane %v6970_v32, %v10932_v12 }
 0x8a8   :  { %v6427_v52 = vadd.f32 %v6426_v7, %v6425_v14  ;;  %v6435_v3 = vrot.slane %v6434_v36, 2  ;;  %v6463_v41 = vsel %vm6462_vm14, %v6410_v31, %v6461_v49  ;;  %6991 = vbcast.lane.b32.xlu1 %v6989_v24, 256  ;;  %v7017_v46 = vrot.slane %v6970_v32, %v10945_v2 }
 0x8a9   :  { %v6423_v6 = vrot.slane %v6422_v0, 1  ;;  %v6465_v4 = vsel %vm6464_vm15, %v6417_v40, %v6463_v41  ;;  %6984 = vbcast.lane.b32.xlu0 %v6982_v8, 256  ;;  %v7010_v55 = vrot.slane %v6970_v32, %v10941_v19  ;;  %v7031_v61 = vrot.slane %v6970_v32, %v10953_v42  ;;  %v7589_v19 = vld [vmem:[#allocation26] ss:$0 sm:$0xff] }
 0x8aa   :  { %v6428_v1 = vrot.slane %v6427_v52, 2  ;;  %v6436_v47 = vadd.f32 %v6435_v3, %v6434_v36  ;;  %v7024_v25 = vrot.slane %v6970_v32, %v10949_v18  ;;  %v9886_v59 = vmov 1966171168   ;;  %v7591_v36 = vld [vmem:[#allocation29] ss:$0 sm:$0xff] }
 0x8ab   :  { %v6424_v34 = vadd.f32 %v6423_v6, %v6422_v0  ;;  %v6687_v2 = vunpack.c.l.s4 %v9886_v59 }
 0x8ac   :  { %v6429_v38 = vadd.f32 %v6428_v1, %v6427_v52  ;;  %v6437_v63 = vrot.slane %v6436_v47, 1  ;;  %7005 = vbcast.lane.b32.xlu1 %v7003_v28, 256 }
 0x8ad   :  { %v6467_v21 = vsel %vm6466_vm2, %v6424_v34, %v6465_v4  ;;  %6998 = vbcast.lane.b32.xlu0 %v6996_v57, 256  ;;  %v6688_v49 = vunpack.c.0.s8 %v6687_v2 }
 0x8ae   :  { %v6430_v51 = vrot.slane %v6429_v38, 1  ;;  %v6438_v10 = vadd.f32 %v6437_v63, %v6436_v47 }
 0x8af   :  { %v6691_v14 = vsub.s32 %v6688_v49, %v10923_v23 }
 0x8b0   :  { %v6431_v44 = vadd.f32 %v6430_v51, %v6429_v38  ;;  %7019 = vbcast.lane.b32.xlu1 %v7017_v46, 256 }
 0x8b1   :  { %7012 = vbcast.lane.b32.xlu0 %v7010_v55, 256 }
 0x8b2   :  { %v6469_v48 = vsel %vm6468_vm3, %v6431_v44, %v6467_v21 }
 0x8b3   :  { %v6471_v39 = vsel %vm6470_vm4, %v6438_v10, %v6469_v48 }
 0x8b4   :  { %8652 = vmatmul.mubr.msk.f32.vlgmr.msra.gmra.mrb[78].mxu0 %vm447_vm0, %v6471_v39  ;;  %8703 = vmatmul.mubr.msk.f32.vlgmr.msra.gmra.mrb[106].mxu1 %vm447_vm0, %v6471_v39 }
 0x8b5   :  { %8909 = vmatpush3.bf16.msra.mxu0 %v8906_v16  ;;  %7033 = vbcast.lane.b32.xlu1 %v7031_v61, 256 }
 0x8b6   :  { %8911 = vmatprep.subr.bf16.mxu0 %v8910_v56  ;;  %7026 = vbcast.lane.b32.xlu0 %v7024_v25, 256 }
 0x8b9   :  { %8913 = vmatpush3.bf16.msra.mxu0 %v8910_v56 }
 0x8ba   :  { %8920 = vmatprep.subr.bf16.mxu0 %v9885_v43 }
 0x964   :  { %v8664_v30 = vpop.f32.mrb[98].mxu1 }
 0x965   :  { %v6645_v45 = vpop.f32.mrb[99].mxu1  ;;  %v6651_v6 = vadd.f32 %v8664_v30, %v7591_v36 }
 0x966   :  { %v6646_v4 = vadd.f32 %v7591_v36, %v6645_v45 }
 0x96c   :  { %v8667_v26 = vpop.f32.mrb[100].mxu1 }
 0x96d   :  { %v6655_v29 = vpop.f32.mrb[101].mxu1  ;;  %v6661_v1 = vadd.f32 %v8667_v26, %v7591_v36 }
 0x96e   :  { %v6656_v47 = vadd.f32 %v7591_v36, %v6655_v29 }
 0x970   :  { %v8670_v35 = vpop.f32.mrb[102].mxu1 }
 0x971   :  { %v6665_v12 = vpop.f32.mrb[103].mxu1  ;;  %v6671_v21 = vadd.f32 %v8670_v35, %v7591_v36 }
 0x972   :  { %v6666_v51 = vadd.f32 %v7591_v36, %v6665_v12 }
 0x977   :  { %v8673_v17 = vpop.f32.mrb[104].mxu1 }
 0x978   :  { %v6675_v54 = vpop.f32.mrb[105].mxu1  ;;  %v6681_v10 = vadd.f32 %v8673_v17, %v7591_v36 }
 0x979   :  { %v6676_v37 = vadd.f32 %v7591_v36, %v6675_v54 }
 0x987   :  { %v6540_v60 = vpop.f32.mrb[78].mxu0  ;;  %v11415_v42 = vpop.f32.mrb[106].mxu1 }
 0x988   :  { %v6541_v18 = vadd.f32 %v7589_v19, %v6540_v60  ;;  %v8653_v31 = vpop.f32.mrb[79].mxu0  ;;  %v8704_v7 = vpop.f32.mrb[107].mxu1 }
 0x98a   :  { %v6685_v40 = vcombine.high %v6541_v18, %v6541_v18  ;;  %v6692_v0 = vrot.slane %v6541_v18, %v6691_v14 }
 0x98c   :  { %v6699_v52 = vrot.slane %v6685_v40, %v6691_v14  ;;  %v6700_v3 = vcombine.high %v6692_v0, %v6692_v0  ;;  %v6708_v41 = vrot.slane %v6692_v0, %v6691_v14 }
 0x98e   :  { %v6701_v34 = vcombine.high %v6699_v52, %v6699_v52  ;;  %v6715_v38 = vrot.slane %v6699_v52, %v6691_v14  ;;  %v6722_v63 = vrot.slane %v6700_v3, %v6691_v14  ;;  %v6730_v23 = vcombine.high %v6708_v41, %v6708_v41 }
 0x98f   :  { %v6737_v44 = vrot.slane %v6708_v41, %v10926_v9 }
 0x990   :  { %v6729_v48 = vrot.slane %v6701_v34, %v6691_v14  ;;  %v6731_v39 = vcombine.high %v6715_v38, %v6715_v38  ;;  %v6732_v50 = vcombine.high %v6722_v63, %v6722_v63  ;;  %v6741_v22 = vrot.slane %v6722_v63, %v10926_v9 }
 0x991   :  { %v6745_v16 = vrot.slane %v6730_v23, %v10926_v9  ;;  %v6753_v5 = vrot.slane %v6715_v38, %v10926_v9  ;;  %v6774_v56 = vadd.f32 %v6737_v44, %v6646_v4  ;;  %v7099_v44 = vld [vmem:[%s11527_s23] sm:$0xff] }
 0x992   :  { %v6733_v32 = vcombine.high %v6729_v48, %v6729_v48  ;;  %v6749_v24 = vrot.slane %v6732_v50, %v10926_v9  ;;  %v6757_v8 = vrot.slane %v6729_v48, %v10926_v9  ;;  %v6761_v28 = vrot.slane %v6731_v39, %v10926_v9  ;;  %v7100_v48 = vld [vmem:[%s11527_s23 + $0x8] sm:$0xff]  ;;  %v7101_v39 = vld [vmem:[%s11527_s23 + $0x10] sm:$0xff] }
 0x993   :  { %v6775_v57 = vadd.f32 %v6741_v22, %v6651_v6  ;;  %v6776_v46 = vadd.f32 %v6745_v16, %v6656_v47  ;;  %v6778_v55 = vadd.f32 %v6753_v5, %v6666_v51  ;;  %v7600_v61 = vmul.f32 -1.442695, %v6774_v56  ;;  %v7102_v22 = vld [vmem:[%s11527_s23 + $0x18] sm:$0xff]  ;;  %v7608_v16 = vld [vmem:[#allocation32] ss:$0 sm:$0xff]  ;;  %v6985_v5 = vpop.permute.xlu0 %6984  ;;  %s9887_s23 = smov [#allocation35]  }
 0x994   :  { %v6765_v25 = vrot.slane %v6733_v32, %v10926_v9  ;;  %v6777_v30 = vadd.f32 %v6749_v24, %v6661_v1  ;;  %v6779_v45 = vadd.f32 %v6757_v8, %v6671_v21  ;;  %v6780_v26 = vadd.f32 %v6761_v28, %v6676_v37  ;;  %s7286_s24 = sshll.u32 %s9887_s23, 4  ;;  %s7287_s24 = int_to_ptr.vmem [resolvable:$true] %s7286_s24 }
 0x995   :  { %9263 = vpow2.f32 %v7600_v61  ;;  %v7601_v29 = vmul.f32 -1.442695, %v6775_v57  ;;  %v7602_v35 = vmul.f32 -1.442695, %v6776_v46  ;;  %v7604_v54 = vmul.f32 -1.442695, %v6778_v55  ;;  %p9792_p1 = scmp.lt.s32.totalorder %s7287_s24, %s7287_s24 }
 0x996   :  { %v6781_v12 = vadd.f32 %v6765_v25, %v6681_v10  ;;  %v7603_v17 = vmul.f32 -1.442695, %v6777_v30  ;;  %v7605_v59 = vmul.f32 -1.442695, %v6779_v45  ;;  %v7606_v2 = vmul.f32 -1.442695, %v6780_v26 }
 0x997   :  { %9265 = vpow2.f32 %v7601_v29  ;;  %v8921_v50 = vpack.c.bf16 %v7100_v48, %v7099_v44  ;;  %v8924_v37 = vpack.c.bf16 %v7102_v22, %v7101_v39  ;;  %v6999_v45 = vpop.permute.xlu0 %6998  ;;  %s9787_s16 = scalar_lea.vmem %s7287_s24, 1024 }
 0x998   :  { %9267 = vpow2.f32 %v7602_v35  ;;  %v7607_v49 = vmul.f32 -1.442695, %v6781_v12  ;;  %p9788_p0 = scmp.ne.s32.totalorder %s7287_s24, %s9787_s16  ;;  %p9793_p2 = scmp.lt.s32.totalorder %s9787_s16, %s9787_s16 }
 0x999   :  { %9269 = vpow2.f32 %v7603_v17 }
 0x99a   :  { %9271 = vpow2.f32 %v7604_v54  ;;  %p9794_p3 = por %p9793_p2, %p9792_p1 }
 0x99b   :  { %9273 = vpow2.f32 %v7605_v59 }
 0x99c   :  { %9275 = vpow2.f32 %v7606_v2  ;;  %p9795_p4 = pnand %p9794_p3, %p9788_p0 }
 0x99d   :  { %9277 = vpow2.f32 %v7607_v49 }
 0x99f   :  { %v9264_v19 = vpop.eup %9263 }
 0x9a0   :  { %v6806_v9 = vadd.f32 1.0, %v9264_v19 }
 0x9a1   :  { %v9266_v14 = vpop.eup %9265 }
 0x9a2   :  { %v9268_v60 = vpop.eup %9267  ;;  %v6807_v18 = vadd.f32 1.0, %v9266_v14  ;;  %9279 = vrcp.f32 %v6806_v9 }
 0x9a3   :  { %v9270_v31 = vpop.eup %9269  ;;  %v6808_v7 = vadd.f32 1.0, %v9268_v60 }
 0x9a4   :  { %v9272_v36 = vpop.eup %9271  ;;  %v6809_v40 = vadd.f32 1.0, %v9270_v31  ;;  %9281 = vrcp.f32 %v6807_v18 }
 0x9a5   :  { %v9274_v0 = vpop.eup %9273  ;;  %v6810_v52 = vadd.f32 1.0, %v9272_v36  ;;  %9283 = vrcp.f32 %v6808_v7 }
 0x9a6   :  { %v9276_v3 = vpop.eup %9275  ;;  %v6811_v41 = vadd.f32 1.0, %v9274_v0  ;;  %9285 = vrcp.f32 %v6809_v40 }
 0x9a7   :  { %v9278_v6 = vpop.eup %9277  ;;  %v6812_v4 = vadd.f32 1.0, %v9276_v3  ;;  %9287 = vrcp.f32 %v6810_v52 }
 0x9a8   :  { %v6813_v47 = vadd.f32 1.0, %v9278_v6  ;;  %9289 = vrcp.f32 %v6811_v41 }
 0x9a9   :  { %9291 = vrcp.f32 %v6812_v4 }
 0x9aa   :  { %9293 = vrcp.f32 %v6813_v47 }
 0x9ac   :  { %v9280_v1 = vpop.eup %9279 }
 0x9ad   :  { %8682 = vmatprep.mubr.msk.f32.mxu0 %vm447_vm0, %v9280_v1 }
 0x9ae   :  { %v9282_v34 = vpop.eup %9281 }
 0x9af   :  { %v9284_v38 = vpop.eup %9283  ;;  %8683 = vmatmul.mubr.msk.f32.vlgmr.msra.gmra.mrb[80].mxu0 %vm447_vm0, %v9282_v34 }
 0x9b0   :  { %8685 = vmatprep.mubr.msk.f32.mxu0 %vm447_vm0, %v9284_v38  ;;  %v9286_v63 = vpop.eup %9285  ;;  %8922 = vmatpush3.bf16.msra.mxu0 %v8921_v50 }
 0x9b1   :  { %v9288_v23 = vpop.eup %9287  ;;  %8923 = vmatprep.subr.bf16.mxu0 %v9885_v43 }
 0x9b2   :  { %v9290_v21 = vpop.eup %9289 }
 0x9b3   :  { %8686 = vmatmul.mubr.msk.f32.gmra.mrb[82].mxu0 %vm447_vm0, %v9286_v63  ;;  %v9292_v51 = vpop.eup %9291 }
 0x9b4   :  { %8688 = vmatprep.mubr.msk.f32.mxu0 %vm447_vm0, %v9288_v23  ;;  %v9294_v10 = vpop.eup %9293  ;;  %8925 = vmatpush3.bf16.msra.mxu0 %v8924_v37 }
 0x9b7   :  { %8689 = vmatmul.mubr.msk.f32.gmra.mrb[84].mxu0 %vm447_vm0, %v9290_v21 }
 0x9b8   :  { %8691 = vmatprep.mubr.msk.f32.mxu0 %vm447_vm0, %v9292_v51 }
 0x9bb   :  { %8692 = vmatmul.mubr.msk.f32.gmra.mrb[86].mxu0 %vm447_vm0, %v9294_v10 }
 0x9bc   :  { %8713 = vmatprep.mubr.msk.f32.mxu0 %vm9883_vm1, %v9882_v20  ;;  %v6992_v20 = vpop.permute.xlu1 %6991 }
 0x9c0   :  { %v7006_v28 = vpop.permute.xlu1 %7005 }
 0xa82   :  { %v8684_v56 = vpop.f32.mrb[80].mxu0 }
 0xa83   :  { %v6937_v32 = vadd.f32 %v8684_v56, %v7608_v16  ;;  %v6931_v24 = vpop.f32.mrb[81].mxu0 }
 0xa84   :  { %v6932_v8 = vadd.f32 %v7608_v16, %v6931_v24 }
 0xa85   :  { %v6972_v57 = vmul.f32 %v6937_v32, %v11337_v53  ;;  %v7020_v53 = vpop.permute.xlu1 %7019 }
 0xa86   :  { %v8687_v46 = vpop.f32.mrb[82].mxu0  ;;  %v6971_v55 = vmul.f32 %v6932_v8, %v11329_v13 }
 0xa87   :  { %v7036_v61 = vmul.f32 %v6992_v20, %v6972_v57  ;;  %v6947_v25 = vadd.f32 %v8687_v46, %v7608_v16  ;;  %v6941_v30 = vpop.f32.mrb[83].mxu0 }
 0xa88   :  { %v7035_v26 = vmul.f32 %v6985_v5, %v6971_v55  ;;  %v6942_v43 = vadd.f32 %v7608_v16, %v6941_v30 }
 0xa89   :  { %v7050_v29 = vsel %vm447_vm0, %v7036_v61, 0.0  ;;  %v6974_v35 = vmul.f32 %v6947_v25, %v11359_v15  ;;  %v7013_v15 = vpop.permute.xlu0 %7012  ;;  %v7034_v23 = vpop.permute.xlu1 %7033 }
 0xa8a   :  { %v7051_v12 = vrot.slane %v7050_v29, 4  ;;  %v7043_v17 = vsel %vm447_vm0, %v7035_v26, 0.0  ;;  %v8690_v54 = vpop.f32.mrb[84].mxu0  ;;  %v6973_v59 = vmul.f32 %v6942_v43, %v11346_v11 }
 0xa8b   :  { %v7044_v2 = vrot.slane %v7043_v17, 4  ;;  %v7038_v49 = vmul.f32 %v7006_v28, %v6974_v35  ;;  %v6957_v13 = vadd.f32 %v8690_v54, %v7608_v16  ;;  %v6951_v19 = vpop.f32.mrb[85].mxu0 }
 0xa8c   :  { %v7052_v9 = vadd.f32 %v7051_v12, %v7050_v29  ;;  %v7037_v14 = vmul.f32 %v6999_v45, %v6973_v59  ;;  %v6952_v60 = vadd.f32 %v7608_v16, %v6951_v19 }
 0xa8d   :  { %v7045_v18 = vadd.f32 %v7044_v2, %v7043_v17  ;;  %v7064_v31 = vsel %vm447_vm0, %v7038_v49, 0.0  ;;  %v6976_v7 = vmul.f32 %v6957_v13, %v11370_v62  ;;  %v7027_v5 = vpop.permute.xlu0 %7026 }
 0xa8e   :  { %v7053_v36 = vrot.slane %v7052_v9, 2  ;;  %v7065_v40 = vrot.slane %v7064_v31, 4  ;;  %v7057_v0 = vsel %vm447_vm0, %v7037_v14, 0.0  ;;  %v8693_v52 = vpop.f32.mrb[86].mxu0  ;;  %v6975_v11 = vmul.f32 %v6952_v60, %v11353_v58 }
 0xa8f   :  { %v7046_v3 = vrot.slane %v7045_v18, 2  ;;  %v7058_v41 = vrot.slane %v7057_v0, 4  ;;  %v7040_v6 = vmul.f32 %v7020_v53, %v6976_v7  ;;  %v6967_v4 = vadd.f32 %v8693_v52, %v7608_v16  ;;  %v6961_v1 = vpop.f32.mrb[87].mxu0 }
 0xa90   :  { %v7054_v47 = vadd.f32 %v7053_v36, %v7052_v9  ;;  %v7066_v34 = vadd.f32 %v7065_v40, %v7064_v31  ;;  %v7039_v38 = vmul.f32 %v7013_v15, %v6975_v11  ;;  %v6962_v63 = vadd.f32 %v7608_v16, %v6961_v1 }
 0xa91   :  { %v7047_v21 = vadd.f32 %v7046_v3, %v7045_v18  ;;  %v7059_v62 = vadd.f32 %v7058_v41, %v7057_v0  ;;  %v7078_v51 = vsel %vm447_vm0, %v7040_v6, 0.0  ;;  %v6978_v10 = vmul.f32 %v6967_v4, %v11379_v27 }
 0xa92   :  { %v7055_v44 = vrot.slane %v7054_v47, 1  ;;  %v7067_v48 = vrot.slane %v7066_v34, 2  ;;  %v7079_v39 = vrot.slane %v7078_v51, 4  ;;  %v7071_v58 = vsel %vm447_vm0, %v7039_v38, 0.0 }
 0xa93   :  { %v7048_v50 = vrot.slane %v7047_v21, 1  ;;  %v7060_v22 = vrot.slane %v7059_v62, 2  ;;  %v7072_v37 = vrot.slane %v7071_v58, 4  ;;  %v7042_v20 = vmul.f32 %v7034_v23, %v6978_v10 }
 0xa94   :  { %v7056_v56 = vadd.f32 %v7055_v44, %v7054_v47  ;;  %v7068_v32 = vadd.f32 %v7067_v48, %v7066_v34  ;;  %v7080_v16 = vadd.f32 %v7079_v39, %v7078_v51  ;;  %v6977_v24 = vmul.f32 %v6962_v63, %v11384_v33 }
 0xa95   :  { %v7049_v8 = vadd.f32 %v7048_v50, %v7047_v21  ;;  %v7061_v28 = vadd.f32 %v7060_v22, %v7059_v62  ;;  %v7073_v57 = vadd.f32 %v7072_v37, %v7071_v58  ;;  %v7092_v27 = vsel %vm447_vm0, %v7042_v20, 0.0 }
 0xa96   :  { %v7069_v46 = vrot.slane %v7068_v32, 1  ;;  %v7081_v55 = vrot.slane %v7080_v16, 2  ;;  %v7093_v61 = vrot.slane %v7092_v27, 4  ;;  %v7041_v25 = vmul.f32 %v7027_v5, %v6977_v24 }
 0xa97   :  { %v7185_v30 = vsel %vm6458_vm12, %v7056_v56, %v7049_v8  ;;  %v7062_v45 = vrot.slane %v7061_v28, 1  ;;  %v7074_v26 = vrot.slane %v7073_v57, 2 }
 0xa98   :  { %v7082_v43 = vadd.f32 %v7081_v55, %v7080_v16  ;;  %v7094_v29 = vadd.f32 %v7093_v61, %v7092_v27  ;;  %v7085_v35 = vsel %vm447_vm0, %v7041_v25, 0.0  ;;  %v7070_v54 = vadd.f32 %v7069_v46, %v7068_v32 }
 0xa99   :  { %v7063_v12 = vadd.f32 %v7062_v45, %v7061_v28  ;;  %v7075_v17 = vadd.f32 %v7074_v26, %v7073_v57  ;;  %v7086_v33 = vrot.slane %v7085_v35, 4 }
 0xa9a   :  { %v7083_v59 = vrot.slane %v7082_v43, 1  ;;  %v7095_v53 = vrot.slane %v7094_v29, 2 }
 0xa9b   :  { %v7186_v2 = vsel %vm6460_vm13, %v7063_v12, %v7185_v30  ;;  %v7076_v49 = vrot.slane %v7075_v17, 1  ;;  %v7087_v13 = vadd.f32 %v7086_v33, %v7085_v35 }
 0xa9c   :  { %v7187_v19 = vsel %vm6462_vm14, %v7070_v54, %v7186_v2  ;;  %v7096_v9 = vadd.f32 %v7095_v53, %v7094_v29  ;;  %v7084_v18 = vadd.f32 %v7083_v59, %v7082_v43 }
 0xa9d   :  { %v7077_v14 = vadd.f32 %v7076_v49, %v7075_v17  ;;  %v7088_v60 = vrot.slane %v7087_v13, 2 }
 0xa9e   :  { %v7097_v15 = vrot.slane %v7096_v9, 1 }
 0xa9f   :  { %v7188_v31 = vsel %vm6464_vm15, %v7077_v14, %v7187_v19  ;;  %v7089_v7 = vadd.f32 %v7088_v60, %v7087_v13 }
 0xaa0   :  { %v7189_v36 = vsel %vm6466_vm2, %v7084_v18, %v7188_v31  ;;  %v7098_v52 = vadd.f32 %v7097_v15, %v7096_v9 }
 0xaa1   :  { %v7090_v40 = vrot.slane %v7089_v7, 1 }
 0xaa3   :  { %v7091_v0 = vadd.f32 %v7090_v40, %v7089_v7 }
 0xaa5   :  { %v7190_v11 = vsel %vm6468_vm3, %v7091_v0, %v7189_v36 }
 0xaa6   :  { %v7191_v3 = vsel %vm6470_vm4, %v7098_v52, %v7190_v11 }
 0xaa7   :  { %8714 = vmatmul.mubr.msk.f32.vlgmr.msra.gmra.mrb[88].mxu0 %vm447_vm0, %v7191_v3 }
 0xaa8   :  { %9798 = shalt.err (!%p9795_p4)
}
 0xaa9   :  { %s11578_s22 = sld [smem:[#allocation64_spill]] }
 0xaaf   :  { %s9799_s25 = scalar_lea.hbm %s11578_s22, 1024 }
 0xab0   :  { %p9800_p5 = scmp.ne.s32.totalorder %s11578_s22, %s9799_s25  ;;  %p9803_p6 = scmp.lt.u32.totalorder %s9799_s25, %s11578_s22 }
 0xab2   :  { %p9805_p7 = pnand %p9803_p6, %p9800_p5 }
 0xab4   :  { %9808 = shalt.err (!%p9805_p7)
}
 0xab5   :  { %7292 = dma.vmem_to_hbm [thread:$0]  %s7287_s24, 1024, %s11578_s22, [#allocation4], %s11568_s4, %s11568_s4, %s11567_s0  }
 0xab6   :  { %s11579_s19 = sld [smem:[#allocation63_spill]]  ;;  %s9888_s11 = smov [#allocation36]  }
 0xab7   :  { %s7299_s6 = sshll.u32 %s9888_s11, 4  ;;  %s7300_s6 = int_to_ptr.vmem [resolvable:$true] %s7299_s6 }
 0xab8   :  { %s9809_s10 = scalar_lea.vmem %s7300_s6, 128  ;;  %p9814_p9 = scmp.lt.s32.totalorder %s7300_s6, %s7300_s6 }
 0xab9   :  { %p9810_p8 = scmp.ne.s32.totalorder %s7300_s6, %s9809_s10  ;;  %p9815_p10 = scmp.lt.s32.totalorder %s9809_s10, %s9809_s10 }
 0xabb   :  { %p9816_p11 = por %p9815_p10, %p9814_p9 }
 0xabc   :  { %v7619_v6 = vld [vmem:[%s11579_s19] ss:$0 sm:$0xff] }
 0xabd   :  { %p9817_p12 = pnand %p9816_p11, %p9810_p8 }
 0xb7a   :  { %v7260_v41 = vpop.f32.mrb[88].mxu0 }
 0xb7b   :  { %v7261_v4 = vadd.f32 %v7260_v41, %v11415_v42  ;;  %v8715_v1 = vpop.f32.mrb[89].mxu0 }
 0xb7d   :  { %v7271_v47 = vadd.f32 %v7619_v6, %v7261_v4 }
 0xb7f   :  { %7280 = vst.msk [vmem:[#allocation36] sm:$0xff] %vm447_vm0, %v7271_v47 }
 0xb80   :  { %9820 = shalt.err (!%p9817_p12)
}
 0xb81   :  { %s11580_s30 = sld [smem:[#allocation65_spill]] }
 0xb87   :  { %s9821_s8 = scalar_lea.hbm %s11580_s30, 128 }
 0xb88   :  { %p9822_p13 = scmp.ne.s32.totalorder %s11580_s30, %s9821_s8  ;;  %p9825_p0 = scmp.lt.u32.totalorder %s9821_s8, %s11580_s30 }
 0xb8a   :  { %p9827_p1 = pnand %p9825_p0, %p9822_p13 }
 0xb8c   :  { %9830 = shalt.err (!%p9827_p1)
}
 0xb8d   :  { %7302 = dma.vmem_to_hbm [thread:$0]  %s7300_s6, 128, %s11580_s30, [#allocation37]  }
 0xb8e   :  { %9853 = dma.done.wait [#allocation4], 1024  }
 0xb8f   :  { %9854 = vsyncadd [#allocation4], 4294966272 }
 0xb90   :  { %9855 = dma.done.wait [#allocation37], 128  }
 0xb91   :  { %9856 = vsyncadd [#allocation37], 4294967168 }
 0xb92   :  { %7309 = vsyncpa [#allocation3], 1 }
 0xb93   :  { %7310 = vsyncpa [#allocation6], 1 }
 0xb94   :  { %7311 = vsyncpa [#allocation9], 1 }
 0xb95   :  { %7312 = vsyncpa [#allocation12], 1 }
 0xb96   :  { %7313 = vsyncpa [#allocation15], 1 }
 0xb97   :  { %7314 = vsyncpa [#allocation18], 1 }
 0xb98   :  { %7315 = vsyncpa [#allocation21], 1 }
 0xb99   :  { %7316 = vsyncpa [#allocation24], 1 }
 0xb9a   :  { %7317 = vsyncpa [#allocation27], 1 }
 0xb9b   :  { %7318 = vsyncpa [#allocation30], 1 }
 0xb9c   :  { %7319 = vsyncpa [#allocation33], 1 }
 0xb9d   :  { %7320 = vsyncpa [#allocation4], 1 }
 0xb9e   :  { %7321 = vsyncpa [#allocation37], 1 }

</bundles_post_ra>
